<compile_context>
chip_gen: v7x
topology: tpu7x:2x2x1
jax: 0.10.0
libtpu: 0.0.40
codegen_flags: <defaults>
</compile_context>

<pallas_src>
import jax
import jax.numpy as jnp
from jax import lax
from jax.experimental import pallas as pl
from jax.experimental.pallas import tpu as pltpu

D = 512                                   # feature dim fixed by the module
NUM_RES_BLOCKS = 3
NUM_LINEARS = 1 + 2 * NUM_RES_BLOCKS + 1  # dense + 3*(2 per ResBlock) + final = 8
BN_EPS = 1e-5


def adversarial_mapper_kernel(x_ref, w_ref, b_ref, gamma_ref, beta_ref, o_ref):
    """Fully fused forward pass; all operands VMEM-resident.

    x_ref:     (B, D)       f32  VMEM
    w_ref:     (8, D, D)    bf16 VMEM (single bulk DMA by Pallas)
    b_ref:     (8, D)       f32  VMEM
    gamma_ref: (1, D)       f32  VMEM  (BatchNorm weight)
    beta_ref:  (1, D)       f32  VMEM  (BatchNorm bias)
    o_ref:     (B, D)       f32  VMEM
    """

    def linear(h, layer):
        # bf16 operands on the MXU, f32 accumulation; bias add in f32.
        y = jnp.dot(h.astype(jnp.bfloat16), w_ref[layer],
                    preferred_element_type=jnp.float32)
        return y + b_ref[pl.ds(layer, 1), :]        # (1, D) sublane-broadcast bias

    x = x_ref[...]
    out = linear(x, 0)                              # self.dense

    # 3 ResBlocks: ReLU -> Linear -> ReLU -> Linear, plus residual add (f32).
    for r in range(NUM_RES_BLOCKS):
        res = out
        h = jnp.maximum(out, 0.0)
        h = linear(h, 1 + 2 * r)
        h = jnp.maximum(h, 0.0)
        h = linear(h, 2 + 2 * r)
        out = h + res

    # BatchNorm1d in training mode: per-feature batch stats (biased var), f32.
    mean = jnp.mean(out, axis=0, keepdims=True)
    diff = out - mean
    var = jnp.mean(diff * diff, axis=0, keepdims=True)
    out = diff * lax.rsqrt(var + BN_EPS)
    out = out * gamma_ref[...] + beta_ref[...]

    # final ReLU + Linear
    out = jnp.maximum(out, 0.0)
    out = linear(out, NUM_LINEARS - 1)

    o_ref[...] = out


def adversarial_mapper(x, w_stack_bf16, b_stack, gamma, beta):
    B, d = x.shape
    assert d == D
    assert w_stack_bf16.dtype == jnp.bfloat16
    assert b_stack.shape == (NUM_LINEARS, D)

    w_bytes = NUM_LINEARS * D * D * 2                    # bf16 weights (4 MiB)
    act_bytes = 2 * B * D * 4                            # x in + out
    misc_bytes = NUM_LINEARS * D * 4 + 2 * D * 4         # biases + gamma/beta
    cost = pl.CostEstimate(
        flops=2 * NUM_LINEARS * B * D * D,
        transcendentals=D,                               # rsqrt in BatchNorm
        bytes_accessed=w_bytes + act_bytes + misc_bytes,
    )

    vmem = pl.BlockSpec(memory_space=pltpu.MemorySpace.VMEM)
    return pl.pallas_call(
        adversarial_mapper_kernel,
        out_shape=jax.ShapeDtypeStruct((B, D), jnp.float32),
        in_specs=[
            vmem,   # x            (B, D)      f32
            vmem,   # w_stack      (8, D, D)   bf16 -- one bulk HBM->VMEM copy
            vmem,   # b_stack      (8, D)      f32
            vmem,   # gamma        (1, D)      f32
            vmem,   # beta         (1, D)      f32
        ],
        out_specs=vmem,
        compiler_params=pltpu.CompilerParams(vmem_limit_bytes=32 << 20),
        cost_estimate=cost,
    )(x, w_stack_bf16, b_stack, gamma, beta)


def init_params(key):
    """PyTorch-nn.Linear-style init (U[-1/sqrt(fan_in), +...]); weights bf16."""
    bound = 1.0 / jnp.sqrt(jnp.float32(D))
    kw, kb = jax.random.split(key)
    # Generated directly in (in, out) layout (distribution is symmetric).
    w_stack = jax.random.uniform(
        kw, (NUM_LINEARS, D, D), jnp.float32, minval=-bound, maxval=bound)
    w_stack_bf16 = w_stack.astype(jnp.bfloat16)          # parameter dtype = bf16
    b_stack = jax.random.uniform(
        kb, (NUM_LINEARS, D), jnp.float32, minval=-bound, maxval=bound)
    gamma = jnp.ones((1, D), jnp.float32)                # BatchNorm1d weight init
    beta = jnp.zeros((1, D), jnp.float32)                # BatchNorm1d bias init
    return w_stack_bf16, b_stack, gamma, beta


def reference_forward(x, w_stack_bf16, b_stack, gamma, beta):
    """Pure-JAX f32 reference (same bf16 parameters, f32 math) for sanity check."""
    w = w_stack_bf16.astype(jnp.float32)

    def linear(h, i):
        return h @ w[i] + b_stack[i][None, :]

    out = linear(x, 0)
    for r in range(NUM_RES_BLOCKS):
        res = out
        h = jnp.maximum(out, 0.0)
        h = linear(h, 1 + 2 * r)
        h = jnp.maximum(h, 0.0)
        h = linear(h, 2 + 2 * r)
        out = h + res
    mean = jnp.mean(out, axis=0, keepdims=True)
    var = jnp.mean((out - mean) ** 2, axis=0, keepdims=True)
    out = (out - mean) / jnp.sqrt(var + BN_EPS)
    out = out * gamma + beta
    out = jnp.maximum(out, 0.0)
    return linear(out, NUM_LINEARS - 1)


if __name__ == "__main__":
    batch = 16  # multiple of 16 so the bf16 matmul LHS fills packed sublane tiles
    x = jax.random.normal(jax.random.PRNGKey(0), (batch, D), jnp.float32)
    w_stack_bf16, b_stack, gamma, beta = init_params(jax.random.PRNGKey(42))

    out = adversarial_mapper(x, w_stack_bf16, b_stack, gamma, beta)
    out = jax.block_until_ready(out)

    ref = reference_forward(x, w_stack_bf16, b_stack, gamma, beta)
    assert out.shape == (batch, D)
    # bf16 matmul operands w/ f32 accumulation vs f32 reference -> loose tol.
    assert jnp.allclose(out, ref, atol=2e-2, rtol=2e-2)

    print("KERNEL_OK")
</pallas_src>

<mosaic_0001>
module attributes {stable_mosaic.version = 11 : i64} {
  func.func @adversarial_mapper_kernel(%arg0: memref<16x512xf32, #tpu.memory_space<vmem>>, %arg1: memref<8x512x512xbf16, #tpu.memory_space<vmem>>, %arg2: memref<8x512xf32, #tpu.memory_space<vmem>>, %arg3: memref<1x512xf32, #tpu.memory_space<vmem>>, %arg4: memref<1x512xf32, #tpu.memory_space<vmem>>, %arg5: memref<16x512xf32, #tpu.memory_space<vmem>>) attributes {dimension_semantics = [], scalar_prefetch = 0 : i64, scratch_operands = 0 : i64, tpu.core_type = #tpu.core_type<tc>} {
    %c0 = arith.constant 0 : index
    %c0_0 = arith.constant 0 : index
    %0 = vector.load %arg0[%c0, %c0_0] : memref<16x512xf32, #tpu.memory_space<vmem>>, vector<16x512xf32>
    %1 = arith.truncf %0 : vector<16x512xf32> to vector<16x512xbf16>
    %c0_1 = arith.constant 0 : index
    %c0_2 = arith.constant 0 : index
    %c0_3 = arith.constant 0 : index
    %2 = vector.load %arg1[%c0_1, %c0_2, %c0_3] : memref<8x512x512xbf16, #tpu.memory_space<vmem>>, vector<1x512x512xbf16>
    %3 = vector.shape_cast %2 : vector<1x512x512xbf16> to vector<512x512xbf16>
    %cst = arith.constant dense<0.000000e+00> : vector<16x512xf32>
    %4 = tpu.matmul %1, %3, %cst {dimension_numbers = #tpu.dot_dimension_numbers<[1], [0], [0], [1], [0, 0, 1, 1], [], []>} : vector<16x512xbf16>, vector<512x512xbf16>, vector<16x512xf32> -> vector<16x512xf32>
    %c0_4 = arith.constant 0 : index
    %c0_5 = arith.constant 0 : index
    %5 = vector.load %arg2[%c0_4, %c0_5] : memref<8x512xf32, #tpu.memory_space<vmem>>, vector<1x512xf32>
    %6 = vector.broadcast %5 : vector<1x512xf32> to vector<16x512xf32>
    %7 = arith.addf %4, %6 : vector<16x512xf32>
    %cst_6 = arith.constant 0.000000e+00 : f32
    %8 = vector.broadcast %cst_6 : f32 to vector<16x512xf32>
    %9 = arith.maximumf %7, %8 : vector<16x512xf32>
    %10 = arith.truncf %9 : vector<16x512xf32> to vector<16x512xbf16>
    %c1 = arith.constant 1 : index
    %c0_7 = arith.constant 0 : index
    %c0_8 = arith.constant 0 : index
    %11 = vector.load %arg1[%c1, %c0_7, %c0_8] : memref<8x512x512xbf16, #tpu.memory_space<vmem>>, vector<1x512x512xbf16>
    %12 = vector.shape_cast %11 : vector<1x512x512xbf16> to vector<512x512xbf16>
    %cst_9 = arith.constant dense<0.000000e+00> : vector<16x512xf32>
    %13 = tpu.matmul %10, %12, %cst_9 {dimension_numbers = #tpu.dot_dimension_numbers<[1], [0], [0], [1], [0, 0, 1, 1], [], []>} : vector<16x512xbf16>, vector<512x512xbf16>, vector<16x512xf32> -> vector<16x512xf32>
    %c1_10 = arith.constant 1 : index
    %c0_11 = arith.constant 0 : index
    %14 = vector.load %arg2[%c1_10, %c0_11] : memref<8x512xf32, #tpu.memory_space<vmem>>, vector<1x512xf32>
    %15 = vector.broadcast %14 : vector<1x512xf32> to vector<16x512xf32>
    %16 = arith.addf %13, %15 : vector<16x512xf32>
    %cst_12 = arith.constant 0.000000e+00 : f32
    %17 = vector.broadcast %cst_12 : f32 to vector<16x512xf32>
    %18 = arith.maximumf %16, %17 : vector<16x512xf32>
    %19 = arith.truncf %18 : vector<16x512xf32> to vector<16x512xbf16>
    %c2 = arith.constant 2 : index
    %c0_13 = arith.constant 0 : index
    %c0_14 = arith.constant 0 : index
    %20 = vector.load %arg1[%c2, %c0_13, %c0_14] : memref<8x512x512xbf16, #tpu.memory_space<vmem>>, vector<1x512x512xbf16>
    %21 = vector.shape_cast %20 : vector<1x512x512xbf16> to vector<512x512xbf16>
    %cst_15 = arith.constant dense<0.000000e+00> : vector<16x512xf32>
    %22 = tpu.matmul %19, %21, %cst_15 {dimension_numbers = #tpu.dot_dimension_numbers<[1], [0], [0], [1], [0, 0, 1, 1], [], []>} : vector<16x512xbf16>, vector<512x512xbf16>, vector<16x512xf32> -> vector<16x512xf32>
    %c2_16 = arith.constant 2 : index
    %c0_17 = arith.constant 0 : index
    %23 = vector.load %arg2[%c2_16, %c0_17] : memref<8x512xf32, #tpu.memory_space<vmem>>, vector<1x512xf32>
    %24 = vector.broadcast %23 : vector<1x512xf32> to vector<16x512xf32>
    %25 = arith.addf %22, %24 : vector<16x512xf32>
    %26 = arith.addf %25, %7 : vector<16x512xf32>
    %cst_18 = arith.constant 0.000000e+00 : f32
    %27 = vector.broadcast %cst_18 : f32 to vector<16x512xf32>
    %28 = arith.maximumf %26, %27 : vector<16x512xf32>
    %29 = arith.truncf %28 : vector<16x512xf32> to vector<16x512xbf16>
    %c3 = arith.constant 3 : index
    %c0_19 = arith.constant 0 : index
    %c0_20 = arith.constant 0 : index
    %30 = vector.load %arg1[%c3, %c0_19, %c0_20] : memref<8x512x512xbf16, #tpu.memory_space<vmem>>, vector<1x512x512xbf16>
    %31 = vector.shape_cast %30 : vector<1x512x512xbf16> to vector<512x512xbf16>
    %cst_21 = arith.constant dense<0.000000e+00> : vector<16x512xf32>
    %32 = tpu.matmul %29, %31, %cst_21 {dimension_numbers = #tpu.dot_dimension_numbers<[1], [0], [0], [1], [0, 0, 1, 1], [], []>} : vector<16x512xbf16>, vector<512x512xbf16>, vector<16x512xf32> -> vector<16x512xf32>
    %c3_22 = arith.constant 3 : index
    %c0_23 = arith.constant 0 : index
    %33 = vector.load %arg2[%c3_22, %c0_23] : memref<8x512xf32, #tpu.memory_space<vmem>>, vector<1x512xf32>
    %34 = vector.broadcast %33 : vector<1x512xf32> to vector<16x512xf32>
    %35 = arith.addf %32, %34 : vector<16x512xf32>
    %cst_24 = arith.constant 0.000000e+00 : f32
    %36 = vector.broadcast %cst_24 : f32 to vector<16x512xf32>
    %37 = arith.maximumf %35, %36 : vector<16x512xf32>
    %38 = arith.truncf %37 : vector<16x512xf32> to vector<16x512xbf16>
    %c4 = arith.constant 4 : index
    %c0_25 = arith.constant 0 : index
    %c0_26 = arith.constant 0 : index
    %39 = vector.load %arg1[%c4, %c0_25, %c0_26] : memref<8x512x512xbf16, #tpu.memory_space<vmem>>, vector<1x512x512xbf16>
    %40 = vector.shape_cast %39 : vector<1x512x512xbf16> to vector<512x512xbf16>
    %cst_27 = arith.constant dense<0.000000e+00> : vector<16x512xf32>
    %41 = tpu.matmul %38, %40, %cst_27 {dimension_numbers = #tpu.dot_dimension_numbers<[1], [0], [0], [1], [0, 0, 1, 1], [], []>} : vector<16x512xbf16>, vector<512x512xbf16>, vector<16x512xf32> -> vector<16x512xf32>
    %c4_28 = arith.constant 4 : index
    %c0_29 = arith.constant 0 : index
    %42 = vector.load %arg2[%c4_28, %c0_29] : memref<8x512xf32, #tpu.memory_space<vmem>>, vector<1x512xf32>
    %43 = vector.broadcast %42 : vector<1x512xf32> to vector<16x512xf32>
    %44 = arith.addf %41, %43 : vector<16x512xf32>
    %45 = arith.addf %44, %26 : vector<16x512xf32>
    %cst_30 = arith.constant 0.000000e+00 : f32
    %46 = vector.broadcast %cst_30 : f32 to vector<16x512xf32>
    %47 = arith.maximumf %45, %46 : vector<16x512xf32>
    %48 = arith.truncf %47 : vector<16x512xf32> to vector<16x512xbf16>
    %c5 = arith.constant 5 : index
    %c0_31 = arith.constant 0 : index
    %c0_32 = arith.constant 0 : index
    %49 = vector.load %arg1[%c5, %c0_31, %c0_32] : memref<8x512x512xbf16, #tpu.memory_space<vmem>>, vector<1x512x512xbf16>
    %50 = vector.shape_cast %49 : vector<1x512x512xbf16> to vector<512x512xbf16>
    %cst_33 = arith.constant dense<0.000000e+00> : vector<16x512xf32>
    %51 = tpu.matmul %48, %50, %cst_33 {dimension_numbers = #tpu.dot_dimension_numbers<[1], [0], [0], [1], [0, 0, 1, 1], [], []>} : vector<16x512xbf16>, vector<512x512xbf16>, vector<16x512xf32> -> vector<16x512xf32>
    %c5_34 = arith.constant 5 : index
    %c0_35 = arith.constant 0 : index
    %52 = vector.load %arg2[%c5_34, %c0_35] : memref<8x512xf32, #tpu.memory_space<vmem>>, vector<1x512xf32>
    %53 = vector.broadcast %52 : vector<1x512xf32> to vector<16x512xf32>
    %54 = arith.addf %51, %53 : vector<16x512xf32>
    %cst_36 = arith.constant 0.000000e+00 : f32
    %55 = vector.broadcast %cst_36 : f32 to vector<16x512xf32>
    %56 = arith.maximumf %54, %55 : vector<16x512xf32>
    %57 = arith.truncf %56 : vector<16x512xf32> to vector<16x512xbf16>
    %c6 = arith.constant 6 : index
    %c0_37 = arith.constant 0 : index
    %c0_38 = arith.constant 0 : index
    %58 = vector.load %arg1[%c6, %c0_37, %c0_38] : memref<8x512x512xbf16, #tpu.memory_space<vmem>>, vector<1x512x512xbf16>
    %59 = vector.shape_cast %58 : vector<1x512x512xbf16> to vector<512x512xbf16>
    %cst_39 = arith.constant dense<0.000000e+00> : vector<16x512xf32>
    %60 = tpu.matmul %57, %59, %cst_39 {dimension_numbers = #tpu.dot_dimension_numbers<[1], [0], [0], [1], [0, 0, 1, 1], [], []>} : vector<16x512xbf16>, vector<512x512xbf16>, vector<16x512xf32> -> vector<16x512xf32>
    %c6_40 = arith.constant 6 : index
    %c0_41 = arith.constant 0 : index
    %61 = vector.load %arg2[%c6_40, %c0_41] : memref<8x512xf32, #tpu.memory_space<vmem>>, vector<1x512xf32>
    %62 = vector.broadcast %61 : vector<1x512xf32> to vector<16x512xf32>
    %63 = arith.addf %60, %62 : vector<16x512xf32>
    %64 = arith.addf %63, %45 : vector<16x512xf32>
    %cst_42 = arith.constant dense<0.000000e+00> : vector<512xf32>
    %65 = vector.multi_reduction <add>, %64, %cst_42 [0] : vector<16x512xf32> to vector<512xf32>
    %66 = vector.shape_cast %65 : vector<512xf32> to vector<1x512xf32>
    %cst_43 = arith.constant 1.600000e+01 : f32
    %67 = vector.broadcast %cst_43 : f32 to vector<1x512xf32>
    %68 = arith.divf %66, %67 : vector<1x512xf32>
    %69 = vector.broadcast %68 : vector<1x512xf32> to vector<16x512xf32>
    %70 = arith.subf %64, %69 : vector<16x512xf32>
    %71 = arith.mulf %70, %70 : vector<16x512xf32>
    %cst_44 = arith.constant dense<0.000000e+00> : vector<512xf32>
    %72 = vector.multi_reduction <add>, %71, %cst_44 [0] : vector<16x512xf32> to vector<512xf32>
    %73 = vector.shape_cast %72 : vector<512xf32> to vector<1x512xf32>
    %cst_45 = arith.constant 1.600000e+01 : f32
    %74 = vector.broadcast %cst_45 : f32 to vector<1x512xf32>
    %75 = arith.divf %73, %74 : vector<1x512xf32>
    %cst_46 = arith.constant 9.99999974E-6 : f32
    %76 = vector.broadcast %cst_46 : f32 to vector<1x512xf32>
    %77 = arith.addf %75, %76 : vector<1x512xf32>
    %78 = math.rsqrt %77 : vector<1x512xf32>
    %79 = vector.broadcast %78 : vector<1x512xf32> to vector<16x512xf32>
    %80 = arith.mulf %70, %79 : vector<16x512xf32>
    %c0_47 = arith.constant 0 : index
    %c0_48 = arith.constant 0 : index
    %81 = vector.load %arg3[%c0_47, %c0_48] : memref<1x512xf32, #tpu.memory_space<vmem>>, vector<1x512xf32>
    %82 = vector.broadcast %81 : vector<1x512xf32> to vector<16x512xf32>
    %83 = arith.mulf %80, %82 : vector<16x512xf32>
    %c0_49 = arith.constant 0 : index
    %c0_50 = arith.constant 0 : index
    %84 = vector.load %arg4[%c0_49, %c0_50] : memref<1x512xf32, #tpu.memory_space<vmem>>, vector<1x512xf32>
    %85 = vector.broadcast %84 : vector<1x512xf32> to vector<16x512xf32>
    %86 = arith.addf %83, %85 : vector<16x512xf32>
    %cst_51 = arith.constant 0.000000e+00 : f32
    %87 = vector.broadcast %cst_51 : f32 to vector<16x512xf32>
    %88 = arith.maximumf %86, %87 : vector<16x512xf32>
    %89 = arith.truncf %88 : vector<16x512xf32> to vector<16x512xbf16>
    %c7 = arith.constant 7 : index
    %c0_52 = arith.constant 0 : index
    %c0_53 = arith.constant 0 : index
    %90 = vector.load %arg1[%c7, %c0_52, %c0_53] : memref<8x512x512xbf16, #tpu.memory_space<vmem>>, vector<1x512x512xbf16>
    %91 = vector.shape_cast %90 : vector<1x512x512xbf16> to vector<512x512xbf16>
    %cst_54 = arith.constant dense<0.000000e+00> : vector<16x512xf32>
    %92 = tpu.matmul %89, %91, %cst_54 {dimension_numbers = #tpu.dot_dimension_numbers<[1], [0], [0], [1], [0, 0, 1, 1], [], []>} : vector<16x512xbf16>, vector<512x512xbf16>, vector<16x512xf32> -> vector<16x512xf32>
    %c7_55 = arith.constant 7 : index
    %c0_56 = arith.constant 0 : index
    %93 = vector.load %arg2[%c7_55, %c0_56] : memref<8x512xf32, #tpu.memory_space<vmem>>, vector<1x512xf32>
    %94 = vector.broadcast %93 : vector<1x512xf32> to vector<16x512xf32>
    %95 = arith.addf %92, %94 : vector<16x512xf32>
    %c0_57 = arith.constant 0 : index
    %c0_58 = arith.constant 0 : index
    %96 = vector.load %arg5[%c0_57, %c0_58] : memref<16x512xf32, #tpu.memory_space<vmem>>, vector<16x512xf32>
    tpu.vector_store %arg5[%c0_57, %c0_58], %95 {strides = array<i32>} : memref<16x512xf32, #tpu.memory_space<vmem>>, vector<16x512xf32>,
    return
  }
}

</mosaic_0001>

<bundles_post_ra>
// kernel: tpu_custom_call.1
= control target key start
LH: loop header
LB: loop body
LE: loop exit
PB: predicated region body
PF: predicated region fallthrough
CT: control target
= control target key end

     0   :  { %10 = vsyncpa [#allocation3], 0  ;;  %s11303_s0 = inlined_call_operand.hbm [shape: f32[16,512], index: 0, kind: input, shape index: {}]   ;;  %s11304_s1 = inlined_call_operand.hbm [shape: bf16[8,512,512], index: 1, kind: input, shape index: {}]   ;;  %s11305_s2 = inlined_call_operand.hbm [shape: f32[8,512], index: 2, kind: input, shape index: {}]   ;;  %s11306_s3 = inlined_call_operand.hbm [shape: f32[1,512], index: 3, kind: input, shape index: {}]   ;;  %s11307_s4 = inlined_call_operand.hbm [shape: f32[1,512], index: 4, kind: input, shape index: {}]   ;;  %s11308_s5 = inlined_call_operand.hbm [shape: f32[16,512], index: 5, kind: output, shape index: {}]  }
   0x1   :  { %11 = vsyncpa [#allocation6], 0 }
   0x2   :  { %12 = vsyncpa [#allocation9], 0 }
   0x3   :  { %13 = vsyncpa [#allocation4], 0  ;;  %s10943_s18 = smov [#allocation5]   ;;  %s10803_s22 = scalar_lea.hbm %s11304_s1, 131072 }
   0x4   :  { %s31_s19 = sshll.u32 %s10943_s18, 4  ;;  %p10804_p0 = scmp.ne.s32.totalorder %s11304_s1, %s10803_s22  ;;  %s32_s19 = int_to_ptr.vmem [resolvable:$true] %s31_s19 }
   0x5   :  { %p10807_p1 = scmp.lt.u32.totalorder %s10803_s22, %s11304_s1 }
   0x7   :  { %p10809_p2 = pnand %p10807_p1, %p10804_p0 }
   0x9   :  { %10812 = shalt.err (!%p10809_p2)
}
   0xa   :  { %s10813_s27 = scalar_lea.vmem %s32_s19, 131072  ;;  %p10818_p4 = scmp.lt.s32.totalorder %s32_s19, %s32_s19 }
   0xb   :  { %p10814_p3 = scmp.ne.s32.totalorder %s32_s19, %s10813_s27  ;;  %p10819_p5 = scmp.lt.s32.totalorder %s10813_s27, %s10813_s27 }
   0xd   :  { %p10820_p6 = por %p10819_p5, %p10818_p4 }
   0xf   :  { %p10821_p7 = pnand %p10820_p6, %p10814_p3 }
  0x11   :  { %10824 = shalt.err (!%p10821_p7)
}
  0x12   :  { %s10944_s28 = smov 256   ;;  %s10945_s29 = smov 16  }
  0x13   :  { %37 = dma.hbm_to_vmem [thread:$0]  %s11304_s1, 131072, %s32_s19, [#allocation6], %s10944_s28, %s10944_s28, %s10945_s29  }
  0x14   :  { %s10946_s7 = smov [#allocation8]   ;;  %s10947_s9 = smov [#allocation2]  }
  0x15   :  { %s54_s8 = sshll.u32 %s10946_s7, 4  ;;  %s19_s10 = sshll.u32 %s10947_s9, 4  ;;  %s55_s8 = int_to_ptr.vmem [resolvable:$true] %s54_s8  ;;  %s20_s10 = int_to_ptr.vmem [resolvable:$true] %s19_s10 }
  0x16   :  { %s10825_s13 = scalar_lea.hbm %s11306_s3, 64 }
  0x17   :  { %p10826_p8 = scmp.ne.s32.totalorder %s11306_s3, %s10825_s13  ;;  %p10829_p9 = scmp.lt.u32.totalorder %s10825_s13, %s11306_s3 }
  0x19   :  { %p10831_p10 = pnand %p10829_p9, %p10826_p8 }
  0x1b   :  { %10834 = shalt.err (!%p10831_p10)
}
  0x1c   :  { %s10835_s1 = scalar_lea.vmem %s55_s8, 64  ;;  %p10840_p12 = scmp.lt.s32.totalorder %s55_s8, %s55_s8 }
  0x1d   :  { %p10836_p11 = scmp.ne.s32.totalorder %s55_s8, %s10835_s1  ;;  %p10841_p13 = scmp.lt.s32.totalorder %s10835_s1, %s10835_s1 }
  0x1f   :  { %p10842_p0 = por %p10841_p13, %p10840_p12 }
  0x21   :  { %p10843_p1 = pnand %p10842_p0, %p10836_p11 }
  0x23   :  { %10846 = shalt.err (!%p10843_p1)
}
  0x24   :  { %57 = dma.hbm_to_vmem [thread:$0]  %s11306_s3, 64, %s55_s8, [#allocation9]  }
  0x25   :  { %s10847_s22 = scalar_lea.hbm %s11303_s0, 1024 }
  0x26   :  { %p10848_p2 = scmp.ne.s32.totalorder %s11303_s0, %s10847_s22  ;;  %p10851_p3 = scmp.lt.u32.totalorder %s10847_s22, %s11303_s0 }
  0x28   :  { %p10853_p4 = pnand %p10851_p3, %p10848_p2 }
  0x2a   :  { %10856 = shalt.err (!%p10853_p4)
}
  0x2b   :  { %s10857_s27 = scalar_lea.vmem %s20_s10, 1024  ;;  %p10862_p6 = scmp.lt.s32.totalorder %s20_s10, %s20_s10 }
  0x2c   :  { %p10858_p5 = scmp.ne.s32.totalorder %s20_s10, %s10857_s27  ;;  %p10863_p7 = scmp.lt.s32.totalorder %s10857_s27, %s10857_s27 }
  0x2e   :  { %p10864_p8 = por %p10863_p7, %p10862_p6 }
  0x30   :  { %p10865_p9 = pnand %p10864_p8, %p10858_p5 }
  0x32   :  { %10868 = shalt.err (!%p10865_p9)
}
  0x33   :  { %s10948_s3 = smov 512   ;;  %s10949_s28 = smov 32  }
  0x34   :  { %25 = dma.hbm_to_vmem [thread:$0]  %s11303_s0, 1024, %s20_s10, [#allocation3], %s10948_s3, %s10948_s3, %s10949_s28  }
  0x35   :  { %s10950_s6 = smov [#allocation7]   ;;  %s10951_s8 = smov [#allocation10]  }
  0x36   :  { %s44_s7 = sshll.u32 %s10950_s6, 4  ;;  %s64_s9 = sshll.u32 %s10951_s8, 4  ;;  %s45_s7 = int_to_ptr.vmem [resolvable:$true] %s44_s7  ;;  %s65_s9 = int_to_ptr.vmem [resolvable:$true] %s64_s9 }
  0x37   :  { %s10869_s13 = scalar_lea.hbm %s11305_s2, 512 }
  0x38   :  { %p10870_p10 = scmp.ne.s32.totalorder %s11305_s2, %s10869_s13  ;;  %p10873_p11 = scmp.lt.u32.totalorder %s10869_s13, %s11305_s2 }
  0x3a   :  { %p10875_p12 = pnand %p10873_p11, %p10870_p10 }
  0x3c   :  { %10878 = shalt.err (!%p10875_p12)
}
  0x3d   :  { %s10879_s0 = scalar_lea.vmem %s45_s7, 512  ;;  %p10884_p0 = scmp.lt.s32.totalorder %s45_s7, %s45_s7 }
  0x3e   :  { %p10880_p13 = scmp.ne.s32.totalorder %s45_s7, %s10879_s0  ;;  %p10885_p1 = scmp.lt.s32.totalorder %s10879_s0, %s10879_s0 }
  0x40   :  { %p10886_p2 = por %p10885_p1, %p10884_p0 }
  0x42   :  { %p10887_p3 = pnand %p10886_p2, %p10880_p13 }
  0x44   :  { %10890 = shalt.err (!%p10887_p3)
}
  0x45   :  { %47 = dma.hbm_to_vmem [thread:$0]  %s11305_s2, 512, %s45_s7, [#allocation6]  }
  0x46   :  { %s10891_s20 = scalar_lea.hbm %s11307_s4, 64 }
  0x47   :  { %p10892_p4 = scmp.ne.s32.totalorder %s11307_s4, %s10891_s20  ;;  %p10895_p5 = scmp.lt.u32.totalorder %s10891_s20, %s11307_s4 }
  0x49   :  { %p10897_p6 = pnand %p10895_p5, %p10892_p4 }
  0x4b   :  { %10900 = shalt.err (!%p10897_p6)
}
  0x4c   :  { %s10901_s25 = scalar_lea.vmem %s65_s9, 64  ;;  %p10906_p8 = scmp.lt.s32.totalorder %s65_s9, %s65_s9 }
  0x4d   :  { %p10902_p7 = scmp.ne.s32.totalorder %s65_s9, %s10901_s25  ;;  %p10907_p9 = scmp.lt.s32.totalorder %s10901_s25, %s10901_s25 }
  0x4f   :  { %p10908_p10 = por %p10907_p9, %p10906_p8 }
  0x51   :  { %p10909_p11 = pnand %p10908_p10, %p10902_p7 }
  0x53   :  { %10912 = shalt.err (!%p10909_p11)
}
  0x54   :  { %67 = dma.hbm_to_vmem [thread:$0]  %s11307_s4, 64, %s65_s9, [#allocation9]  }
  0x55   :  { %10935 = dma.done.wait [#allocation3], 1024  }
  0x56   :  { %10936 = vsyncadd [#allocation3], 4294966272 }
  0x57   :  { %10937 = dma.done.wait [#allocation6], 131584  }
  0x58   :  { %10938 = vsyncadd [#allocation6], 4294835712 }
  0x59   :  { %10939 = dma.done.wait [#allocation9], 128  }
  0x5a   :  { %10940 = vsyncadd [#allocation9], 4294967168  ;;  %v9259_v0 = vld [vmem:[#allocation5 + $0x4] ss:$16 sps:$4 sm:$0xff]   ;;  %v9261_v1 = vld [vmem:[#allocation5 + $0xc] ss:$16 sps:$4 sm:$0xff]  }
  0x5b   :  { %885 = vmatprep.subr.bf16.mxu0 %v9259_v0  ;;  %v9263_v2 = vld [vmem:[#allocation5] ss:$16 sps:$4 sm:$0xff]   ;;  %v9264_v3 = vld [vmem:[#allocation5 + $0x8] ss:$16 sps:$4 sm:$0xff]   ;;  %971 = vmatprep.subr.bf16.mxu1 %v9261_v1  ;;  %v9265_v4 = vld [vmem:[#allocation5 + $0x24] ss:$16 sps:$4 sm:$0xff]  }
  0x5c   :  { %886 = vmatpush1.bf16.msra.mxu0 %v9263_v2  ;;  %972 = vmatpush1.bf16.msra.mxu1 %v9264_v3  ;;  %v9267_v5 = vld [vmem:[#allocation5 + $0x2c] ss:$16 sps:$4 sm:$0xff]   ;;  %v9269_v6 = vld [vmem:[#allocation5 + $0x20] ss:$16 sps:$4 sm:$0xff]   ;;  %v9270_v7 = vld [vmem:[#allocation5 + $0x28] ss:$16 sps:$4 sm:$0xff]  }
  0x5d   :  { %887 = vmatprep.subr.bf16.mxu0 %v9265_v4  ;;  %973 = vmatprep.subr.bf16.mxu1 %v9267_v5  ;;  %v9271_v8 = vld [vmem:[#allocation5 + $0x44] ss:$16 sps:$4 sm:$0xff]   ;;  %v9273_v9 = vld [vmem:[#allocation5 + $0x4c] ss:$16 sps:$4 sm:$0xff]   ;;  %v9275_v10 = vld [vmem:[#allocation5 + $0x40] ss:$16 sps:$4 sm:$0xff]  }
  0x5e   :  { %v9276_v11 = vld [vmem:[#allocation5 + $0x48] ss:$16 sps:$4 sm:$0xff]   ;;  %v9277_v12 = vld [vmem:[#allocation5 + $0x64] ss:$16 sps:$4 sm:$0xff]   ;;  %v9279_v13 = vld [vmem:[#allocation5 + $0x6c] ss:$16 sps:$4 sm:$0xff]  }
  0x5f   :  { %v9281_v14 = vld [vmem:[#allocation5 + $0x60] ss:$16 sps:$4 sm:$0xff]   ;;  %v9282_v15 = vld [vmem:[#allocation5 + $0x68] ss:$16 sps:$4 sm:$0xff]   ;;  %v9283_v16 = vld [vmem:[#allocation5 + $0x84] ss:$16 sps:$4 sm:$0xff]  }
  0x60   :  { %888 = vmatpush1.bf16.msra.mxu0 %v9269_v6  ;;  %974 = vmatpush1.bf16.msra.mxu1 %v9270_v7  ;;  %v9285_v17 = vld [vmem:[#allocation5 + $0x8c] ss:$16 sps:$4 sm:$0xff]   ;;  %v9287_v18 = vld [vmem:[#allocation5 + $0x80] ss:$16 sps:$4 sm:$0xff]   ;;  %v9288_v19 = vld [vmem:[#allocation5 + $0x88] ss:$16 sps:$4 sm:$0xff]  }
  0x61   :  { %889 = vmatprep.subr.bf16.mxu0 %v9271_v8  ;;  %975 = vmatprep.subr.bf16.mxu1 %v9273_v9  ;;  %v9289_v20 = vld [vmem:[#allocation5 + $0xa4] ss:$16 sps:$4 sm:$0xff]   ;;  %v9291_v21 = vld [vmem:[#allocation5 + $0xac] ss:$16 sps:$4 sm:$0xff]   ;;  %v9293_v22 = vld [vmem:[#allocation5 + $0xa0] ss:$16 sps:$4 sm:$0xff]  }
  0x62   :  { %v9294_v23 = vld [vmem:[#allocation5 + $0xa8] ss:$16 sps:$4 sm:$0xff]   ;;  %v9295_v24 = vld [vmem:[#allocation5 + $0xc4] ss:$16 sps:$4 sm:$0xff]   ;;  %v9297_v25 = vld [vmem:[#allocation5 + $0xcc] ss:$16 sps:$4 sm:$0xff]  }
  0x63   :  { %v9299_v26 = vld [vmem:[#allocation5 + $0xc0] ss:$16 sps:$4 sm:$0xff]   ;;  %v9300_v27 = vld [vmem:[#allocation5 + $0xc8] ss:$16 sps:$4 sm:$0xff]   ;;  %v9301_v28 = vld [vmem:[#allocation5 + $0xe4] ss:$16 sps:$4 sm:$0xff]  }
  0x64   :  { %890 = vmatpush1.bf16.msra.mxu0 %v9275_v10  ;;  %976 = vmatpush1.bf16.msra.mxu1 %v9276_v11  ;;  %v9303_v29 = vld [vmem:[#allocation5 + $0xec] ss:$16 sps:$4 sm:$0xff]   ;;  %v9305_v30 = vld [vmem:[#allocation5 + $0xe0] ss:$16 sps:$4 sm:$0xff]   ;;  %v9306_v31 = vld [vmem:[#allocation5 + $0xe8] ss:$16 sps:$4 sm:$0xff]  }
  0x65   :  { %891 = vmatprep.subr.bf16.mxu0 %v9277_v12  ;;  %977 = vmatprep.subr.bf16.mxu1 %v9279_v13  ;;  %v9307_v32 = vld [vmem:[#allocation5 + $0x104] ss:$16 sps:$4 sm:$0xff]   ;;  %v9309_v33 = vld [vmem:[#allocation5 + $0x10c] ss:$16 sps:$4 sm:$0xff]   ;;  %v9311_v34 = vld [vmem:[#allocation5 + $0x100] ss:$16 sps:$4 sm:$0xff]  }
  0x66   :  { %v9312_v35 = vld [vmem:[#allocation5 + $0x108] ss:$16 sps:$4 sm:$0xff]   ;;  %v9313_v36 = vld [vmem:[#allocation5 + $0x124] ss:$16 sps:$4 sm:$0xff]   ;;  %v9315_v37 = vld [vmem:[#allocation5 + $0x12c] ss:$16 sps:$4 sm:$0xff]  }
  0x67   :  { %v9317_v38 = vld [vmem:[#allocation5 + $0x120] ss:$16 sps:$4 sm:$0xff]   ;;  %v9318_v39 = vld [vmem:[#allocation5 + $0x128] ss:$16 sps:$4 sm:$0xff]   ;;  %v9319_v40 = vld [vmem:[#allocation5 + $0x144] ss:$16 sps:$4 sm:$0xff]  }
  0x68   :  { %892 = vmatpush1.bf16.msra.mxu0 %v9281_v14  ;;  %978 = vmatpush1.bf16.msra.mxu1 %v9282_v15  ;;  %v9321_v41 = vld [vmem:[#allocation5 + $0x14c] ss:$16 sps:$4 sm:$0xff]   ;;  %v9323_v42 = vld [vmem:[#allocation5 + $0x140] ss:$16 sps:$4 sm:$0xff]   ;;  %v9324_v43 = vld [vmem:[#allocation5 + $0x148] ss:$16 sps:$4 sm:$0xff]  }
  0x69   :  { %893 = vmatprep.subr.bf16.mxu0 %v9283_v16  ;;  %979 = vmatprep.subr.bf16.mxu1 %v9285_v17  ;;  %v9325_v44 = vld [vmem:[#allocation5 + $0x164] ss:$16 sps:$4 sm:$0xff]   ;;  %v9327_v45 = vld [vmem:[#allocation5 + $0x16c] ss:$16 sps:$4 sm:$0xff]   ;;  %v9329_v48 = vld [vmem:[#allocation5 + $0x160] ss:$16 sps:$4 sm:$0xff]  }
  0x6a   :  { %v84_v46 = vld [vmem:[#allocation2 + $0x8] sm:$0xff]  ;;  %v9331_v51 = vld [vmem:[#allocation5 + $0x184] ss:$16 sps:$4 sm:$0xff]   ;;  %v9335_v53 = vld [vmem:[#allocation5 + $0x180] ss:$16 sps:$4 sm:$0xff]   ;;  %s10952_s4 = smov [#allocation11]  }
  0x6b   :  { %v88_v47 = vld [vmem:[#allocation2 + $0x28] sm:$0xff]  ;;  %v9337_v55 = vld [vmem:[#allocation5 + $0x1a4] ss:$16 sps:$4 sm:$0xff]   ;;  %v9341_v57 = vld [vmem:[#allocation5 + $0x1a0] ss:$16 sps:$4 sm:$0xff]   ;;  %s8083_s27 = sshll.u32 %s10952_s4, 4  ;;  %s8084_s27 = int_to_ptr.vmem [resolvable:$true] %s8083_s27 }
  0x6c   :  { %894 = vmatpush1.bf16.msra.mxu0 %v9287_v18  ;;  %980 = vmatpush1.bf16.msra.mxu1 %v9288_v19  ;;  %v9330_v49 = vld [vmem:[#allocation5 + $0x168] ss:$16 sps:$4 sm:$0xff]   ;;  %v92_v50 = vpack.c.bf16 %v88_v47, %v84_v46  ;;  %v9333_v52 = vld [vmem:[#allocation5 + $0x18c] ss:$16 sps:$4 sm:$0xff]   ;;  %v9343_v59 = vld [vmem:[#allocation5 + $0x1c4] ss:$16 sps:$4 sm:$0xff]   ;;  %p10918_p13 = scmp.lt.s32.totalorder %s8084_s27, %s8084_s27 }
  0x6d   :  { %895 = vmatprep.subr.bf16.mxu0 %v9289_v20  ;;  %981 = vmatprep.subr.bf16.mxu1 %v9291_v21  ;;  %v9336_v54 = vld [vmem:[#allocation5 + $0x188] ss:$16 sps:$4 sm:$0xff]   ;;  %v9339_v56 = vld [vmem:[#allocation5 + $0x1ac] ss:$16 sps:$4 sm:$0xff]   ;;  %v9347_v61 = vld [vmem:[#allocation5 + $0x1c0] ss:$16 sps:$4 sm:$0xff]  }
  0x6e   :  { %917 = vmatprep.mubr.bf16.mxu0 %v92_v50  ;;  %1003 = vmatprep.mubr.bf16.mxu1 %v92_v50  ;;  %v9342_v58 = vld [vmem:[#allocation5 + $0x1a8] ss:$16 sps:$4 sm:$0xff]   ;;  %v9345_v60 = vld [vmem:[#allocation5 + $0x1cc] ss:$16 sps:$4 sm:$0xff]   ;;  %v9349_v63 = vld [vmem:[#allocation5 + $0x1e4] ss:$16 sps:$4 sm:$0xff]  }
  0x6f   :  { %v9348_v62 = vld [vmem:[#allocation5 + $0x1c8] ss:$16 sps:$4 sm:$0xff]   ;;  %v9351_v0 = vld [vmem:[#allocation5 + $0x1ec] ss:$16 sps:$4 sm:$0xff]   ;;  %v9353_v1 = vld [vmem:[#allocation5 + $0x1e0] ss:$16 sps:$4 sm:$0xff]  }
  0x70   :  { %896 = vmatpush1.bf16.msra.mxu0 %v9293_v22  ;;  %982 = vmatpush1.bf16.msra.mxu1 %v9294_v23  ;;  %v9354_v2 = vld [vmem:[#allocation5 + $0x1e8] ss:$16 sps:$4 sm:$0xff]   ;;  %v9357_v3 = vld [vmem:[#allocation5 + $0x204] ss:$16 sps:$4 sm:$0xff]   ;;  %v9360_v6 = vld [vmem:[#allocation5 + $0x20c] ss:$16 sps:$4 sm:$0xff]  }
  0x71   :  { %897 = vmatprep.subr.bf16.mxu0 %v9295_v24  ;;  %983 = vmatprep.subr.bf16.mxu1 %v9297_v25  ;;  %v83_v4 = vld [vmem:[#allocation2] sm:$0xff]  ;;  %v9358_v8 = vld [vmem:[#allocation5 + $0x208] ss:$16 sps:$4 sm:$0xff]   ;;  %v9366_v11 = vld [vmem:[#allocation5 + $0x22c] ss:$16 sps:$4 sm:$0xff]   ;;  %s10913_s29 = scalar_lea.vmem %s8084_s27, 1024 }
  0x72   :  { %v87_v5 = vld [vmem:[#allocation2 + $0x20] sm:$0xff]  ;;  %v9364_v13 = vld [vmem:[#allocation5 + $0x228] ss:$16 sps:$4 sm:$0xff]   ;;  %v9372_v15 = vld [vmem:[#allocation5 + $0x24c] ss:$16 sps:$4 sm:$0xff]   ;;  %p10914_p12 = scmp.ne.s32.totalorder %s8084_s27, %s10913_s29  ;;  %p10919_p0 = scmp.lt.s32.totalorder %s10913_s29, %s10913_s29 }
  0x73   :  { %v9355_v7 = vld [vmem:[#allocation5 + $0x200] ss:$16 sps:$4 sm:$0xff]   ;;  %v91_v9 = vpack.c.bf16 %v87_v5, %v83_v4  ;;  %v9363_v10 = vld [vmem:[#allocation5 + $0x224] ss:$16 sps:$4 sm:$0xff]   ;;  %v9370_v17 = vld [vmem:[#allocation5 + $0x248] ss:$16 sps:$4 sm:$0xff]  }
  0x74   :  { %898 = vmatpush1.bf16.msra.mxu0 %v9299_v26  ;;  %984 = vmatpush1.bf16.msra.mxu1 %v9300_v27  ;;  %v9361_v12 = vld [vmem:[#allocation5 + $0x220] ss:$16 sps:$4 sm:$0xff]   ;;  %v9369_v14 = vld [vmem:[#allocation5 + $0x244] ss:$16 sps:$4 sm:$0xff]   ;;  %v9378_v19 = vld [vmem:[#allocation5 + $0x26c] ss:$16 sps:$4 sm:$0xff]   ;;  %p10920_p1 = por %p10919_p0, %p10918_p13 }
  0x75   :  { %899 = vmatprep.subr.bf16.mxu0 %v9301_v28  ;;  %985 = vmatprep.subr.bf16.mxu1 %v9303_v29  ;;  %v9367_v16 = vld [vmem:[#allocation5 + $0x240] ss:$16 sps:$4 sm:$0xff]   ;;  %v9375_v18 = vld [vmem:[#allocation5 + $0x264] ss:$16 sps:$4 sm:$0xff]   ;;  %v9376_v21 = vld [vmem:[#allocation5 + $0x268] ss:$16 sps:$4 sm:$0xff]  }
  0x76   :  { %v9373_v20 = vld [vmem:[#allocation5 + $0x260] ss:$16 sps:$4 sm:$0xff]   ;;  %v9381_v22 = vld [vmem:[#allocation5 + $0x284] ss:$16 sps:$4 sm:$0xff]   ;;  %v9384_v23 = vld [vmem:[#allocation5 + $0x28c] ss:$16 sps:$4 sm:$0xff]   ;;  %p10921_p2 = pnand %p10920_p1, %p10914_p12 }
  0x77   :  { %v9379_v24 = vld [vmem:[#allocation5 + $0x280] ss:$16 sps:$4 sm:$0xff]   ;;  %v9382_v25 = vld [vmem:[#allocation5 + $0x288] ss:$16 sps:$4 sm:$0xff]   ;;  %v9387_v26 = vld [vmem:[#allocation5 + $0x2a4] ss:$16 sps:$4 sm:$0xff]  }
  0x78   :  { %900 = vmatpush1.bf16.msra.mxu0 %v9305_v30  ;;  %986 = vmatpush1.bf16.msra.mxu1 %v9306_v31  ;;  %v9390_v27 = vld [vmem:[#allocation5 + $0x2ac] ss:$16 sps:$4 sm:$0xff]   ;;  %v9385_v28 = vld [vmem:[#allocation5 + $0x2a0] ss:$16 sps:$4 sm:$0xff]   ;;  %v9388_v29 = vld [vmem:[#allocation5 + $0x2a8] ss:$16 sps:$4 sm:$0xff]  }
  0x79   :  { %901 = vmatprep.subr.bf16.mxu0 %v9307_v32  ;;  %987 = vmatprep.subr.bf16.mxu1 %v9309_v33  ;;  %v9393_v30 = vld [vmem:[#allocation5 + $0x2c4] ss:$16 sps:$4 sm:$0xff]   ;;  %v9396_v31 = vld [vmem:[#allocation5 + $0x2cc] ss:$16 sps:$4 sm:$0xff]   ;;  %v9391_v33 = vld [vmem:[#allocation5 + $0x2c0] ss:$16 sps:$4 sm:$0xff]  }
  0x7a   :  { %v86_v32 = vld [vmem:[#allocation2 + $0x18] sm:$0xff]  ;;  %v9409_v47 = vld [vmem:[#allocation5 + $0x320] ss:$16 sps:$4 sm:$0xff]   ;;  %v9447_v5 = vld [vmem:[#allocation5 + $0x3e4] ss:$16 sps:$4 sm:$0xff]  }
  0x7b   :  { %v9414_v46 = vld [vmem:[#allocation5 + $0x32c] ss:$16 sps:$4 sm:$0xff]   ;;  %v9442_v4 = vld [vmem:[#allocation5 + $0x3c8] ss:$16 sps:$4 sm:$0xff]  }
  0x7c   :  { %902 = vmatpush1.bf16.msra.mxu0 %v9311_v34  ;;  %988 = vmatpush1.bf16.msra.mxu1 %v9312_v35  ;;  %v9394_v34 = vld [vmem:[#allocation5 + $0x2c8] ss:$16 sps:$4 sm:$0xff]   ;;  %v9420_v50 = vld [vmem:[#allocation5 + $0x34c] ss:$16 sps:$4 sm:$0xff]  }
  0x7d   :  { %903 = vmatprep.subr.bf16.mxu0 %v9313_v36  ;;  %989 = vmatprep.subr.bf16.mxu1 %v9315_v37  ;;  %v90_v35 = vld [vmem:[#allocation2 + $0x38] sm:$0xff]  ;;  %v9399_v36 = vld [vmem:[#allocation5 + $0x2e4] ss:$16 sps:$4 sm:$0xff]  }
  0x7e   :  { %v94_v37 = vpack.c.bf16 %v90_v35, %v86_v32  ;;  %v9483_v32 = vld [vmem:[#allocation5 + $0x4a4] ss:$16 sps:$4 sm:$0xff]   ;;  %v9484_v35 = vld [vmem:[#allocation5 + $0x4a8] ss:$16 sps:$4 sm:$0xff]  }
  0x80   :  { %904 = vmatpush1.bf16.msra.mxu0 %v9317_v38  ;;  %990 = vmatpush1.bf16.msra.mxu1 %v9318_v39  ;;  %v9402_v38 = vld [vmem:[#allocation5 + $0x2ec] ss:$16 sps:$4 sm:$0xff]   ;;  %v9397_v39 = vld [vmem:[#allocation5 + $0x2e0] ss:$16 sps:$4 sm:$0xff]  }
  0x81   :  { %905 = vmatprep.subr.bf16.mxu0 %v9319_v40  ;;  %991 = vmatprep.subr.bf16.mxu1 %v9321_v41  ;;  %v9400_v40 = vld [vmem:[#allocation5 + $0x2e8] ss:$16 sps:$4 sm:$0xff]   ;;  %v9405_v41 = vld [vmem:[#allocation5 + $0x304] ss:$16 sps:$4 sm:$0xff]  }
  0x84   :  { %906 = vmatpush1.bf16.msra.mxu0 %v9323_v42  ;;  %992 = vmatpush1.bf16.msra.mxu1 %v9324_v43  ;;  %v9408_v42 = vld [vmem:[#allocation5 + $0x30c] ss:$16 sps:$4 sm:$0xff]   ;;  %v9403_v43 = vld [vmem:[#allocation5 + $0x300] ss:$16 sps:$4 sm:$0xff]  }
  0x85   :  { %907 = vmatprep.subr.bf16.mxu0 %v9325_v44  ;;  %993 = vmatprep.subr.bf16.mxu1 %v9327_v45  ;;  %v9406_v44 = vld [vmem:[#allocation5 + $0x308] ss:$16 sps:$4 sm:$0xff]   ;;  %v9411_v45 = vld [vmem:[#allocation5 + $0x324] ss:$16 sps:$4 sm:$0xff]  }
  0x88   :  { %908 = vmatpush1.bf16.msra.mxu0 %v9329_v48  ;;  %994 = vmatpush1.bf16.msra.mxu1 %v9330_v49  ;;  %v9412_v48 = vld [vmem:[#allocation5 + $0x328] ss:$16 sps:$4 sm:$0xff]   ;;  %v9417_v49 = vld [vmem:[#allocation5 + $0x344] ss:$16 sps:$4 sm:$0xff]  }
  0x89   :  { %909 = vmatprep.subr.bf16.mxu0 %v9331_v51  ;;  %995 = vmatprep.subr.bf16.mxu1 %v9333_v52  ;;  %v9415_v51 = vld [vmem:[#allocation5 + $0x340] ss:$16 sps:$4 sm:$0xff]   ;;  %v9418_v52 = vld [vmem:[#allocation5 + $0x348] ss:$16 sps:$4 sm:$0xff]  }
  0x8c   :  { %910 = vmatpush1.bf16.msra.mxu0 %v9335_v53  ;;  %996 = vmatpush1.bf16.msra.mxu1 %v9336_v54  ;;  %v9423_v53 = vld [vmem:[#allocation5 + $0x364] ss:$16 sps:$4 sm:$0xff]   ;;  %v9426_v54 = vld [vmem:[#allocation5 + $0x36c] ss:$16 sps:$4 sm:$0xff]  }
  0x8d   :  { %911 = vmatprep.subr.bf16.mxu0 %v9337_v55  ;;  %997 = vmatprep.subr.bf16.mxu1 %v9339_v56  ;;  %v9421_v55 = vld [vmem:[#allocation5 + $0x360] ss:$16 sps:$4 sm:$0xff]   ;;  %v9424_v56 = vld [vmem:[#allocation5 + $0x368] ss:$16 sps:$4 sm:$0xff]  }
  0x90   :  { %912 = vmatpush1.bf16.msra.mxu0 %v9341_v57  ;;  %998 = vmatpush1.bf16.msra.mxu1 %v9342_v58  ;;  %v9429_v57 = vld [vmem:[#allocation5 + $0x384] ss:$16 sps:$4 sm:$0xff]   ;;  %v9432_v58 = vld [vmem:[#allocation5 + $0x38c] ss:$16 sps:$4 sm:$0xff]  }
  0x91   :  { %913 = vmatprep.subr.bf16.mxu0 %v9343_v59  ;;  %999 = vmatprep.subr.bf16.mxu1 %v9345_v60  ;;  %v9427_v59 = vld [vmem:[#allocation5 + $0x380] ss:$16 sps:$4 sm:$0xff]   ;;  %v9430_v60 = vld [vmem:[#allocation5 + $0x388] ss:$16 sps:$4 sm:$0xff]  }
  0x94   :  { %914 = vmatpush1.bf16.msra.mxu0 %v9347_v61  ;;  %1000 = vmatpush1.bf16.msra.mxu1 %v9348_v62  ;;  %v9435_v61 = vld [vmem:[#allocation5 + $0x3a4] ss:$16 sps:$4 sm:$0xff]   ;;  %v9438_v62 = vld [vmem:[#allocation5 + $0x3ac] ss:$16 sps:$4 sm:$0xff]  }
  0x95   :  { %915 = vmatprep.subr.bf16.mxu0 %v9349_v63  ;;  %1001 = vmatprep.subr.bf16.mxu1 %v9351_v0  ;;  %v9433_v63 = vld [vmem:[#allocation5 + $0x3a0] ss:$16 sps:$4 sm:$0xff]   ;;  %v9436_v0 = vld [vmem:[#allocation5 + $0x3a8] ss:$16 sps:$4 sm:$0xff]  }
  0x98   :  { %916 = vmatpush1.bf16.msra.mxu0 %v9353_v1  ;;  %1002 = vmatpush1.bf16.msra.mxu1 %v9354_v2  ;;  %v9441_v1 = vld [vmem:[#allocation5 + $0x3c4] ss:$16 sps:$4 sm:$0xff]   ;;  %v9444_v2 = vld [vmem:[#allocation5 + $0x3cc] ss:$16 sps:$4 sm:$0xff]  }
  0x99   :  { %928 = vmatprep.subr.bf16.mxu0 %v9357_v3  ;;  %1014 = vmatprep.subr.bf16.mxu1 %v9360_v6  ;;  %v9439_v3 = vld [vmem:[#allocation5 + $0x3c0] ss:$16 sps:$4 sm:$0xff]   ;;  %v9450_v6 = vld [vmem:[#allocation5 + $0x3ec] ss:$16 sps:$4 sm:$0xff]  }
  0x9b   :  { %918 = vmatmul.mubr.bf16.vlgmr.msra.gmra.mrb[0].mxu0 %v91_v9  ;;  %1004 = vmatmul.mubr.bf16.vlgmr.msra.gmra.mrb[0].mxu1 %v91_v9  ;;  %v85_v9 = vld [vmem:[#allocation2 + $0x10] sm:$0xff] }
  0x9c   :  { %929 = vmatpush1.bf16.msra.mxu0 %v9355_v7  ;;  %1015 = vmatpush1.bf16.msra.mxu1 %v9358_v8  ;;  %v9445_v7 = vld [vmem:[#allocation5 + $0x3e0] ss:$16 sps:$4 sm:$0xff]   ;;  %v9448_v8 = vld [vmem:[#allocation5 + $0x3e8] ss:$16 sps:$4 sm:$0xff]  }
  0x9d   :  { %930 = vmatprep.subr.bf16.mxu0 %v9363_v10  ;;  %1016 = vmatprep.subr.bf16.mxu1 %v9366_v11  ;;  %v89_v10 = vld [vmem:[#allocation2 + $0x30] sm:$0xff] }
  0x9e   :  { %960 = vmatprep.mubr.bf16.mxu0 %v94_v37  ;;  %1046 = vmatprep.mubr.bf16.mxu1 %v94_v37  ;;  %v9453_v11 = vld [vmem:[#allocation5 + $0x404] ss:$16 sps:$4 sm:$0xff]   ;;  %v9492_v37 = vld [vmem:[#allocation5 + $0x4cc] ss:$16 sps:$4 sm:$0xff]  }
  0xa0   :  { %931 = vmatpush1.bf16.msra.mxu0 %v9361_v12  ;;  %1017 = vmatpush1.bf16.msra.mxu1 %v9364_v13  ;;  %v9456_v12 = vld [vmem:[#allocation5 + $0x40c] ss:$16 sps:$4 sm:$0xff]   ;;  %v9451_v13 = vld [vmem:[#allocation5 + $0x400] ss:$16 sps:$4 sm:$0xff]  }
  0xa1   :  { %932 = vmatprep.subr.bf16.mxu0 %v9369_v14  ;;  %1018 = vmatprep.subr.bf16.mxu1 %v9372_v15  ;;  %v9454_v14 = vld [vmem:[#allocation5 + $0x408] ss:$16 sps:$4 sm:$0xff]   ;;  %v93_v15 = vpack.c.bf16 %v89_v10, %v85_v9  ;;  %v9546_v9 = vld [vmem:[#allocation5 + $0x5ec] ss:$16 sps:$4 sm:$0xff]   ;;  %v9541_v10 = vld [vmem:[#allocation5 + $0x5e0] ss:$16 sps:$4 sm:$0xff]  }
  0xa4   :  { %933 = vmatpush1.bf16.msra.mxu0 %v9367_v16  ;;  %1019 = vmatpush1.bf16.msra.mxu1 %v9370_v17  ;;  %v9459_v16 = vld [vmem:[#allocation5 + $0x424] ss:$16 sps:$4 sm:$0xff]   ;;  %v9462_v17 = vld [vmem:[#allocation5 + $0x42c] ss:$16 sps:$4 sm:$0xff]  }
  0xa5   :  { %934 = vmatprep.subr.bf16.mxu0 %v9375_v18  ;;  %1020 = vmatprep.subr.bf16.mxu1 %v9378_v19  ;;  %v9457_v18 = vld [vmem:[#allocation5 + $0x420] ss:$16 sps:$4 sm:$0xff]   ;;  %v9460_v19 = vld [vmem:[#allocation5 + $0x428] ss:$16 sps:$4 sm:$0xff]  }
  0xa8   :  { %935 = vmatpush1.bf16.msra.mxu0 %v9373_v20  ;;  %1021 = vmatpush1.bf16.msra.mxu1 %v9376_v21  ;;  %v9465_v20 = vld [vmem:[#allocation5 + $0x444] ss:$16 sps:$4 sm:$0xff]   ;;  %v9468_v21 = vld [vmem:[#allocation5 + $0x44c] ss:$16 sps:$4 sm:$0xff]  }
  0xa9   :  { %936 = vmatprep.subr.bf16.mxu0 %v9381_v22  ;;  %1022 = vmatprep.subr.bf16.mxu1 %v9384_v23  ;;  %v9463_v22 = vld [vmem:[#allocation5 + $0x440] ss:$16 sps:$4 sm:$0xff]   ;;  %v9466_v23 = vld [vmem:[#allocation5 + $0x448] ss:$16 sps:$4 sm:$0xff]  }
  0xac   :  { %937 = vmatpush1.bf16.msra.mxu0 %v9379_v24  ;;  %1023 = vmatpush1.bf16.msra.mxu1 %v9382_v25  ;;  %v9471_v24 = vld [vmem:[#allocation5 + $0x464] ss:$16 sps:$4 sm:$0xff]   ;;  %v9474_v25 = vld [vmem:[#allocation5 + $0x46c] ss:$16 sps:$4 sm:$0xff]  }
  0xad   :  { %938 = vmatprep.subr.bf16.mxu0 %v9387_v26  ;;  %1024 = vmatprep.subr.bf16.mxu1 %v9390_v27  ;;  %v9469_v26 = vld [vmem:[#allocation5 + $0x460] ss:$16 sps:$4 sm:$0xff]   ;;  %v9472_v27 = vld [vmem:[#allocation5 + $0x468] ss:$16 sps:$4 sm:$0xff]  }
  0xb0   :  { %939 = vmatpush1.bf16.msra.mxu0 %v9385_v28  ;;  %1025 = vmatpush1.bf16.msra.mxu1 %v9388_v29  ;;  %v9477_v28 = vld [vmem:[#allocation5 + $0x484] ss:$16 sps:$4 sm:$0xff]   ;;  %v9480_v29 = vld [vmem:[#allocation5 + $0x48c] ss:$16 sps:$4 sm:$0xff]  }
  0xb1   :  { %940 = vmatprep.subr.bf16.mxu0 %v9393_v30  ;;  %1026 = vmatprep.subr.bf16.mxu1 %v9396_v31  ;;  %v9475_v30 = vld [vmem:[#allocation5 + $0x480] ss:$16 sps:$4 sm:$0xff]   ;;  %v9478_v31 = vld [vmem:[#allocation5 + $0x488] ss:$16 sps:$4 sm:$0xff]  }
  0xb4   :  { %941 = vmatpush1.bf16.msra.mxu0 %v9391_v33  ;;  %1027 = vmatpush1.bf16.msra.mxu1 %v9394_v34  ;;  %v9486_v33 = vld [vmem:[#allocation5 + $0x4ac] ss:$16 sps:$4 sm:$0xff]   ;;  %v9481_v34 = vld [vmem:[#allocation5 + $0x4a0] ss:$16 sps:$4 sm:$0xff]  }
  0xb5   :  { %942 = vmatprep.subr.bf16.mxu0 %v9399_v36  ;;  %1028 = vmatprep.subr.bf16.mxu1 %v9402_v38  ;;  %v9489_v36 = vld [vmem:[#allocation5 + $0x4c4] ss:$16 sps:$4 sm:$0xff]   ;;  %v9487_v38 = vld [vmem:[#allocation5 + $0x4c0] ss:$16 sps:$4 sm:$0xff]  }
  0xb8   :  { %943 = vmatpush1.bf16.msra.mxu0 %v9397_v39  ;;  %1029 = vmatpush1.bf16.msra.mxu1 %v9400_v40  ;;  %v9490_v39 = vld [vmem:[#allocation5 + $0x4c8] ss:$16 sps:$4 sm:$0xff]   ;;  %v9495_v40 = vld [vmem:[#allocation5 + $0x4e4] ss:$16 sps:$4 sm:$0xff]  }
  0xb9   :  { %944 = vmatprep.subr.bf16.mxu0 %v9405_v41  ;;  %1030 = vmatprep.subr.bf16.mxu1 %v9408_v42  ;;  %v9498_v41 = vld [vmem:[#allocation5 + $0x4ec] ss:$16 sps:$4 sm:$0xff]   ;;  %v9493_v42 = vld [vmem:[#allocation5 + $0x4e0] ss:$16 sps:$4 sm:$0xff]  }
  0xbc   :  { %945 = vmatpush1.bf16.msra.mxu0 %v9403_v43  ;;  %1031 = vmatpush1.bf16.msra.mxu1 %v9406_v44  ;;  %v9496_v43 = vld [vmem:[#allocation5 + $0x4e8] ss:$16 sps:$4 sm:$0xff]   ;;  %v9501_v44 = vld [vmem:[#allocation5 + $0x504] ss:$16 sps:$4 sm:$0xff]  }
  0xbd   :  { %946 = vmatprep.subr.bf16.mxu0 %v9411_v45  ;;  %1032 = vmatprep.subr.bf16.mxu1 %v9414_v46  ;;  %v9504_v45 = vld [vmem:[#allocation5 + $0x50c] ss:$16 sps:$4 sm:$0xff]   ;;  %v9499_v46 = vld [vmem:[#allocation5 + $0x500] ss:$16 sps:$4 sm:$0xff]  }
  0xc0   :  { %947 = vmatpush1.bf16.msra.mxu0 %v9409_v47  ;;  %1033 = vmatpush1.bf16.msra.mxu1 %v9412_v48  ;;  %v9502_v47 = vld [vmem:[#allocation5 + $0x508] ss:$16 sps:$4 sm:$0xff]   ;;  %v9507_v48 = vld [vmem:[#allocation5 + $0x524] ss:$16 sps:$4 sm:$0xff]  }
  0xc1   :  { %948 = vmatprep.subr.bf16.mxu0 %v9417_v49  ;;  %1034 = vmatprep.subr.bf16.mxu1 %v9420_v50  ;;  %v9510_v49 = vld [vmem:[#allocation5 + $0x52c] ss:$16 sps:$4 sm:$0xff]   ;;  %v9505_v50 = vld [vmem:[#allocation5 + $0x520] ss:$16 sps:$4 sm:$0xff]  }
  0xc4   :  { %949 = vmatpush1.bf16.msra.mxu0 %v9415_v51  ;;  %1035 = vmatpush1.bf16.msra.mxu1 %v9418_v52  ;;  %v9508_v51 = vld [vmem:[#allocation5 + $0x528] ss:$16 sps:$4 sm:$0xff]   ;;  %v9513_v52 = vld [vmem:[#allocation5 + $0x544] ss:$16 sps:$4 sm:$0xff]  }
  0xc5   :  { %950 = vmatprep.subr.bf16.mxu0 %v9423_v53  ;;  %1036 = vmatprep.subr.bf16.mxu1 %v9426_v54  ;;  %v9516_v53 = vld [vmem:[#allocation5 + $0x54c] ss:$16 sps:$4 sm:$0xff]   ;;  %v9511_v54 = vld [vmem:[#allocation5 + $0x540] ss:$16 sps:$4 sm:$0xff]  }
  0xc8   :  { %951 = vmatpush1.bf16.msra.mxu0 %v9421_v55  ;;  %1037 = vmatpush1.bf16.msra.mxu1 %v9424_v56  ;;  %v9514_v55 = vld [vmem:[#allocation5 + $0x548] ss:$16 sps:$4 sm:$0xff]   ;;  %v9519_v56 = vld [vmem:[#allocation5 + $0x564] ss:$16 sps:$4 sm:$0xff]  }
  0xc9   :  { %952 = vmatprep.subr.bf16.mxu0 %v9429_v57  ;;  %1038 = vmatprep.subr.bf16.mxu1 %v9432_v58  ;;  %v9522_v57 = vld [vmem:[#allocation5 + $0x56c] ss:$16 sps:$4 sm:$0xff]   ;;  %v9517_v58 = vld [vmem:[#allocation5 + $0x560] ss:$16 sps:$4 sm:$0xff]  }
  0xcc   :  { %953 = vmatpush1.bf16.msra.mxu0 %v9427_v59  ;;  %1039 = vmatpush1.bf16.msra.mxu1 %v9430_v60  ;;  %v9520_v59 = vld [vmem:[#allocation5 + $0x568] ss:$16 sps:$4 sm:$0xff]   ;;  %v9525_v60 = vld [vmem:[#allocation5 + $0x584] ss:$16 sps:$4 sm:$0xff]  }
  0xcd   :  { %954 = vmatprep.subr.bf16.mxu0 %v9435_v61  ;;  %1040 = vmatprep.subr.bf16.mxu1 %v9438_v62  ;;  %v9528_v61 = vld [vmem:[#allocation5 + $0x58c] ss:$16 sps:$4 sm:$0xff]   ;;  %v9523_v62 = vld [vmem:[#allocation5 + $0x580] ss:$16 sps:$4 sm:$0xff]  }
  0xd0   :  { %955 = vmatpush1.bf16.msra.mxu0 %v9433_v63  ;;  %1041 = vmatpush1.bf16.msra.mxu1 %v9436_v0  ;;  %v9526_v63 = vld [vmem:[#allocation5 + $0x588] ss:$16 sps:$4 sm:$0xff]   ;;  %v9531_v0 = vld [vmem:[#allocation5 + $0x5a4] ss:$16 sps:$4 sm:$0xff]  }
  0xd1   :  { %956 = vmatprep.subr.bf16.mxu0 %v9441_v1  ;;  %1042 = vmatprep.subr.bf16.mxu1 %v9444_v2  ;;  %v9534_v1 = vld [vmem:[#allocation5 + $0x5ac] ss:$16 sps:$4 sm:$0xff]   ;;  %v9529_v2 = vld [vmem:[#allocation5 + $0x5a0] ss:$16 sps:$4 sm:$0xff]  }
  0xd4   :  { %957 = vmatpush1.bf16.msra.mxu0 %v9439_v3  ;;  %1043 = vmatpush1.bf16.msra.mxu1 %v9442_v4  ;;  %v9532_v3 = vld [vmem:[#allocation5 + $0x5a8] ss:$16 sps:$4 sm:$0xff]   ;;  %v9537_v4 = vld [vmem:[#allocation5 + $0x5c4] ss:$16 sps:$4 sm:$0xff]  }
  0xd5   :  { %958 = vmatprep.subr.bf16.mxu0 %v9447_v5  ;;  %1044 = vmatprep.subr.bf16.mxu1 %v9450_v6  ;;  %v9540_v5 = vld [vmem:[#allocation5 + $0x5cc] ss:$16 sps:$4 sm:$0xff]   ;;  %v9535_v6 = vld [vmem:[#allocation5 + $0x5c0] ss:$16 sps:$4 sm:$0xff]  }
  0xd8   :  { %959 = vmatpush1.bf16.msra.mxu0 %v9445_v7  ;;  %1045 = vmatpush1.bf16.msra.mxu1 %v9448_v8  ;;  %v9538_v7 = vld [vmem:[#allocation5 + $0x5c8] ss:$16 sps:$4 sm:$0xff]   ;;  %v9543_v8 = vld [vmem:[#allocation5 + $0x5e4] ss:$16 sps:$4 sm:$0xff]  }
  0xd9   :  { %1861 = vmatprep.subr.bf16.mxu0 %v9453_v11  ;;  %1947 = vmatprep.subr.bf16.mxu1 %v9456_v12  ;;  %v9544_v11 = vld [vmem:[#allocation5 + $0x5e8] ss:$16 sps:$4 sm:$0xff]   ;;  %v9549_v12 = vld [vmem:[#allocation5 + $0x604] ss:$16 sps:$4 sm:$0xff]  }
  0xdb   :  { %961 = vmatmul.mubr.bf16.vlgmr.msra.gmra.mrb[0].mxu0 %v93_v15  ;;  %1047 = vmatmul.mubr.bf16.vlgmr.msra.gmra.mrb[0].mxu1 %v93_v15 }
  0xdc   :  { %1862 = vmatpush1.bf16.msra.mxu0 %v9451_v13  ;;  %1948 = vmatpush1.bf16.msra.mxu1 %v9454_v14  ;;  %v9552_v13 = vld [vmem:[#allocation5 + $0x60c] ss:$16 sps:$4 sm:$0xff]   ;;  %v225_v14 = vlaneseq }
  0xdd   :  { %1863 = vmatprep.subr.bf16.mxu0 %v9459_v16  ;;  %1949 = vmatprep.subr.bf16.mxu1 %v9462_v17  ;;  %v11048_v16 = vld [vmem:[#allocation7] ss:$8 sm:$0xf] }
  0xde   :  { %v11046_v15 = vshrl.u32 %v225_v14, 7  ;;  %v9595_v14 = vld [vmem:[#allocation5 + $0x700] ss:$16 sps:$4 sm:$0xff]  }
  0xe0   :  { %1864 = vmatpush1.bf16.msra.mxu0 %v9457_v18  ;;  %1950 = vmatpush1.bf16.msra.mxu1 %v9460_v19  ;;  %v11051_v17 = vsub.s32 1, %v11046_v15  ;;  %v11054_v18 = vsub.s32 0, %v11046_v15  ;;  %v11057_v19 = vsub.s32 3, %v11046_v15 }
  0xe1   :  { %1865 = vmatprep.subr.bf16.mxu0 %v9465_v20  ;;  %1951 = vmatprep.subr.bf16.mxu1 %v9468_v21 }
  0xe2   :  { %v232_v20 = vrot.slane %v11048_v16, %v11051_v17  ;;  %v228_v21 = vrot.slane %v11048_v16, %v11054_v18 }
  0xe4   :  { %1866 = vmatpush1.bf16.msra.mxu0 %v9463_v22  ;;  %1952 = vmatpush1.bf16.msra.mxu1 %v9466_v23 }
  0xe5   :  { %1867 = vmatprep.subr.bf16.mxu0 %v9471_v24  ;;  %1953 = vmatprep.subr.bf16.mxu1 %v9474_v25  ;;  %v240_v25 = vrot.slane %v11048_v16, %v11057_v19 }
  0xe8   :  { %1868 = vmatpush1.bf16.msra.mxu0 %v9469_v26  ;;  %1954 = vmatpush1.bf16.msra.mxu1 %v9472_v27 }
  0xe9   :  { %1869 = vmatprep.subr.bf16.mxu0 %v9477_v28  ;;  %1955 = vmatprep.subr.bf16.mxu1 %v9480_v29 }
  0xec   :  { %1870 = vmatpush1.bf16.msra.mxu0 %v9475_v30  ;;  %1956 = vmatpush1.bf16.msra.mxu1 %v9478_v31 }
  0xed   :  { %1871 = vmatprep.subr.bf16.mxu0 %v9483_v32  ;;  %1957 = vmatprep.subr.bf16.mxu1 %v9486_v33 }
  0xf0   :  { %1872 = vmatpush1.bf16.msra.mxu0 %v9481_v34  ;;  %1958 = vmatpush1.bf16.msra.mxu1 %v9484_v35 }
  0xf1   :  { %1873 = vmatprep.subr.bf16.mxu0 %v9489_v36  ;;  %1959 = vmatprep.subr.bf16.mxu1 %v9492_v37 }
  0xf4   :  { %1874 = vmatpush1.bf16.msra.mxu0 %v9487_v38  ;;  %1960 = vmatpush1.bf16.msra.mxu1 %v9490_v39 }
  0xf5   :  { %1875 = vmatprep.subr.bf16.mxu0 %v9495_v40  ;;  %1961 = vmatprep.subr.bf16.mxu1 %v9498_v41  ;;  %v9547_v40 = vld [vmem:[#allocation5 + $0x600] ss:$16 sps:$4 sm:$0xff]   ;;  %v9550_v41 = vld [vmem:[#allocation5 + $0x608] ss:$16 sps:$4 sm:$0xff]  }
  0xf8   :  { %1876 = vmatpush1.bf16.msra.mxu0 %v9493_v42  ;;  %1962 = vmatpush1.bf16.msra.mxu1 %v9496_v43 }
  0xf9   :  { %1877 = vmatprep.subr.bf16.mxu0 %v9501_v44  ;;  %1963 = vmatprep.subr.bf16.mxu1 %v9504_v45  ;;  %v9555_v45 = vld [vmem:[#allocation5 + $0x624] ss:$16 sps:$4 sm:$0xff]  }
  0xfc   :  { %1878 = vmatpush1.bf16.msra.mxu0 %v9499_v46  ;;  %1964 = vmatpush1.bf16.msra.mxu1 %v9502_v47  ;;  %v9558_v46 = vld [vmem:[#allocation5 + $0x62c] ss:$16 sps:$4 sm:$0xff]  }
  0xfd   :  { %1879 = vmatprep.subr.bf16.mxu0 %v9507_v48  ;;  %1965 = vmatprep.subr.bf16.mxu1 %v9510_v49  ;;  %v9553_v49 = vld [vmem:[#allocation5 + $0x620] ss:$16 sps:$4 sm:$0xff]  }
 0x100   :  { %1880 = vmatpush1.bf16.msra.mxu0 %v9505_v50  ;;  %1966 = vmatpush1.bf16.msra.mxu1 %v9508_v51  ;;  %v9556_v50 = vld [vmem:[#allocation5 + $0x628] ss:$16 sps:$4 sm:$0xff]  }
 0x101   :  { %1881 = vmatprep.subr.bf16.mxu0 %v9513_v52  ;;  %1967 = vmatprep.subr.bf16.mxu1 %v9516_v53  ;;  %v9561_v52 = vld [vmem:[#allocation5 + $0x644] ss:$16 sps:$4 sm:$0xff]   ;;  %v9564_v53 = vld [vmem:[#allocation5 + $0x64c] ss:$16 sps:$4 sm:$0xff]  }
 0x104   :  { %1882 = vmatpush1.bf16.msra.mxu0 %v9511_v54  ;;  %1968 = vmatpush1.bf16.msra.mxu1 %v9514_v55  ;;  %v9559_v54 = vld [vmem:[#allocation5 + $0x640] ss:$16 sps:$4 sm:$0xff]   ;;  %v9562_v55 = vld [vmem:[#allocation5 + $0x648] ss:$16 sps:$4 sm:$0xff]  }
 0x105   :  { %1883 = vmatprep.subr.bf16.mxu0 %v9519_v56  ;;  %1969 = vmatprep.subr.bf16.mxu1 %v9522_v57  ;;  %v9567_v56 = vld [vmem:[#allocation5 + $0x664] ss:$16 sps:$4 sm:$0xff]   ;;  %v9570_v57 = vld [vmem:[#allocation5 + $0x66c] ss:$16 sps:$4 sm:$0xff]  }
 0x108   :  { %1884 = vmatpush1.bf16.msra.mxu0 %v9517_v58  ;;  %1970 = vmatpush1.bf16.msra.mxu1 %v9520_v59  ;;  %v9565_v58 = vld [vmem:[#allocation5 + $0x660] ss:$16 sps:$4 sm:$0xff]   ;;  %v9568_v59 = vld [vmem:[#allocation5 + $0x668] ss:$16 sps:$4 sm:$0xff]  }
 0x109   :  { %1885 = vmatprep.subr.bf16.mxu0 %v9525_v60  ;;  %1971 = vmatprep.subr.bf16.mxu1 %v9528_v61  ;;  %v9573_v60 = vld [vmem:[#allocation5 + $0x684] ss:$16 sps:$4 sm:$0xff]   ;;  %v9576_v61 = vld [vmem:[#allocation5 + $0x68c] ss:$16 sps:$4 sm:$0xff]  }
 0x10c   :  { %1886 = vmatpush1.bf16.msra.mxu0 %v9523_v62  ;;  %1972 = vmatpush1.bf16.msra.mxu1 %v9526_v63  ;;  %v9571_v62 = vld [vmem:[#allocation5 + $0x680] ss:$16 sps:$4 sm:$0xff]   ;;  %v9574_v63 = vld [vmem:[#allocation5 + $0x688] ss:$16 sps:$4 sm:$0xff]  }
 0x10d   :  { %1887 = vmatprep.subr.bf16.mxu0 %v9531_v0  ;;  %1973 = vmatprep.subr.bf16.mxu1 %v9534_v1  ;;  %v9579_v0 = vld [vmem:[#allocation5 + $0x6a4] ss:$16 sps:$4 sm:$0xff]   ;;  %v9582_v1 = vld [vmem:[#allocation5 + $0x6ac] ss:$16 sps:$4 sm:$0xff]  }
 0x110   :  { %1888 = vmatpush1.bf16.msra.mxu0 %v9529_v2  ;;  %1974 = vmatpush1.bf16.msra.mxu1 %v9532_v3  ;;  %v9577_v2 = vld [vmem:[#allocation5 + $0x6a0] ss:$16 sps:$4 sm:$0xff]   ;;  %v9580_v3 = vld [vmem:[#allocation5 + $0x6a8] ss:$16 sps:$4 sm:$0xff]  }
 0x111   :  { %1889 = vmatprep.subr.bf16.mxu0 %v9537_v4  ;;  %1975 = vmatprep.subr.bf16.mxu1 %v9540_v5  ;;  %v9585_v4 = vld [vmem:[#allocation5 + $0x6c4] ss:$16 sps:$4 sm:$0xff]   ;;  %v9588_v5 = vld [vmem:[#allocation5 + $0x6cc] ss:$16 sps:$4 sm:$0xff]  }
 0x114   :  { %1890 = vmatpush1.bf16.msra.mxu0 %v9535_v6  ;;  %1976 = vmatpush1.bf16.msra.mxu1 %v9538_v7  ;;  %v9583_v6 = vld [vmem:[#allocation5 + $0x6c0] ss:$16 sps:$4 sm:$0xff]   ;;  %v9586_v7 = vld [vmem:[#allocation5 + $0x6c8] ss:$16 sps:$4 sm:$0xff]  }
 0x115   :  { %1891 = vmatprep.subr.bf16.mxu0 %v9543_v8  ;;  %1977 = vmatprep.subr.bf16.mxu1 %v9546_v9  ;;  %v9591_v8 = vld [vmem:[#allocation5 + $0x6e4] ss:$16 sps:$4 sm:$0xff]   ;;  %v9594_v9 = vld [vmem:[#allocation5 + $0x6ec] ss:$16 sps:$4 sm:$0xff]  }
 0x118   :  { %1892 = vmatpush1.bf16.msra.mxu0 %v9541_v10  ;;  %1978 = vmatpush1.bf16.msra.mxu1 %v9544_v11  ;;  %v9589_v10 = vld [vmem:[#allocation5 + $0x6e0] ss:$16 sps:$4 sm:$0xff]   ;;  %v9592_v11 = vld [vmem:[#allocation5 + $0x6e8] ss:$16 sps:$4 sm:$0xff]  }
 0x119   :  { %1904 = vmatprep.subr.bf16.mxu0 %v9549_v12  ;;  %1990 = vmatprep.subr.bf16.mxu1 %v9552_v13  ;;  %v9597_v12 = vld [vmem:[#allocation5 + $0x704] ss:$16 sps:$4 sm:$0xff]   ;;  %v9600_v13 = vld [vmem:[#allocation5 + $0x70c] ss:$16 sps:$4 sm:$0xff]  }
 0x1ae   :  { %v962_v22 = vpop.f32.mrb[0].mxu0  ;;  %v11063_v23 = vpop.f32.mrb[0].mxu1 }
 0x1af   :  { %v964_v24 = vpop.f32.mrb[1].mxu0  ;;  %v1050_v26 = vpop.f32.mrb[1].mxu1  ;;  %v11071_v30 = vadd.f32 %v962_v22, %v228_v21  ;;  %v9606_v22 = vld [vmem:[#allocation5 + $0x72c] ss:$16 sps:$4 sm:$0xff]  }
 0x1b0   :  { %v11067_v27 = vadd.f32 %v964_v24, %v232_v20  ;;  %v966_v28 = vpop.f32.mrb[2].mxu0  ;;  %v11069_v29 = vpop.f32.mrb[2].mxu1  ;;  %v11079_v36 = vadd.f32 %v1050_v26, %v240_v25  ;;  %v9601_v24 = vld [vmem:[#allocation5 + $0x720] ss:$16 sps:$4 sm:$0xff]   ;;  %v9609_v26 = vld [vmem:[#allocation5 + $0x744] ss:$16 sps:$4 sm:$0xff]  }
 0x1b1   :  { %v11073_v31 = vadd.f32 %v966_v28, %v228_v21  ;;  %v968_v32 = vpop.f32.mrb[3].mxu0  ;;  %v1054_v33 = vpop.f32.mrb[3].mxu1  ;;  %v1057_v42 = vmax.f32 %v11071_v30, 0.0  ;;  %v9603_v21 = vld [vmem:[#allocation5 + $0x724] ss:$16 sps:$4 sm:$0xff]  }
 0x1b2   :  { %v11075_v34 = vadd.f32 %v968_v32, %v232_v20  ;;  %v11077_v35 = vadd.f32 %v1054_v33, %v240_v25  ;;  %v1058_v38 = vmax.f32 %v11067_v27, 0.0  ;;  %v1060_v47 = vmax.f32 %v11079_v36, 0.0  ;;  %v9598_v20 = vld [vmem:[#allocation5 + $0x708] ss:$16 sps:$4 sm:$0xff]   ;;  %v9612_v28 = vld [vmem:[#allocation5 + $0x74c] ss:$16 sps:$4 sm:$0xff]  }
 0x1b3   :  { %v1061_v37 = vmax.f32 %v11073_v31, 0.0  ;;  %v9604_v25 = vld [vmem:[#allocation5 + $0x728] ss:$16 sps:$4 sm:$0xff]   ;;  %v9607_v32 = vld [vmem:[#allocation5 + $0x740] ss:$16 sps:$4 sm:$0xff]  }
 0x1b4   :  { %v1062_v39 = vmax.f32 %v11075_v34, 0.0  ;;  %v1064_v43 = vmax.f32 %v11077_v35, 0.0  ;;  %v9610_v33 = vld [vmem:[#allocation5 + $0x748] ss:$16 sps:$4 sm:$0xff]  }
 0x1b5   :  { %v1065_v48 = vpack.c.bf16 %v1061_v37, %v1057_v42  ;;  %v9615_v37 = vld [vmem:[#allocation5 + $0x764] ss:$16 sps:$4 sm:$0xff]   ;;  %v9624_v42 = vld [vmem:[#allocation5 + $0x78c] ss:$16 sps:$4 sm:$0xff]  }
 0x1b6   :  { %v1066_v44 = vpack.c.bf16 %v1062_v39, %v1058_v38  ;;  %v1068_v51 = vpack.c.bf16 %v1064_v43, %v1060_v47  ;;  %v9618_v38 = vld [vmem:[#allocation5 + $0x76c] ss:$16 sps:$4 sm:$0xff]   ;;  %v9613_v39 = vld [vmem:[#allocation5 + $0x760] ss:$16 sps:$4 sm:$0xff]  }
 0x1b7   :  { %v9619_v43 = vld [vmem:[#allocation5 + $0x780] ss:$16 sps:$4 sm:$0xff]  }
 0x1b8   :  { %1893 = vmatprep.mubr.bf16.mxu0 %v1066_v44  ;;  %1979 = vmatprep.mubr.bf16.mxu1 %v1066_v44  ;;  %v9622_v44 = vld [vmem:[#allocation5 + $0x788] ss:$16 sps:$4 sm:$0xff]   ;;  %v9625_v47 = vld [vmem:[#allocation5 + $0x7a0] ss:$16 sps:$4 sm:$0xff]  }
 0x1b9   :  { %1894 = vmatmul.mubr.bf16.vlgmr.msra.gmra.mrb[4].mxu0 %v1065_v48  ;;  %1980 = vmatmul.mubr.bf16.vlgmr.msra.gmra.mrb[4].mxu1 %v1065_v48  ;;  %v9628_v48 = vld [vmem:[#allocation5 + $0x7a8] ss:$16 sps:$4 sm:$0xff]  }
 0x1ba   :  { %1905 = vmatpush1.bf16.msra.mxu0 %v9547_v40  ;;  %1991 = vmatpush1.bf16.msra.mxu1 %v9550_v41  ;;  %v9616_v40 = vld [vmem:[#allocation5 + $0x768] ss:$16 sps:$4 sm:$0xff]   ;;  %v9621_v41 = vld [vmem:[#allocation5 + $0x784] ss:$16 sps:$4 sm:$0xff]  }
 0x1bb   :  { %1936 = vmatprep.mubr.bf16.mxu0 %v1068_v51  ;;  %2022 = vmatprep.mubr.bf16.mxu1 %v1068_v51  ;;  %v9636_v51 = vld [vmem:[#allocation5 + $0x7cc] ss:$16 sps:$4 sm:$0xff]  }
 0x1bc   :  { %1906 = vmatprep.subr.bf16.mxu0 %v9555_v45  ;;  %1992 = vmatprep.subr.bf16.mxu1 %v9558_v46  ;;  %v9627_v45 = vld [vmem:[#allocation5 + $0x7a4] ss:$16 sps:$4 sm:$0xff]   ;;  %v9630_v46 = vld [vmem:[#allocation5 + $0x7ac] ss:$16 sps:$4 sm:$0xff]  }
 0x1be   :  { %1907 = vmatpush1.bf16.msra.mxu0 %v9553_v49  ;;  %1993 = vmatpush1.bf16.msra.mxu1 %v9556_v50  ;;  %v11088_v49 = vsub.s32 2, %v11046_v15  ;;  %v9633_v50 = vld [vmem:[#allocation5 + $0x7c4] ss:$16 sps:$4 sm:$0xff]   ;;  %v9637_v15 = vld [vmem:[#allocation5 + $0x7e0] ss:$16 sps:$4 sm:$0xff]  }
 0x1bf   :  { %1908 = vmatprep.subr.bf16.mxu0 %v9561_v52  ;;  %1994 = vmatprep.subr.bf16.mxu1 %v9564_v53  ;;  %v9631_v52 = vld [vmem:[#allocation5 + $0x7c0] ss:$16 sps:$4 sm:$0xff]   ;;  %v9634_v53 = vld [vmem:[#allocation5 + $0x7c8] ss:$16 sps:$4 sm:$0xff]  }
 0x1c2   :  { %1909 = vmatpush1.bf16.msra.mxu0 %v9559_v54  ;;  %1995 = vmatpush1.bf16.msra.mxu1 %v9562_v55  ;;  %v236_v54 = vrot.slane %v11048_v16, %v11088_v49  ;;  %v9639_v55 = vld [vmem:[#allocation5 + $0x7e4] ss:$16 sps:$4 sm:$0xff]  }
 0x1c3   :  { %1910 = vmatprep.subr.bf16.mxu0 %v9567_v56  ;;  %1996 = vmatprep.subr.bf16.mxu1 %v9570_v57  ;;  %v9642_v56 = vld [vmem:[#allocation5 + $0x7ec] ss:$16 sps:$4 sm:$0xff]  }
 0x1c4   :  { %v11093_v57 = vadd.f32 %v11069_v29, %v236_v54 }
 0x1c6   :  { %1911 = vmatpush1.bf16.msra.mxu0 %v9565_v58  ;;  %1997 = vmatpush1.bf16.msra.mxu1 %v9568_v59  ;;  %v9640_v58 = vld [vmem:[#allocation5 + $0x7e8] ss:$16 sps:$4 sm:$0xff]   ;;  %v11096_v59 = vadd.f32 %v11063_v23, %v236_v54  ;;  %v1063_v16 = vmax.f32 %v11093_v57, 0.0  ;;  %v9649_v23 = vld [vmem:[#allocation5 + $0x820] ss:$16 sps:$4 sm:$0xff]  }
 0x1c7   :  { %1912 = vmatprep.subr.bf16.mxu0 %v9573_v60  ;;  %1998 = vmatprep.subr.bf16.mxu1 %v9576_v61  ;;  %v9645_v60 = vld [vmem:[#allocation5 + $0x804] ss:$16 sps:$4 sm:$0xff]   ;;  %v9648_v61 = vld [vmem:[#allocation5 + $0x80c] ss:$16 sps:$4 sm:$0xff]  }
 0x1c8   :  { %v1059_v29 = vmax.f32 %v11096_v59, 0.0  ;;  %v9711_v54 = vld [vmem:[#allocation5 + $0x964] ss:$16 sps:$4 sm:$0xff]  }
 0x1ca   :  { %1913 = vmatpush1.bf16.msra.mxu0 %v9571_v62  ;;  %1999 = vmatpush1.bf16.msra.mxu1 %v9574_v63  ;;  %v9643_v62 = vld [vmem:[#allocation5 + $0x800] ss:$16 sps:$4 sm:$0xff]   ;;  %v9646_v63 = vld [vmem:[#allocation5 + $0x808] ss:$16 sps:$4 sm:$0xff]  }
 0x1cb   :  { %1914 = vmatprep.subr.bf16.mxu0 %v9579_v0  ;;  %2000 = vmatprep.subr.bf16.mxu1 %v9582_v1  ;;  %v9651_v0 = vld [vmem:[#allocation5 + $0x824] ss:$16 sps:$4 sm:$0xff]   ;;  %v9654_v1 = vld [vmem:[#allocation5 + $0x82c] ss:$16 sps:$4 sm:$0xff]  }
 0x1ce   :  { %1915 = vmatpush1.bf16.msra.mxu0 %v9577_v2  ;;  %2001 = vmatpush1.bf16.msra.mxu1 %v9580_v3  ;;  %v1067_v2 = vpack.c.bf16 %v1063_v16, %v1059_v29  ;;  %v9652_v3 = vld [vmem:[#allocation5 + $0x828] ss:$16 sps:$4 sm:$0xff]   ;;  %v9721_v29 = vld [vmem:[#allocation5 + $0x9a0] ss:$16 sps:$4 sm:$0xff]  }
 0x1cf   :  { %1916 = vmatprep.subr.bf16.mxu0 %v9585_v4  ;;  %2002 = vmatprep.subr.bf16.mxu1 %v9588_v5  ;;  %v9657_v4 = vld [vmem:[#allocation5 + $0x844] ss:$16 sps:$4 sm:$0xff]   ;;  %v9660_v5 = vld [vmem:[#allocation5 + $0x84c] ss:$16 sps:$4 sm:$0xff]   ;;  %v9718_v16 = vld [vmem:[#allocation5 + $0x988] ss:$16 sps:$4 sm:$0xff]  }
 0x1d2   :  { %1917 = vmatpush1.bf16.msra.mxu0 %v9583_v6  ;;  %2003 = vmatpush1.bf16.msra.mxu1 %v9586_v7  ;;  %v9655_v6 = vld [vmem:[#allocation5 + $0x840] ss:$16 sps:$4 sm:$0xff]   ;;  %v9658_v7 = vld [vmem:[#allocation5 + $0x848] ss:$16 sps:$4 sm:$0xff]  }
 0x1d3   :  { %1918 = vmatprep.subr.bf16.mxu0 %v9591_v8  ;;  %2004 = vmatprep.subr.bf16.mxu1 %v9594_v9  ;;  %v9663_v8 = vld [vmem:[#allocation5 + $0x864] ss:$16 sps:$4 sm:$0xff]   ;;  %v9666_v9 = vld [vmem:[#allocation5 + $0x86c] ss:$16 sps:$4 sm:$0xff]  }
 0x1d6   :  { %1919 = vmatpush1.bf16.msra.mxu0 %v9589_v10  ;;  %2005 = vmatpush1.bf16.msra.mxu1 %v9592_v11  ;;  %v9661_v10 = vld [vmem:[#allocation5 + $0x860] ss:$16 sps:$4 sm:$0xff]   ;;  %v9664_v11 = vld [vmem:[#allocation5 + $0x868] ss:$16 sps:$4 sm:$0xff]  }
 0x1d7   :  { %1920 = vmatprep.subr.bf16.mxu0 %v9597_v12  ;;  %2006 = vmatprep.subr.bf16.mxu1 %v9600_v13  ;;  %v9669_v12 = vld [vmem:[#allocation5 + $0x884] ss:$16 sps:$4 sm:$0xff]   ;;  %v9672_v13 = vld [vmem:[#allocation5 + $0x88c] ss:$16 sps:$4 sm:$0xff]  }
 0x1da   :  { %1921 = vmatpush1.bf16.msra.mxu0 %v9595_v14  ;;  %2007 = vmatpush1.bf16.msra.mxu1 %v9598_v20  ;;  %v9667_v14 = vld [vmem:[#allocation5 + $0x880] ss:$16 sps:$4 sm:$0xff]   ;;  %v9670_v20 = vld [vmem:[#allocation5 + $0x888] ss:$16 sps:$4 sm:$0xff]  }
 0x1db   :  { %1922 = vmatprep.subr.bf16.mxu0 %v9603_v21  ;;  %2008 = vmatprep.subr.bf16.mxu1 %v9606_v22  ;;  %v9675_v21 = vld [vmem:[#allocation5 + $0x8a4] ss:$16 sps:$4 sm:$0xff]   ;;  %v9678_v22 = vld [vmem:[#allocation5 + $0x8ac] ss:$16 sps:$4 sm:$0xff]  }
 0x1de   :  { %1923 = vmatpush1.bf16.msra.mxu0 %v9601_v24  ;;  %2009 = vmatpush1.bf16.msra.mxu1 %v9604_v25  ;;  %v9673_v24 = vld [vmem:[#allocation5 + $0x8a0] ss:$16 sps:$4 sm:$0xff]   ;;  %v9676_v25 = vld [vmem:[#allocation5 + $0x8a8] ss:$16 sps:$4 sm:$0xff]  }
 0x1df   :  { %1924 = vmatprep.subr.bf16.mxu0 %v9609_v26  ;;  %2010 = vmatprep.subr.bf16.mxu1 %v9612_v28  ;;  %v9681_v26 = vld [vmem:[#allocation5 + $0x8c4] ss:$16 sps:$4 sm:$0xff]   ;;  %v9684_v28 = vld [vmem:[#allocation5 + $0x8cc] ss:$16 sps:$4 sm:$0xff]  }
 0x1e2   :  { %1925 = vmatpush1.bf16.msra.mxu0 %v9607_v32  ;;  %2011 = vmatpush1.bf16.msra.mxu1 %v9610_v33  ;;  %v9679_v32 = vld [vmem:[#allocation5 + $0x8c0] ss:$16 sps:$4 sm:$0xff]   ;;  %v9682_v33 = vld [vmem:[#allocation5 + $0x8c8] ss:$16 sps:$4 sm:$0xff]  }
 0x1e3   :  { %1926 = vmatprep.subr.bf16.mxu0 %v9615_v37  ;;  %2012 = vmatprep.subr.bf16.mxu1 %v9618_v38  ;;  %v9687_v37 = vld [vmem:[#allocation5 + $0x8e4] ss:$16 sps:$4 sm:$0xff]   ;;  %v9690_v38 = vld [vmem:[#allocation5 + $0x8ec] ss:$16 sps:$4 sm:$0xff]  }
 0x1e6   :  { %1927 = vmatpush1.bf16.msra.mxu0 %v9613_v39  ;;  %2013 = vmatpush1.bf16.msra.mxu1 %v9616_v40  ;;  %v9685_v39 = vld [vmem:[#allocation5 + $0x8e0] ss:$16 sps:$4 sm:$0xff]   ;;  %v9688_v40 = vld [vmem:[#allocation5 + $0x8e8] ss:$16 sps:$4 sm:$0xff]  }
 0x1e7   :  { %1928 = vmatprep.subr.bf16.mxu0 %v9621_v41  ;;  %2014 = vmatprep.subr.bf16.mxu1 %v9624_v42  ;;  %v9693_v41 = vld [vmem:[#allocation5 + $0x904] ss:$16 sps:$4 sm:$0xff]   ;;  %v9696_v42 = vld [vmem:[#allocation5 + $0x90c] ss:$16 sps:$4 sm:$0xff]  }
 0x1ea   :  { %1929 = vmatpush1.bf16.msra.mxu0 %v9619_v43  ;;  %2015 = vmatpush1.bf16.msra.mxu1 %v9622_v44  ;;  %v9691_v43 = vld [vmem:[#allocation5 + $0x900] ss:$16 sps:$4 sm:$0xff]   ;;  %v9694_v44 = vld [vmem:[#allocation5 + $0x908] ss:$16 sps:$4 sm:$0xff]  }
 0x1eb   :  { %1930 = vmatprep.subr.bf16.mxu0 %v9627_v45  ;;  %2016 = vmatprep.subr.bf16.mxu1 %v9630_v46  ;;  %v9699_v45 = vld [vmem:[#allocation5 + $0x924] ss:$16 sps:$4 sm:$0xff]   ;;  %v9702_v46 = vld [vmem:[#allocation5 + $0x92c] ss:$16 sps:$4 sm:$0xff]  }
 0x1ee   :  { %1931 = vmatpush1.bf16.msra.mxu0 %v9625_v47  ;;  %2017 = vmatpush1.bf16.msra.mxu1 %v9628_v48  ;;  %v9697_v47 = vld [vmem:[#allocation5 + $0x920] ss:$16 sps:$4 sm:$0xff]   ;;  %v9700_v48 = vld [vmem:[#allocation5 + $0x928] ss:$16 sps:$4 sm:$0xff]  }
 0x1ef   :  { %1932 = vmatprep.subr.bf16.mxu0 %v9633_v50  ;;  %2018 = vmatprep.subr.bf16.mxu1 %v9636_v51  ;;  %v9705_v50 = vld [vmem:[#allocation5 + $0x944] ss:$16 sps:$4 sm:$0xff]   ;;  %v9708_v51 = vld [vmem:[#allocation5 + $0x94c] ss:$16 sps:$4 sm:$0xff]  }
 0x1f2   :  { %1933 = vmatpush1.bf16.msra.mxu0 %v9631_v52  ;;  %2019 = vmatpush1.bf16.msra.mxu1 %v9634_v53  ;;  %v9703_v52 = vld [vmem:[#allocation5 + $0x940] ss:$16 sps:$4 sm:$0xff]   ;;  %v9706_v53 = vld [vmem:[#allocation5 + $0x948] ss:$16 sps:$4 sm:$0xff]  }
 0x1f3   :  { %1934 = vmatprep.subr.bf16.mxu0 %v9639_v55  ;;  %2020 = vmatprep.subr.bf16.mxu1 %v9642_v56  ;;  %v9714_v55 = vld [vmem:[#allocation5 + $0x96c] ss:$16 sps:$4 sm:$0xff]   ;;  %v9709_v56 = vld [vmem:[#allocation5 + $0x960] ss:$16 sps:$4 sm:$0xff]  }
 0x1f6   :  { %1935 = vmatpush1.bf16.msra.mxu0 %v9637_v15  ;;  %2021 = vmatpush1.bf16.msra.mxu1 %v9640_v58  ;;  %v9712_v15 = vld [vmem:[#allocation5 + $0x968] ss:$16 sps:$4 sm:$0xff]   ;;  %v9717_v58 = vld [vmem:[#allocation5 + $0x984] ss:$16 sps:$4 sm:$0xff]  }
 0x1f7   :  { %2837 = vmatprep.subr.bf16.mxu0 %v9645_v60  ;;  %2923 = vmatprep.subr.bf16.mxu1 %v9648_v61  ;;  %v9720_v60 = vld [vmem:[#allocation5 + $0x98c] ss:$16 sps:$4 sm:$0xff]   ;;  %v9715_v61 = vld [vmem:[#allocation5 + $0x980] ss:$16 sps:$4 sm:$0xff]  }
 0x1f9   :  { %1937 = vmatmul.mubr.bf16.vlgmr.msra.gmra.mrb[4].mxu0 %v1067_v2  ;;  %2023 = vmatmul.mubr.bf16.vlgmr.msra.gmra.mrb[4].mxu1 %v1067_v2  ;;  %v9732_v2 = vld [vmem:[#allocation5 + $0x9cc] ss:$16 sps:$4 sm:$0xff]  }
 0x1fa   :  { %2838 = vmatpush1.bf16.msra.mxu0 %v9643_v62  ;;  %2924 = vmatpush1.bf16.msra.mxu1 %v9646_v63  ;;  %v9723_v62 = vld [vmem:[#allocation5 + $0x9a4] ss:$16 sps:$4 sm:$0xff]   ;;  %v9726_v63 = vld [vmem:[#allocation5 + $0x9ac] ss:$16 sps:$4 sm:$0xff]  }
 0x1fb   :  { %2839 = vmatprep.subr.bf16.mxu0 %v9651_v0  ;;  %2925 = vmatprep.subr.bf16.mxu1 %v9654_v1  ;;  %v9724_v0 = vld [vmem:[#allocation5 + $0x9a8] ss:$16 sps:$4 sm:$0xff]   ;;  %v9729_v1 = vld [vmem:[#allocation5 + $0x9c4] ss:$16 sps:$4 sm:$0xff]  }
 0x1fe   :  { %2840 = vmatpush1.bf16.msra.mxu0 %v9649_v23  ;;  %2926 = vmatpush1.bf16.msra.mxu1 %v9652_v3  ;;  %v9727_v23 = vld [vmem:[#allocation5 + $0x9c0] ss:$16 sps:$4 sm:$0xff]   ;;  %v9730_v3 = vld [vmem:[#allocation5 + $0x9c8] ss:$16 sps:$4 sm:$0xff]  }
 0x1ff   :  { %2841 = vmatprep.subr.bf16.mxu0 %v9657_v4  ;;  %2927 = vmatprep.subr.bf16.mxu1 %v9660_v5  ;;  %v9735_v4 = vld [vmem:[#allocation5 + $0x9e4] ss:$16 sps:$4 sm:$0xff]   ;;  %v9738_v5 = vld [vmem:[#allocation5 + $0x9ec] ss:$16 sps:$4 sm:$0xff]  }
 0x202   :  { %2842 = vmatpush1.bf16.msra.mxu0 %v9655_v6  ;;  %2928 = vmatpush1.bf16.msra.mxu1 %v9658_v7  ;;  %v9733_v6 = vld [vmem:[#allocation5 + $0x9e0] ss:$16 sps:$4 sm:$0xff]   ;;  %v9736_v7 = vld [vmem:[#allocation5 + $0x9e8] ss:$16 sps:$4 sm:$0xff]  }
 0x203   :  { %2843 = vmatprep.subr.bf16.mxu0 %v9663_v8  ;;  %2929 = vmatprep.subr.bf16.mxu1 %v9666_v9  ;;  %v9741_v8 = vld [vmem:[#allocation5 + $0xa04] ss:$16 sps:$4 sm:$0xff]   ;;  %v9744_v9 = vld [vmem:[#allocation5 + $0xa0c] ss:$16 sps:$4 sm:$0xff]  }
 0x206   :  { %2844 = vmatpush1.bf16.msra.mxu0 %v9661_v10  ;;  %2930 = vmatpush1.bf16.msra.mxu1 %v9664_v11  ;;  %v1199_v10 = vld [vmem:[#allocation7 + $0x1] ss:$8 sm:$0xf] }
 0x207   :  { %2845 = vmatprep.subr.bf16.mxu0 %v9669_v12  ;;  %2931 = vmatprep.subr.bf16.mxu1 %v9672_v13  ;;  %v1204_v11 = vrot.slane %v1199_v10, %v11054_v18  ;;  %v1212_v12 = vrot.slane %v1199_v10, %v11088_v49  ;;  %v1208_v13 = vrot.slane %v1199_v10, %v11051_v17 }
 0x20a   :  { %2846 = vmatpush1.bf16.msra.mxu0 %v9667_v14  ;;  %2932 = vmatpush1.bf16.msra.mxu1 %v9670_v20  ;;  %v1216_v14 = vrot.slane %v1199_v10, %v11057_v19  ;;  %v9774_v10 = vld [vmem:[#allocation5 + $0xaac] ss:$16 sps:$4 sm:$0xff]  }
 0x20b   :  { %2847 = vmatprep.subr.bf16.mxu0 %v9675_v21  ;;  %2933 = vmatprep.subr.bf16.mxu1 %v9678_v22 }
 0x20e   :  { %2848 = vmatpush1.bf16.msra.mxu0 %v9673_v24  ;;  %2934 = vmatpush1.bf16.msra.mxu1 %v9676_v25 }
 0x20f   :  { %2849 = vmatprep.subr.bf16.mxu0 %v9681_v26  ;;  %2935 = vmatprep.subr.bf16.mxu1 %v9684_v28 }
 0x212   :  { %2850 = vmatpush1.bf16.msra.mxu0 %v9679_v32  ;;  %2936 = vmatpush1.bf16.msra.mxu1 %v9682_v33 }
 0x213   :  { %2851 = vmatprep.subr.bf16.mxu0 %v9687_v37  ;;  %2937 = vmatprep.subr.bf16.mxu1 %v9690_v38 }
 0x216   :  { %2852 = vmatpush1.bf16.msra.mxu0 %v9685_v39  ;;  %2938 = vmatpush1.bf16.msra.mxu1 %v9688_v40 }
 0x217   :  { %2853 = vmatprep.subr.bf16.mxu0 %v9693_v41  ;;  %2939 = vmatprep.subr.bf16.mxu1 %v9696_v42 }
 0x21a   :  { %2854 = vmatpush1.bf16.msra.mxu0 %v9691_v43  ;;  %2940 = vmatpush1.bf16.msra.mxu1 %v9694_v44 }
 0x21b   :  { %2855 = vmatprep.subr.bf16.mxu0 %v9699_v45  ;;  %2941 = vmatprep.subr.bf16.mxu1 %v9702_v46 }
 0x21e   :  { %2856 = vmatpush1.bf16.msra.mxu0 %v9697_v47  ;;  %2942 = vmatpush1.bf16.msra.mxu1 %v9700_v48 }
 0x21f   :  { %2857 = vmatprep.subr.bf16.mxu0 %v9705_v50  ;;  %2943 = vmatprep.subr.bf16.mxu1 %v9708_v51 }
 0x222   :  { %2858 = vmatpush1.bf16.msra.mxu0 %v9703_v52  ;;  %2944 = vmatpush1.bf16.msra.mxu1 %v9706_v53 }
 0x223   :  { %2859 = vmatprep.subr.bf16.mxu0 %v9711_v54  ;;  %2945 = vmatprep.subr.bf16.mxu1 %v9714_v55 }
 0x226   :  { %2860 = vmatpush1.bf16.msra.mxu0 %v9709_v56  ;;  %2946 = vmatpush1.bf16.msra.mxu1 %v9712_v15  ;;  %v9739_v15 = vld [vmem:[#allocation5 + $0xa00] ss:$16 sps:$4 sm:$0xff]  }
 0x227   :  { %2861 = vmatprep.subr.bf16.mxu0 %v9717_v58  ;;  %2947 = vmatprep.subr.bf16.mxu1 %v9720_v60  ;;  %v9742_v58 = vld [vmem:[#allocation5 + $0xa08] ss:$16 sps:$4 sm:$0xff]   ;;  %v9747_v60 = vld [vmem:[#allocation5 + $0xa24] ss:$16 sps:$4 sm:$0xff]  }
 0x22a   :  { %2862 = vmatpush1.bf16.msra.mxu0 %v9715_v61  ;;  %2948 = vmatpush1.bf16.msra.mxu1 %v9718_v16  ;;  %v9750_v61 = vld [vmem:[#allocation5 + $0xa2c] ss:$16 sps:$4 sm:$0xff]   ;;  %v9745_v16 = vld [vmem:[#allocation5 + $0xa20] ss:$16 sps:$4 sm:$0xff]  }
 0x22b   :  { %2863 = vmatprep.subr.bf16.mxu0 %v9723_v62  ;;  %2949 = vmatprep.subr.bf16.mxu1 %v9726_v63  ;;  %v9748_v62 = vld [vmem:[#allocation5 + $0xa28] ss:$16 sps:$4 sm:$0xff]   ;;  %v9753_v63 = vld [vmem:[#allocation5 + $0xa44] ss:$16 sps:$4 sm:$0xff]  }
 0x22e   :  { %2864 = vmatpush1.bf16.msra.mxu0 %v9721_v29  ;;  %2950 = vmatpush1.bf16.msra.mxu1 %v9724_v0  ;;  %v9756_v29 = vld [vmem:[#allocation5 + $0xa4c] ss:$16 sps:$4 sm:$0xff]   ;;  %v9751_v0 = vld [vmem:[#allocation5 + $0xa40] ss:$16 sps:$4 sm:$0xff]  }
 0x22f   :  { %2865 = vmatprep.subr.bf16.mxu0 %v9729_v1  ;;  %2951 = vmatprep.subr.bf16.mxu1 %v9732_v2  ;;  %v9754_v1 = vld [vmem:[#allocation5 + $0xa48] ss:$16 sps:$4 sm:$0xff]   ;;  %v9759_v2 = vld [vmem:[#allocation5 + $0xa64] ss:$16 sps:$4 sm:$0xff]  }
 0x232   :  { %2866 = vmatpush1.bf16.msra.mxu0 %v9727_v23  ;;  %2952 = vmatpush1.bf16.msra.mxu1 %v9730_v3  ;;  %v9762_v23 = vld [vmem:[#allocation5 + $0xa6c] ss:$16 sps:$4 sm:$0xff]   ;;  %v9757_v3 = vld [vmem:[#allocation5 + $0xa60] ss:$16 sps:$4 sm:$0xff]  }
 0x233   :  { %2867 = vmatprep.subr.bf16.mxu0 %v9735_v4  ;;  %2953 = vmatprep.subr.bf16.mxu1 %v9738_v5  ;;  %v9760_v4 = vld [vmem:[#allocation5 + $0xa68] ss:$16 sps:$4 sm:$0xff]   ;;  %v9765_v5 = vld [vmem:[#allocation5 + $0xa84] ss:$16 sps:$4 sm:$0xff]  }
 0x236   :  { %2868 = vmatpush1.bf16.msra.mxu0 %v9733_v6  ;;  %2954 = vmatpush1.bf16.msra.mxu1 %v9736_v7  ;;  %v9768_v6 = vld [vmem:[#allocation5 + $0xa8c] ss:$16 sps:$4 sm:$0xff]   ;;  %v9763_v7 = vld [vmem:[#allocation5 + $0xa80] ss:$16 sps:$4 sm:$0xff]  }
 0x237   :  { %2880 = vmatprep.subr.bf16.mxu0 %v9741_v8  ;;  %2966 = vmatprep.subr.bf16.mxu1 %v9744_v9  ;;  %v9766_v8 = vld [vmem:[#allocation5 + $0xa88] ss:$16 sps:$4 sm:$0xff]   ;;  %v9771_v9 = vld [vmem:[#allocation5 + $0xaa4] ss:$16 sps:$4 sm:$0xff]  }
 0x2cc   :  { %v1938_v20 = vpop.f32.mrb[4].mxu0  ;;  %v2024_v21 = vpop.f32.mrb[4].mxu1 }
 0x2cd   :  { %v9129_v22 = vadd.f32 %v1938_v20, %v1204_v11  ;;  %v9133_v24 = vadd.f32 %v2024_v21, %v1212_v12  ;;  %v1940_v25 = vpop.f32.mrb[5].mxu0  ;;  %v2026_v26 = vpop.f32.mrb[5].mxu1  ;;  %v9775_v20 = vld [vmem:[#allocation5 + $0xac0] ss:$16 sps:$4 sm:$0xff]   ;;  %v9778_v21 = vld [vmem:[#allocation5 + $0xac8] ss:$16 sps:$4 sm:$0xff]  }
 0x2ce   :  { %v9130_v28 = vadd.f32 %v1940_v25, %v1208_v13  ;;  %v9134_v32 = vadd.f32 %v2026_v26, %v1216_v14  ;;  %v1942_v33 = vpop.f32.mrb[6].mxu0  ;;  %v2028_v37 = vpop.f32.mrb[6].mxu1  ;;  %v9781_v25 = vld [vmem:[#allocation5 + $0xae0] ss:$16 sps:$4 sm:$0xff]   ;;  %v9784_v26 = vld [vmem:[#allocation5 + $0xae8] ss:$16 sps:$4 sm:$0xff]  }
 0x2cf   :  { %v9131_v38 = vadd.f32 %v1942_v33, %v1204_v11  ;;  %v9135_v39 = vadd.f32 %v2028_v37, %v1212_v12  ;;  %v1944_v40 = vpop.f32.mrb[7].mxu0  ;;  %v2030_v41 = vpop.f32.mrb[7].mxu1  ;;  %v2033_v44 = vmax.f32 %v9129_v22, 0.0  ;;  %v2035_v45 = vmax.f32 %v9133_v24, 0.0  ;;  %v9769_v11 = vld [vmem:[#allocation5 + $0xaa0] ss:$16 sps:$4 sm:$0xff]  }
 0x2d0   :  { %v9132_v42 = vadd.f32 %v1944_v40, %v1208_v13  ;;  %v9136_v43 = vadd.f32 %v2030_v41, %v1216_v14  ;;  %v2034_v48 = vmax.f32 %v9130_v28, 0.0  ;;  %v2036_v50 = vmax.f32 %v9134_v32, 0.0  ;;  %v9772_v12 = vld [vmem:[#allocation5 + $0xaa8] ss:$16 sps:$4 sm:$0xff]   ;;  %v9777_v13 = vld [vmem:[#allocation5 + $0xac4] ss:$16 sps:$4 sm:$0xff]  }
 0x2d1   :  { %v2037_v46 = vmax.f32 %v9131_v38, 0.0  ;;  %v2039_v47 = vmax.f32 %v9135_v39, 0.0  ;;  %v9780_v14 = vld [vmem:[#allocation5 + $0xacc] ss:$16 sps:$4 sm:$0xff]   ;;  %v9783_v22 = vld [vmem:[#allocation5 + $0xae4] ss:$16 sps:$4 sm:$0xff]  }
 0x2d2   :  { %v2038_v51 = vmax.f32 %v9132_v42, 0.0  ;;  %v2040_v52 = vmax.f32 %v9136_v43, 0.0  ;;  %v9786_v24 = vld [vmem:[#allocation5 + $0xaec] ss:$16 sps:$4 sm:$0xff]   ;;  %v9789_v28 = vld [vmem:[#allocation5 + $0xb04] ss:$16 sps:$4 sm:$0xff]  }
 0x2d3   :  { %v2041_v53 = vpack.c.bf16 %v2037_v46, %v2033_v44  ;;  %v11104_v54 = vpack.c.bf16 %v2039_v47, %v2035_v45  ;;  %v9792_v32 = vld [vmem:[#allocation5 + $0xb0c] ss:$16 sps:$4 sm:$0xff]   ;;  %v9787_v33 = vld [vmem:[#allocation5 + $0xb00] ss:$16 sps:$4 sm:$0xff]   ;;  %v9790_v37 = vld [vmem:[#allocation5 + $0xb08] ss:$16 sps:$4 sm:$0xff]  }
 0x2d4   :  { %v2042_v55 = vpack.c.bf16 %v2038_v51, %v2034_v48  ;;  %v2044_v56 = vpack.c.bf16 %v2040_v52, %v2036_v50  ;;  %v9795_v38 = vld [vmem:[#allocation5 + $0xb24] ss:$16 sps:$4 sm:$0xff]   ;;  %v9798_v39 = vld [vmem:[#allocation5 + $0xb2c] ss:$16 sps:$4 sm:$0xff]   ;;  %v9793_v40 = vld [vmem:[#allocation5 + $0xb20] ss:$16 sps:$4 sm:$0xff]  }
 0x2d5   :  { %v9796_v41 = vld [vmem:[#allocation5 + $0xb28] ss:$16 sps:$4 sm:$0xff]   ;;  %v9801_v42 = vld [vmem:[#allocation5 + $0xb44] ss:$16 sps:$4 sm:$0xff]   ;;  %v9804_v43 = vld [vmem:[#allocation5 + $0xb4c] ss:$16 sps:$4 sm:$0xff]  }
 0x2d6   :  { %2869 = vmatprep.mubr.bf16.mxu0 %v2042_v55  ;;  %2955 = vmatprep.mubr.bf16.mxu1 %v2042_v55  ;;  %v9799_v44 = vld [vmem:[#allocation5 + $0xb40] ss:$16 sps:$4 sm:$0xff]   ;;  %v9802_v45 = vld [vmem:[#allocation5 + $0xb48] ss:$16 sps:$4 sm:$0xff]   ;;  %v9807_v46 = vld [vmem:[#allocation5 + $0xb64] ss:$16 sps:$4 sm:$0xff]  }
 0x2d7   :  { %2870 = vmatmul.mubr.bf16.vlgmr.msra.gmra.mrb[8].mxu0 %v2041_v53  ;;  %2956 = vmatmul.mubr.bf16.vlgmr.msra.gmra.mrb[8].mxu1 %v2041_v53  ;;  %v9810_v47 = vld [vmem:[#allocation5 + $0xb6c] ss:$16 sps:$4 sm:$0xff]   ;;  %v9805_v48 = vld [vmem:[#allocation5 + $0xb60] ss:$16 sps:$4 sm:$0xff]   ;;  %v9808_v50 = vld [vmem:[#allocation5 + $0xb68] ss:$16 sps:$4 sm:$0xff]  }
 0x2d8   :  { %2881 = vmatpush1.bf16.msra.mxu0 %v9739_v15  ;;  %2967 = vmatpush1.bf16.msra.mxu1 %v9742_v58  ;;  %v9813_v51 = vld [vmem:[#allocation5 + $0xb84] ss:$16 sps:$4 sm:$0xff]   ;;  %v9816_v52 = vld [vmem:[#allocation5 + $0xb8c] ss:$16 sps:$4 sm:$0xff]   ;;  %v9811_v53 = vld [vmem:[#allocation5 + $0xb80] ss:$16 sps:$4 sm:$0xff]  }
 0x2d9   :  { %2912 = vmatprep.mubr.bf16.mxu0 %v2044_v56  ;;  %2998 = vmatprep.mubr.bf16.mxu1 %v2044_v56  ;;  %v9814_v55 = vld [vmem:[#allocation5 + $0xb88] ss:$16 sps:$4 sm:$0xff]   ;;  %v9819_v56 = vld [vmem:[#allocation5 + $0xba4] ss:$16 sps:$4 sm:$0xff]   ;;  %v9822_v15 = vld [vmem:[#allocation5 + $0xbac] ss:$16 sps:$4 sm:$0xff]  }
 0x2da   :  { %2882 = vmatprep.subr.bf16.mxu0 %v9747_v60  ;;  %2968 = vmatprep.subr.bf16.mxu1 %v9750_v61  ;;  %v9817_v58 = vld [vmem:[#allocation5 + $0xba0] ss:$16 sps:$4 sm:$0xff]   ;;  %v9820_v60 = vld [vmem:[#allocation5 + $0xba8] ss:$16 sps:$4 sm:$0xff]   ;;  %v9825_v61 = vld [vmem:[#allocation5 + $0xbc4] ss:$16 sps:$4 sm:$0xff]  }
 0x2dc   :  { %2883 = vmatpush1.bf16.msra.mxu0 %v9745_v16  ;;  %2969 = vmatpush1.bf16.msra.mxu1 %v9748_v62  ;;  %v9828_v16 = vld [vmem:[#allocation5 + $0xbcc] ss:$16 sps:$4 sm:$0xff]   ;;  %v9823_v62 = vld [vmem:[#allocation5 + $0xbc0] ss:$16 sps:$4 sm:$0xff]  }
 0x2dd   :  { %2884 = vmatprep.subr.bf16.mxu0 %v9753_v63  ;;  %2970 = vmatprep.subr.bf16.mxu1 %v9756_v29  ;;  %v9826_v63 = vld [vmem:[#allocation5 + $0xbc8] ss:$16 sps:$4 sm:$0xff]   ;;  %v9831_v29 = vld [vmem:[#allocation5 + $0xbe4] ss:$16 sps:$4 sm:$0xff]  }
 0x2e0   :  { %2885 = vmatpush1.bf16.msra.mxu0 %v9751_v0  ;;  %2971 = vmatpush1.bf16.msra.mxu1 %v9754_v1  ;;  %v9834_v0 = vld [vmem:[#allocation5 + $0xbec] ss:$16 sps:$4 sm:$0xff]   ;;  %v9829_v1 = vld [vmem:[#allocation5 + $0xbe0] ss:$16 sps:$4 sm:$0xff]  }
 0x2e1   :  { %2886 = vmatprep.subr.bf16.mxu0 %v9759_v2  ;;  %2972 = vmatprep.subr.bf16.mxu1 %v9762_v23  ;;  %v9832_v2 = vld [vmem:[#allocation5 + $0xbe8] ss:$16 sps:$4 sm:$0xff]   ;;  %v9837_v23 = vld [vmem:[#allocation5 + $0xc04] ss:$16 sps:$4 sm:$0xff]  }
 0x2e4   :  { %2887 = vmatpush1.bf16.msra.mxu0 %v9757_v3  ;;  %2973 = vmatpush1.bf16.msra.mxu1 %v9760_v4  ;;  %v9840_v3 = vld [vmem:[#allocation5 + $0xc0c] ss:$16 sps:$4 sm:$0xff]   ;;  %v9835_v4 = vld [vmem:[#allocation5 + $0xc00] ss:$16 sps:$4 sm:$0xff]  }
 0x2e5   :  { %2888 = vmatprep.subr.bf16.mxu0 %v9765_v5  ;;  %2974 = vmatprep.subr.bf16.mxu1 %v9768_v6  ;;  %v9838_v5 = vld [vmem:[#allocation5 + $0xc08] ss:$16 sps:$4 sm:$0xff]   ;;  %v9843_v6 = vld [vmem:[#allocation5 + $0xc24] ss:$16 sps:$4 sm:$0xff]  }
 0x2e8   :  { %2889 = vmatpush1.bf16.msra.mxu0 %v9763_v7  ;;  %2975 = vmatpush1.bf16.msra.mxu1 %v9766_v8  ;;  %v9846_v7 = vld [vmem:[#allocation5 + $0xc2c] ss:$16 sps:$4 sm:$0xff]   ;;  %v9841_v8 = vld [vmem:[#allocation5 + $0xc20] ss:$16 sps:$4 sm:$0xff]  }
 0x2e9   :  { %2890 = vmatprep.subr.bf16.mxu0 %v9771_v9  ;;  %2976 = vmatprep.subr.bf16.mxu1 %v9774_v10  ;;  %v9844_v9 = vld [vmem:[#allocation5 + $0xc28] ss:$16 sps:$4 sm:$0xff]   ;;  %v9849_v10 = vld [vmem:[#allocation5 + $0xc44] ss:$16 sps:$4 sm:$0xff]  }
 0x2ec   :  { %2891 = vmatpush1.bf16.msra.mxu0 %v9769_v11  ;;  %2977 = vmatpush1.bf16.msra.mxu1 %v9772_v12  ;;  %v9852_v11 = vld [vmem:[#allocation5 + $0xc4c] ss:$16 sps:$4 sm:$0xff]   ;;  %v9847_v12 = vld [vmem:[#allocation5 + $0xc40] ss:$16 sps:$4 sm:$0xff]  }
 0x2ed   :  { %2892 = vmatprep.subr.bf16.mxu0 %v9777_v13  ;;  %2978 = vmatprep.subr.bf16.mxu1 %v9780_v14  ;;  %v9850_v13 = vld [vmem:[#allocation5 + $0xc48] ss:$16 sps:$4 sm:$0xff]   ;;  %v9855_v14 = vld [vmem:[#allocation5 + $0xc64] ss:$16 sps:$4 sm:$0xff]  }
 0x2f0   :  { %2893 = vmatpush1.bf16.msra.mxu0 %v9775_v20  ;;  %2979 = vmatpush1.bf16.msra.mxu1 %v9778_v21  ;;  %v9858_v20 = vld [vmem:[#allocation5 + $0xc6c] ss:$16 sps:$4 sm:$0xff]   ;;  %v9853_v21 = vld [vmem:[#allocation5 + $0xc60] ss:$16 sps:$4 sm:$0xff]  }
 0x2f1   :  { %2894 = vmatprep.subr.bf16.mxu0 %v9783_v22  ;;  %2980 = vmatprep.subr.bf16.mxu1 %v9786_v24  ;;  %v9861_v22 = vld [vmem:[#allocation5 + $0xc84] ss:$16 sps:$4 sm:$0xff]   ;;  %v9864_v24 = vld [vmem:[#allocation5 + $0xc8c] ss:$16 sps:$4 sm:$0xff]  }
 0x2f4   :  { %2895 = vmatpush1.bf16.msra.mxu0 %v9781_v25  ;;  %2981 = vmatpush1.bf16.msra.mxu1 %v9784_v26  ;;  %v9859_v25 = vld [vmem:[#allocation5 + $0xc80] ss:$16 sps:$4 sm:$0xff]   ;;  %v9862_v26 = vld [vmem:[#allocation5 + $0xc88] ss:$16 sps:$4 sm:$0xff]  }
 0x2f5   :  { %2896 = vmatprep.subr.bf16.mxu0 %v9789_v28  ;;  %2982 = vmatprep.subr.bf16.mxu1 %v9792_v32  ;;  %v9867_v28 = vld [vmem:[#allocation5 + $0xca4] ss:$16 sps:$4 sm:$0xff]   ;;  %v9870_v32 = vld [vmem:[#allocation5 + $0xcac] ss:$16 sps:$4 sm:$0xff]  }
 0x2f8   :  { %2897 = vmatpush1.bf16.msra.mxu0 %v9787_v33  ;;  %2983 = vmatpush1.bf16.msra.mxu1 %v9790_v37  ;;  %v9865_v33 = vld [vmem:[#allocation5 + $0xca0] ss:$16 sps:$4 sm:$0xff]   ;;  %v9868_v37 = vld [vmem:[#allocation5 + $0xca8] ss:$16 sps:$4 sm:$0xff]  }
 0x2f9   :  { %2898 = vmatprep.subr.bf16.mxu0 %v9795_v38  ;;  %2984 = vmatprep.subr.bf16.mxu1 %v9798_v39  ;;  %v9873_v38 = vld [vmem:[#allocation5 + $0xcc4] ss:$16 sps:$4 sm:$0xff]   ;;  %v9876_v39 = vld [vmem:[#allocation5 + $0xccc] ss:$16 sps:$4 sm:$0xff]  }
 0x2fc   :  { %2899 = vmatpush1.bf16.msra.mxu0 %v9793_v40  ;;  %2985 = vmatpush1.bf16.msra.mxu1 %v9796_v41  ;;  %v9871_v40 = vld [vmem:[#allocation5 + $0xcc0] ss:$16 sps:$4 sm:$0xff]   ;;  %v9874_v41 = vld [vmem:[#allocation5 + $0xcc8] ss:$16 sps:$4 sm:$0xff]  }
 0x2fd   :  { %2900 = vmatprep.subr.bf16.mxu0 %v9801_v42  ;;  %2986 = vmatprep.subr.bf16.mxu1 %v9804_v43  ;;  %v9879_v42 = vld [vmem:[#allocation5 + $0xce4] ss:$16 sps:$4 sm:$0xff]   ;;  %v9882_v43 = vld [vmem:[#allocation5 + $0xcec] ss:$16 sps:$4 sm:$0xff]  }
 0x300   :  { %2901 = vmatpush1.bf16.msra.mxu0 %v9799_v44  ;;  %2987 = vmatpush1.bf16.msra.mxu1 %v9802_v45  ;;  %v9877_v44 = vld [vmem:[#allocation5 + $0xce0] ss:$16 sps:$4 sm:$0xff]   ;;  %v9880_v45 = vld [vmem:[#allocation5 + $0xce8] ss:$16 sps:$4 sm:$0xff]  }
 0x301   :  { %2902 = vmatprep.subr.bf16.mxu0 %v9807_v46  ;;  %2988 = vmatprep.subr.bf16.mxu1 %v9810_v47  ;;  %v9885_v46 = vld [vmem:[#allocation5 + $0xd04] ss:$16 sps:$4 sm:$0xff]   ;;  %v9888_v47 = vld [vmem:[#allocation5 + $0xd0c] ss:$16 sps:$4 sm:$0xff]  }
 0x304   :  { %2903 = vmatpush1.bf16.msra.mxu0 %v9805_v48  ;;  %2989 = vmatpush1.bf16.msra.mxu1 %v9808_v50  ;;  %v9883_v48 = vld [vmem:[#allocation5 + $0xd00] ss:$16 sps:$4 sm:$0xff]   ;;  %v9886_v50 = vld [vmem:[#allocation5 + $0xd08] ss:$16 sps:$4 sm:$0xff]  }
 0x305   :  { %2904 = vmatprep.subr.bf16.mxu0 %v9813_v51  ;;  %2990 = vmatprep.subr.bf16.mxu1 %v9816_v52  ;;  %v9891_v51 = vld [vmem:[#allocation5 + $0xd24] ss:$16 sps:$4 sm:$0xff]   ;;  %v9894_v52 = vld [vmem:[#allocation5 + $0xd2c] ss:$16 sps:$4 sm:$0xff]  }
 0x308   :  { %2905 = vmatpush1.bf16.msra.mxu0 %v9811_v53  ;;  %2991 = vmatpush1.bf16.msra.mxu1 %v9814_v55  ;;  %v9889_v53 = vld [vmem:[#allocation5 + $0xd20] ss:$16 sps:$4 sm:$0xff]   ;;  %v9892_v55 = vld [vmem:[#allocation5 + $0xd28] ss:$16 sps:$4 sm:$0xff]  }
 0x309   :  { %2906 = vmatprep.subr.bf16.mxu0 %v9819_v56  ;;  %2992 = vmatprep.subr.bf16.mxu1 %v9822_v15  ;;  %v9897_v56 = vld [vmem:[#allocation5 + $0xd44] ss:$16 sps:$4 sm:$0xff]   ;;  %v9900_v15 = vld [vmem:[#allocation5 + $0xd4c] ss:$16 sps:$4 sm:$0xff]  }
 0x30c   :  { %2907 = vmatpush1.bf16.msra.mxu0 %v9817_v58  ;;  %2993 = vmatpush1.bf16.msra.mxu1 %v9820_v60  ;;  %v9895_v58 = vld [vmem:[#allocation5 + $0xd40] ss:$16 sps:$4 sm:$0xff]   ;;  %v9898_v60 = vld [vmem:[#allocation5 + $0xd48] ss:$16 sps:$4 sm:$0xff]  }
 0x30d   :  { %2908 = vmatprep.subr.bf16.mxu0 %v9825_v61  ;;  %2994 = vmatprep.subr.bf16.mxu1 %v9828_v16  ;;  %v9903_v61 = vld [vmem:[#allocation5 + $0xd64] ss:$16 sps:$4 sm:$0xff]   ;;  %v9906_v16 = vld [vmem:[#allocation5 + $0xd6c] ss:$16 sps:$4 sm:$0xff]  }
 0x310   :  { %2909 = vmatpush1.bf16.msra.mxu0 %v9823_v62  ;;  %2995 = vmatpush1.bf16.msra.mxu1 %v9826_v63  ;;  %v9901_v62 = vld [vmem:[#allocation5 + $0xd60] ss:$16 sps:$4 sm:$0xff]   ;;  %v9904_v63 = vld [vmem:[#allocation5 + $0xd68] ss:$16 sps:$4 sm:$0xff]  }
 0x311   :  { %2910 = vmatprep.subr.bf16.mxu0 %v9831_v29  ;;  %2996 = vmatprep.subr.bf16.mxu1 %v9834_v0  ;;  %v9909_v29 = vld [vmem:[#allocation5 + $0xd84] ss:$16 sps:$4 sm:$0xff]   ;;  %v9912_v0 = vld [vmem:[#allocation5 + $0xd8c] ss:$16 sps:$4 sm:$0xff]  }
 0x314   :  { %2911 = vmatpush1.bf16.msra.mxu0 %v9829_v1  ;;  %2997 = vmatpush1.bf16.msra.mxu1 %v9832_v2  ;;  %v9907_v1 = vld [vmem:[#allocation5 + $0xd80] ss:$16 sps:$4 sm:$0xff]   ;;  %v9910_v2 = vld [vmem:[#allocation5 + $0xd88] ss:$16 sps:$4 sm:$0xff]  }
 0x315   :  { %3821 = vmatprep.subr.bf16.mxu0 %v9837_v23  ;;  %3907 = vmatprep.subr.bf16.mxu1 %v9840_v3  ;;  %v9915_v23 = vld [vmem:[#allocation5 + $0xda4] ss:$16 sps:$4 sm:$0xff]   ;;  %v9918_v3 = vld [vmem:[#allocation5 + $0xdac] ss:$16 sps:$4 sm:$0xff]  }
 0x317   :  { %2913 = vmatmul.mubr.bf16.vlgmr.msra.gmra.mrb[8].mxu0 %v11104_v54  ;;  %2999 = vmatmul.mubr.bf16.vlgmr.msra.gmra.mrb[8].mxu1 %v11104_v54  ;;  %v9856_v54 = vld [vmem:[#allocation5 + $0xc68] ss:$16 sps:$4 sm:$0xff]  }
 0x318   :  { %3822 = vmatpush1.bf16.msra.mxu0 %v9835_v4  ;;  %3908 = vmatpush1.bf16.msra.mxu1 %v9838_v5  ;;  %v9913_v4 = vld [vmem:[#allocation5 + $0xda0] ss:$16 sps:$4 sm:$0xff]   ;;  %v9916_v5 = vld [vmem:[#allocation5 + $0xda8] ss:$16 sps:$4 sm:$0xff]  }
 0x319   :  { %3823 = vmatprep.subr.bf16.mxu0 %v9843_v6  ;;  %3909 = vmatprep.subr.bf16.mxu1 %v9846_v7  ;;  %v9921_v6 = vld [vmem:[#allocation5 + $0xdc4] ss:$16 sps:$4 sm:$0xff]   ;;  %v9924_v7 = vld [vmem:[#allocation5 + $0xdcc] ss:$16 sps:$4 sm:$0xff]  }
 0x31c   :  { %3824 = vmatpush1.bf16.msra.mxu0 %v9841_v8  ;;  %3910 = vmatpush1.bf16.msra.mxu1 %v9844_v9  ;;  %v9919_v8 = vld [vmem:[#allocation5 + $0xdc0] ss:$16 sps:$4 sm:$0xff]   ;;  %v9922_v9 = vld [vmem:[#allocation5 + $0xdc8] ss:$16 sps:$4 sm:$0xff]  }
 0x31d   :  { %3825 = vmatprep.subr.bf16.mxu0 %v9849_v10  ;;  %3911 = vmatprep.subr.bf16.mxu1 %v9852_v11  ;;  %v9927_v10 = vld [vmem:[#allocation5 + $0xde4] ss:$16 sps:$4 sm:$0xff]   ;;  %v9930_v11 = vld [vmem:[#allocation5 + $0xdec] ss:$16 sps:$4 sm:$0xff]  }
 0x320   :  { %3826 = vmatpush1.bf16.msra.mxu0 %v9847_v12  ;;  %3912 = vmatpush1.bf16.msra.mxu1 %v9850_v13  ;;  %v9925_v12 = vld [vmem:[#allocation5 + $0xde0] ss:$16 sps:$4 sm:$0xff]   ;;  %v9928_v13 = vld [vmem:[#allocation5 + $0xde8] ss:$16 sps:$4 sm:$0xff]  }
 0x321   :  { %3827 = vmatprep.subr.bf16.mxu0 %v9855_v14  ;;  %3913 = vmatprep.subr.bf16.mxu1 %v9858_v20  ;;  %v9933_v14 = vld [vmem:[#allocation5 + $0xe04] ss:$16 sps:$4 sm:$0xff]   ;;  %v9936_v20 = vld [vmem:[#allocation5 + $0xe0c] ss:$16 sps:$4 sm:$0xff]  }
 0x324   :  { %3828 = vmatpush1.bf16.msra.mxu0 %v9853_v21  ;;  %3914 = vmatpush1.bf16.msra.mxu1 %v9856_v54  ;;  %v11108_v21 = vld [vmem:[#allocation7 + $0x2] ss:$8 sm:$0xf] }
 0x325   :  { %3829 = vmatprep.subr.bf16.mxu0 %v9861_v22  ;;  %3915 = vmatprep.subr.bf16.mxu1 %v9864_v24  ;;  %v2180_v54 = vrot.slane %v11108_v21, %v11054_v18  ;;  %v2184_v22 = vrot.slane %v11108_v21, %v11051_v17  ;;  %v2192_v24 = vrot.slane %v11108_v21, %v11057_v19 }
 0x328   :  { %3830 = vmatpush1.bf16.msra.mxu0 %v9859_v25  ;;  %3916 = vmatpush1.bf16.msra.mxu1 %v9862_v26 }
 0x329   :  { %3831 = vmatprep.subr.bf16.mxu0 %v9867_v28  ;;  %3917 = vmatprep.subr.bf16.mxu1 %v9870_v32 }
 0x32c   :  { %3832 = vmatpush1.bf16.msra.mxu0 %v9865_v33  ;;  %3918 = vmatpush1.bf16.msra.mxu1 %v9868_v37 }
 0x32d   :  { %3833 = vmatprep.subr.bf16.mxu0 %v9873_v38  ;;  %3919 = vmatprep.subr.bf16.mxu1 %v9876_v39 }
 0x330   :  { %3834 = vmatpush1.bf16.msra.mxu0 %v9871_v40  ;;  %3920 = vmatpush1.bf16.msra.mxu1 %v9874_v41 }
 0x331   :  { %3835 = vmatprep.subr.bf16.mxu0 %v9879_v42  ;;  %3921 = vmatprep.subr.bf16.mxu1 %v9882_v43 }
 0x334   :  { %3836 = vmatpush1.bf16.msra.mxu0 %v9877_v44  ;;  %3922 = vmatpush1.bf16.msra.mxu1 %v9880_v45 }
 0x335   :  { %3837 = vmatprep.subr.bf16.mxu0 %v9885_v46  ;;  %3923 = vmatprep.subr.bf16.mxu1 %v9888_v47 }
 0x338   :  { %3838 = vmatpush1.bf16.msra.mxu0 %v9883_v48  ;;  %3924 = vmatpush1.bf16.msra.mxu1 %v9886_v50 }
 0x339   :  { %3839 = vmatprep.subr.bf16.mxu0 %v9891_v51  ;;  %3925 = vmatprep.subr.bf16.mxu1 %v9894_v52 }
 0x33c   :  { %3840 = vmatpush1.bf16.msra.mxu0 %v9889_v53  ;;  %3926 = vmatpush1.bf16.msra.mxu1 %v9892_v55 }
 0x33d   :  { %3841 = vmatprep.subr.bf16.mxu0 %v9897_v56  ;;  %3927 = vmatprep.subr.bf16.mxu1 %v9900_v15  ;;  %v9931_v15 = vld [vmem:[#allocation5 + $0xe00] ss:$16 sps:$4 sm:$0xff]  }
 0x340   :  { %3842 = vmatpush1.bf16.msra.mxu0 %v9895_v58  ;;  %3928 = vmatpush1.bf16.msra.mxu1 %v9898_v60  ;;  %v9942_v60 = vld [vmem:[#allocation5 + $0xe2c] ss:$16 sps:$4 sm:$0xff]  }
 0x341   :  { %3843 = vmatprep.subr.bf16.mxu0 %v9903_v61  ;;  %3929 = vmatprep.subr.bf16.mxu1 %v9906_v16  ;;  %v9937_v16 = vld [vmem:[#allocation5 + $0xe20] ss:$16 sps:$4 sm:$0xff]  }
 0x344   :  { %3844 = vmatpush1.bf16.msra.mxu0 %v9901_v62  ;;  %3930 = vmatpush1.bf16.msra.mxu1 %v9904_v63  ;;  %v9940_v62 = vld [vmem:[#allocation5 + $0xe28] ss:$16 sps:$4 sm:$0xff]   ;;  %v9945_v63 = vld [vmem:[#allocation5 + $0xe44] ss:$16 sps:$4 sm:$0xff]  }
 0x345   :  { %3845 = vmatprep.subr.bf16.mxu0 %v9909_v29  ;;  %3931 = vmatprep.subr.bf16.mxu1 %v9912_v0  ;;  %v9948_v29 = vld [vmem:[#allocation5 + $0xe4c] ss:$16 sps:$4 sm:$0xff]   ;;  %v9943_v0 = vld [vmem:[#allocation5 + $0xe40] ss:$16 sps:$4 sm:$0xff]  }
 0x348   :  { %3846 = vmatpush1.bf16.msra.mxu0 %v9907_v1  ;;  %3932 = vmatpush1.bf16.msra.mxu1 %v9910_v2  ;;  %v9946_v1 = vld [vmem:[#allocation5 + $0xe48] ss:$16 sps:$4 sm:$0xff]   ;;  %v9951_v2 = vld [vmem:[#allocation5 + $0xe64] ss:$16 sps:$4 sm:$0xff]  }
 0x349   :  { %3847 = vmatprep.subr.bf16.mxu0 %v9915_v23  ;;  %3933 = vmatprep.subr.bf16.mxu1 %v9918_v3  ;;  %v9954_v23 = vld [vmem:[#allocation5 + $0xe6c] ss:$16 sps:$4 sm:$0xff]   ;;  %v9949_v3 = vld [vmem:[#allocation5 + $0xe60] ss:$16 sps:$4 sm:$0xff]  }
 0x34c   :  { %3848 = vmatpush1.bf16.msra.mxu0 %v9913_v4  ;;  %3934 = vmatpush1.bf16.msra.mxu1 %v9916_v5  ;;  %v9952_v4 = vld [vmem:[#allocation5 + $0xe68] ss:$16 sps:$4 sm:$0xff]   ;;  %v9957_v5 = vld [vmem:[#allocation5 + $0xe84] ss:$16 sps:$4 sm:$0xff]  }
 0x34d   :  { %3849 = vmatprep.subr.bf16.mxu0 %v9921_v6  ;;  %3935 = vmatprep.subr.bf16.mxu1 %v9924_v7  ;;  %v9960_v6 = vld [vmem:[#allocation5 + $0xe8c] ss:$16 sps:$4 sm:$0xff]   ;;  %v9955_v7 = vld [vmem:[#allocation5 + $0xe80] ss:$16 sps:$4 sm:$0xff]  }
 0x350   :  { %3850 = vmatpush1.bf16.msra.mxu0 %v9919_v8  ;;  %3936 = vmatpush1.bf16.msra.mxu1 %v9922_v9  ;;  %v9958_v8 = vld [vmem:[#allocation5 + $0xe88] ss:$16 sps:$4 sm:$0xff]   ;;  %v9963_v9 = vld [vmem:[#allocation5 + $0xea4] ss:$16 sps:$4 sm:$0xff]  }
 0x351   :  { %3851 = vmatprep.subr.bf16.mxu0 %v9927_v10  ;;  %3937 = vmatprep.subr.bf16.mxu1 %v9930_v11  ;;  %v9966_v10 = vld [vmem:[#allocation5 + $0xeac] ss:$16 sps:$4 sm:$0xff]   ;;  %v9961_v11 = vld [vmem:[#allocation5 + $0xea0] ss:$16 sps:$4 sm:$0xff]  }
 0x354   :  { %3852 = vmatpush1.bf16.msra.mxu0 %v9925_v12  ;;  %3938 = vmatpush1.bf16.msra.mxu1 %v9928_v13  ;;  %v9964_v12 = vld [vmem:[#allocation5 + $0xea8] ss:$16 sps:$4 sm:$0xff]   ;;  %v9969_v13 = vld [vmem:[#allocation5 + $0xec4] ss:$16 sps:$4 sm:$0xff]  }
 0x355   :  { %3864 = vmatprep.subr.bf16.mxu0 %v9933_v14  ;;  %3950 = vmatprep.subr.bf16.mxu1 %v9936_v20  ;;  %v9972_v14 = vld [vmem:[#allocation5 + $0xecc] ss:$16 sps:$4 sm:$0xff]   ;;  %v9967_v20 = vld [vmem:[#allocation5 + $0xec0] ss:$16 sps:$4 sm:$0xff]  }
 0x3ea   :  { %v2914_v25 = vpop.f32.mrb[8].mxu0  ;;  %v11116_v26 = vpop.f32.mrb[8].mxu1 }
 0x3eb   :  { %v9137_v28 = vadd.f32 %v2914_v25, %v2180_v54  ;;  %v2916_v32 = vpop.f32.mrb[9].mxu0  ;;  %v3002_v33 = vpop.f32.mrb[9].mxu1  ;;  %v9973_v25 = vld [vmem:[#allocation5 + $0xee0] ss:$16 sps:$4 sm:$0xff]  }
 0x3ec   :  { %v9138_v37 = vadd.f32 %v2916_v32, %v2184_v22  ;;  %v2918_v38 = vpop.f32.mrb[10].mxu0  ;;  %v11118_v39 = vpop.f32.mrb[10].mxu1  ;;  %v9142_v40 = vadd.f32 %v3002_v33, %v2192_v24  ;;  %v9981_v32 = vld [vmem:[#allocation5 + $0xf04] ss:$16 sps:$4 sm:$0xff]   ;;  %v9984_v33 = vld [vmem:[#allocation5 + $0xf0c] ss:$16 sps:$4 sm:$0xff]  }
 0x3ed   :  { %v9139_v41 = vadd.f32 %v2918_v38, %v2180_v54  ;;  %v2920_v42 = vpop.f32.mrb[11].mxu0  ;;  %v3006_v43 = vpop.f32.mrb[11].mxu1  ;;  %v11124_v47 = vadd.f32 %v9137_v28, %v11071_v30  ;;  %v9970_v54 = vld [vmem:[#allocation5 + $0xec8] ss:$16 sps:$4 sm:$0xff]  }
 0x3ee   :  { %v11121_v44 = vadd.f32 %v9138_v37, %v11067_v27  ;;  %v9140_v45 = vadd.f32 %v2920_v42, %v2184_v22  ;;  %v9144_v46 = vadd.f32 %v3006_v43, %v2192_v24  ;;  %v11136_v52 = vadd.f32 %v9142_v40, %v11079_v36  ;;  %v9939_v36 = vld [vmem:[#allocation5 + $0xe24] ss:$16 sps:$4 sm:$0xff]   ;;  %v9978_v24 = vld [vmem:[#allocation5 + $0xeec] ss:$16 sps:$4 sm:$0xff]   ;;  %v9976_v28 = vld [vmem:[#allocation5 + $0xee8] ss:$16 sps:$4 sm:$0xff]  }
 0x3ef   :  { %v11127_v48 = vadd.f32 %v9139_v41, %v11073_v31  ;;  %v3017_v30 = vmax.f32 %v11124_v47, 0.0  ;;  %v9975_v22 = vld [vmem:[#allocation5 + $0xee4] ss:$16 sps:$4 sm:$0xff]   ;;  %v9979_v37 = vld [vmem:[#allocation5 + $0xf00] ss:$16 sps:$4 sm:$0xff]  }
 0x3f0   :  { %v11130_v50 = vadd.f32 %v9140_v45, %v11075_v34  ;;  %v11133_v51 = vadd.f32 %v9144_v46, %v11077_v35  ;;  %v3018_v53 = vmax.f32 %v11121_v44, 0.0  ;;  %v9934_v34 = vld [vmem:[#allocation5 + $0xe08] ss:$16 sps:$4 sm:$0xff]   ;;  %v3020_v58 = vmax.f32 %v11136_v52, 0.0  ;;  %v9987_v40 = vld [vmem:[#allocation5 + $0xf24] ss:$16 sps:$4 sm:$0xff]  }
 0x3f1   :  { %v3021_v27 = vmax.f32 %v11127_v48, 0.0  ;;  %v9982_v38 = vld [vmem:[#allocation5 + $0xf08] ss:$16 sps:$4 sm:$0xff]   ;;  %v9990_v41 = vld [vmem:[#allocation5 + $0xf2c] ss:$16 sps:$4 sm:$0xff]  }
 0x3f2   :  { %v3022_v55 = vmax.f32 %v11130_v50, 0.0  ;;  %v3024_v31 = vmax.f32 %v11133_v51, 0.0  ;;  %v9985_v42 = vld [vmem:[#allocation5 + $0xf20] ss:$16 sps:$4 sm:$0xff]   ;;  %v9988_v43 = vld [vmem:[#allocation5 + $0xf28] ss:$16 sps:$4 sm:$0xff]  }
 0x3f3   :  { %v3025_v35 = vpack.c.bf16 %v3021_v27, %v3017_v30  ;;  %v9993_v45 = vld [vmem:[#allocation5 + $0xf44] ss:$16 sps:$4 sm:$0xff]   ;;  %v9996_v46 = vld [vmem:[#allocation5 + $0xf4c] ss:$16 sps:$4 sm:$0xff]   ;;  %v9991_v27 = vld [vmem:[#allocation5 + $0xf40] ss:$16 sps:$4 sm:$0xff]  }
 0x3f4   :  { %v3026_v56 = vpack.c.bf16 %v3022_v55, %v3018_v53  ;;  %v3028_v61 = vpack.c.bf16 %v3024_v31, %v3020_v58  ;;  %v9994_v53 = vld [vmem:[#allocation5 + $0xf48] ss:$16 sps:$4 sm:$0xff]   ;;  %v9999_v55 = vld [vmem:[#allocation5 + $0xf64] ss:$16 sps:$4 sm:$0xff]   ;;  %v10002_v30 = vld [vmem:[#allocation5 + $0xf6c] ss:$16 sps:$4 sm:$0xff]  }
 0x3f5   :  { %v9997_v31 = vld [vmem:[#allocation5 + $0xf60] ss:$16 sps:$4 sm:$0xff]  }
 0x3f6   :  { %3853 = vmatprep.mubr.bf16.mxu0 %v3026_v56  ;;  %3939 = vmatprep.mubr.bf16.mxu1 %v3026_v56  ;;  %v10000_v56 = vld [vmem:[#allocation5 + $0xf68] ss:$16 sps:$4 sm:$0xff]   ;;  %v10003_v58 = vld [vmem:[#allocation5 + $0xf80] ss:$16 sps:$4 sm:$0xff]  }
 0x3f7   :  { %3854 = vmatmul.mubr.bf16.vlgmr.msra.gmra.mrb[12].mxu0 %v3025_v35  ;;  %3940 = vmatmul.mubr.bf16.vlgmr.msra.gmra.mrb[12].mxu1 %v3025_v35  ;;  %v10006_v35 = vld [vmem:[#allocation5 + $0xf88] ss:$16 sps:$4 sm:$0xff]  }
 0x3f8   :  { %3865 = vmatpush1.bf16.msra.mxu0 %v9931_v15  ;;  %3951 = vmatpush1.bf16.msra.mxu1 %v9934_v34  ;;  %v10005_v15 = vld [vmem:[#allocation5 + $0xf84] ss:$16 sps:$4 sm:$0xff]   ;;  %v10008_v34 = vld [vmem:[#allocation5 + $0xf8c] ss:$16 sps:$4 sm:$0xff]  }
 0x3f9   :  { %3896 = vmatprep.mubr.bf16.mxu0 %v3028_v61  ;;  %3982 = vmatprep.mubr.bf16.mxu1 %v3028_v61  ;;  %v2188_v61 = vrot.slane %v11108_v21, %v11088_v49  ;;  %v10023_v21 = vld [vmem:[#allocation5 + $0xfe4] ss:$16 sps:$4 sm:$0xff]  }
 0x3fa   :  { %3866 = vmatprep.subr.bf16.mxu0 %v9939_v36  ;;  %3952 = vmatprep.subr.bf16.mxu1 %v9942_v60  ;;  %v10011_v36 = vld [vmem:[#allocation5 + $0xfa4] ss:$16 sps:$4 sm:$0xff]   ;;  %v10014_v60 = vld [vmem:[#allocation5 + $0xfac] ss:$16 sps:$4 sm:$0xff]  }
 0x3fc   :  { %3867 = vmatpush1.bf16.msra.mxu0 %v9937_v16  ;;  %3953 = vmatpush1.bf16.msra.mxu1 %v9940_v62  ;;  %v10009_v16 = vld [vmem:[#allocation5 + $0xfa0] ss:$16 sps:$4 sm:$0xff]   ;;  %v10012_v62 = vld [vmem:[#allocation5 + $0xfa8] ss:$16 sps:$4 sm:$0xff]  }
 0x3fd   :  { %3868 = vmatprep.subr.bf16.mxu0 %v9945_v63  ;;  %3954 = vmatprep.subr.bf16.mxu1 %v9948_v29  ;;  %v9143_v63 = vadd.f32 %v11118_v39, %v2188_v61  ;;  %v10017_v29 = vld [vmem:[#allocation5 + $0xfc4] ss:$16 sps:$4 sm:$0xff]   ;;  %v10021_v39 = vld [vmem:[#allocation5 + $0xfe0] ss:$16 sps:$4 sm:$0xff]  }
 0x400   :  { %3869 = vmatpush1.bf16.msra.mxu0 %v9943_v0  ;;  %3955 = vmatpush1.bf16.msra.mxu1 %v9946_v1  ;;  %v10020_v0 = vld [vmem:[#allocation5 + $0xfcc] ss:$16 sps:$4 sm:$0xff]   ;;  %v9141_v1 = vadd.f32 %v11116_v26, %v2188_v61  ;;  %v10083_v61 = vld [vmem:[#allocation5 + $0x1124] ss:$16 sps:$4 sm:$0xff]  }
 0x401   :  { %3870 = vmatprep.subr.bf16.mxu0 %v9951_v2  ;;  %3956 = vmatprep.subr.bf16.mxu1 %v9954_v23  ;;  %v10015_v2 = vld [vmem:[#allocation5 + $0xfc0] ss:$16 sps:$4 sm:$0xff]   ;;  %v10018_v23 = vld [vmem:[#allocation5 + $0xfc8] ss:$16 sps:$4 sm:$0xff]  }
 0x404   :  { %3871 = vmatpush1.bf16.msra.mxu0 %v9949_v3  ;;  %3957 = vmatpush1.bf16.msra.mxu1 %v9952_v4  ;;  %v11149_v3 = vadd.f32 %v9143_v63, %v11093_v57  ;;  %v10026_v4 = vld [vmem:[#allocation5 + $0xfec] ss:$16 sps:$4 sm:$0xff]   ;;  %v10084_v63 = vld [vmem:[#allocation5 + $0x1128] ss:$16 sps:$4 sm:$0xff]  }
 0x405   :  { %3872 = vmatprep.subr.bf16.mxu0 %v9957_v5  ;;  %3958 = vmatprep.subr.bf16.mxu1 %v9960_v6  ;;  %v11152_v5 = vadd.f32 %v9141_v1, %v11096_v59  ;;  %v10024_v6 = vld [vmem:[#allocation5 + $0xfe8] ss:$16 sps:$4 sm:$0xff]   ;;  %v10035_v59 = vld [vmem:[#allocation5 + $0x1024] ss:$16 sps:$4 sm:$0xff]   ;;  %v10087_v1 = vld [vmem:[#allocation5 + $0x1140] ss:$16 sps:$4 sm:$0xff]  }
 0x406   :  { %v3023_v26 = vmax.f32 %v11149_v3, 0.0 }
 0x407   :  { %v3019_v57 = vmax.f32 %v11152_v5, 0.0 }
 0x408   :  { %3873 = vmatpush1.bf16.msra.mxu0 %v9955_v7  ;;  %3959 = vmatpush1.bf16.msra.mxu1 %v9958_v8  ;;  %v10029_v7 = vld [vmem:[#allocation5 + $0x1004] ss:$16 sps:$4 sm:$0xff]   ;;  %v10032_v8 = vld [vmem:[#allocation5 + $0x100c] ss:$16 sps:$4 sm:$0xff]  }
 0x409   :  { %3874 = vmatprep.subr.bf16.mxu0 %v9963_v9  ;;  %3960 = vmatprep.subr.bf16.mxu1 %v9966_v10  ;;  %v10027_v9 = vld [vmem:[#allocation5 + $0x1000] ss:$16 sps:$4 sm:$0xff]   ;;  %v10030_v10 = vld [vmem:[#allocation5 + $0x1008] ss:$16 sps:$4 sm:$0xff]  }
 0x40c   :  { %3875 = vmatpush1.bf16.msra.mxu0 %v9961_v11  ;;  %3961 = vmatpush1.bf16.msra.mxu1 %v9964_v12  ;;  %v3027_v11 = vpack.c.bf16 %v3023_v26, %v3019_v57  ;;  %v10038_v12 = vld [vmem:[#allocation5 + $0x102c] ss:$16 sps:$4 sm:$0xff]   ;;  %v10107_v57 = vld [vmem:[#allocation5 + $0x11a4] ss:$16 sps:$4 sm:$0xff]  }
 0x40d   :  { %3876 = vmatprep.subr.bf16.mxu0 %v9969_v13  ;;  %3962 = vmatprep.subr.bf16.mxu1 %v9972_v14  ;;  %v10033_v13 = vld [vmem:[#allocation5 + $0x1020] ss:$16 sps:$4 sm:$0xff]   ;;  %v10036_v14 = vld [vmem:[#allocation5 + $0x1028] ss:$16 sps:$4 sm:$0xff]   ;;  %v10104_v26 = vld [vmem:[#allocation5 + $0x118c] ss:$16 sps:$4 sm:$0xff]  }
 0x410   :  { %3877 = vmatpush1.bf16.msra.mxu0 %v9967_v20  ;;  %3963 = vmatpush1.bf16.msra.mxu1 %v9970_v54  ;;  %v10041_v20 = vld [vmem:[#allocation5 + $0x1044] ss:$16 sps:$4 sm:$0xff]   ;;  %v10044_v54 = vld [vmem:[#allocation5 + $0x104c] ss:$16 sps:$4 sm:$0xff]  }
 0x411   :  { %3878 = vmatprep.subr.bf16.mxu0 %v9975_v22  ;;  %3964 = vmatprep.subr.bf16.mxu1 %v9978_v24  ;;  %v10039_v22 = vld [vmem:[#allocation5 + $0x1040] ss:$16 sps:$4 sm:$0xff]   ;;  %v10042_v24 = vld [vmem:[#allocation5 + $0x1048] ss:$16 sps:$4 sm:$0xff]  }
 0x414   :  { %3879 = vmatpush1.bf16.msra.mxu0 %v9973_v25  ;;  %3965 = vmatpush1.bf16.msra.mxu1 %v9976_v28  ;;  %v10047_v25 = vld [vmem:[#allocation5 + $0x1064] ss:$16 sps:$4 sm:$0xff]   ;;  %v10050_v28 = vld [vmem:[#allocation5 + $0x106c] ss:$16 sps:$4 sm:$0xff]  }
 0x415   :  { %3880 = vmatprep.subr.bf16.mxu0 %v9981_v32  ;;  %3966 = vmatprep.subr.bf16.mxu1 %v9984_v33  ;;  %v10045_v32 = vld [vmem:[#allocation5 + $0x1060] ss:$16 sps:$4 sm:$0xff]   ;;  %v10048_v33 = vld [vmem:[#allocation5 + $0x1068] ss:$16 sps:$4 sm:$0xff]  }
 0x418   :  { %3881 = vmatpush1.bf16.msra.mxu0 %v9979_v37  ;;  %3967 = vmatpush1.bf16.msra.mxu1 %v9982_v38  ;;  %v10053_v37 = vld [vmem:[#allocation5 + $0x1084] ss:$16 sps:$4 sm:$0xff]   ;;  %v10056_v38 = vld [vmem:[#allocation5 + $0x108c] ss:$16 sps:$4 sm:$0xff]  }
 0x419   :  { %3882 = vmatprep.subr.bf16.mxu0 %v9987_v40  ;;  %3968 = vmatprep.subr.bf16.mxu1 %v9990_v41  ;;  %v10051_v40 = vld [vmem:[#allocation5 + $0x1080] ss:$16 sps:$4 sm:$0xff]   ;;  %v10054_v41 = vld [vmem:[#allocation5 + $0x1088] ss:$16 sps:$4 sm:$0xff]  }
 0x41c   :  { %3883 = vmatpush1.bf16.msra.mxu0 %v9985_v42  ;;  %3969 = vmatpush1.bf16.msra.mxu1 %v9988_v43  ;;  %v10059_v42 = vld [vmem:[#allocation5 + $0x10a4] ss:$16 sps:$4 sm:$0xff]   ;;  %v10062_v43 = vld [vmem:[#allocation5 + $0x10ac] ss:$16 sps:$4 sm:$0xff]  }
 0x41d   :  { %3884 = vmatprep.subr.bf16.mxu0 %v9993_v45  ;;  %3970 = vmatprep.subr.bf16.mxu1 %v9996_v46  ;;  %v10057_v45 = vld [vmem:[#allocation5 + $0x10a0] ss:$16 sps:$4 sm:$0xff]   ;;  %v10060_v46 = vld [vmem:[#allocation5 + $0x10a8] ss:$16 sps:$4 sm:$0xff]  }
 0x420   :  { %3885 = vmatpush1.bf16.msra.mxu0 %v9991_v27  ;;  %3971 = vmatpush1.bf16.msra.mxu1 %v9994_v53  ;;  %v10065_v27 = vld [vmem:[#allocation5 + $0x10c4] ss:$16 sps:$4 sm:$0xff]   ;;  %v10068_v53 = vld [vmem:[#allocation5 + $0x10cc] ss:$16 sps:$4 sm:$0xff]  }
 0x421   :  { %3886 = vmatprep.subr.bf16.mxu0 %v9999_v55  ;;  %3972 = vmatprep.subr.bf16.mxu1 %v10002_v30  ;;  %v10063_v55 = vld [vmem:[#allocation5 + $0x10c0] ss:$16 sps:$4 sm:$0xff]   ;;  %v10066_v30 = vld [vmem:[#allocation5 + $0x10c8] ss:$16 sps:$4 sm:$0xff]  }
 0x424   :  { %3887 = vmatpush1.bf16.msra.mxu0 %v9997_v31  ;;  %3973 = vmatpush1.bf16.msra.mxu1 %v10000_v56  ;;  %v10071_v31 = vld [vmem:[#allocation5 + $0x10e4] ss:$16 sps:$4 sm:$0xff]   ;;  %v10074_v56 = vld [vmem:[#allocation5 + $0x10ec] ss:$16 sps:$4 sm:$0xff]  }
 0x425   :  { %3888 = vmatprep.subr.bf16.mxu0 %v10005_v15  ;;  %3974 = vmatprep.subr.bf16.mxu1 %v10008_v34  ;;  %v10069_v15 = vld [vmem:[#allocation5 + $0x10e0] ss:$16 sps:$4 sm:$0xff]   ;;  %v10072_v34 = vld [vmem:[#allocation5 + $0x10e8] ss:$16 sps:$4 sm:$0xff]  }
 0x428   :  { %3889 = vmatpush1.bf16.msra.mxu0 %v10003_v58  ;;  %3975 = vmatpush1.bf16.msra.mxu1 %v10006_v35  ;;  %v10077_v58 = vld [vmem:[#allocation5 + $0x1104] ss:$16 sps:$4 sm:$0xff]   ;;  %v10080_v35 = vld [vmem:[#allocation5 + $0x110c] ss:$16 sps:$4 sm:$0xff]  }
 0x429   :  { %3890 = vmatprep.subr.bf16.mxu0 %v10011_v36  ;;  %3976 = vmatprep.subr.bf16.mxu1 %v10014_v60  ;;  %v10075_v36 = vld [vmem:[#allocation5 + $0x1100] ss:$16 sps:$4 sm:$0xff]   ;;  %v10078_v60 = vld [vmem:[#allocation5 + $0x1108] ss:$16 sps:$4 sm:$0xff]  }
 0x42c   :  { %3891 = vmatpush1.bf16.msra.mxu0 %v10009_v16  ;;  %3977 = vmatpush1.bf16.msra.mxu1 %v10012_v62  ;;  %v10086_v16 = vld [vmem:[#allocation5 + $0x112c] ss:$16 sps:$4 sm:$0xff]   ;;  %v10081_v62 = vld [vmem:[#allocation5 + $0x1120] ss:$16 sps:$4 sm:$0xff]  }
 0x42d   :  { %3892 = vmatprep.subr.bf16.mxu0 %v10017_v29  ;;  %3978 = vmatprep.subr.bf16.mxu1 %v10020_v0  ;;  %v10089_v29 = vld [vmem:[#allocation5 + $0x1144] ss:$16 sps:$4 sm:$0xff]   ;;  %v10092_v0 = vld [vmem:[#allocation5 + $0x114c] ss:$16 sps:$4 sm:$0xff]  }
 0x430   :  { %3893 = vmatpush1.bf16.msra.mxu0 %v10015_v2  ;;  %3979 = vmatpush1.bf16.msra.mxu1 %v10018_v23  ;;  %v10090_v2 = vld [vmem:[#allocation5 + $0x1148] ss:$16 sps:$4 sm:$0xff]   ;;  %v10095_v23 = vld [vmem:[#allocation5 + $0x1164] ss:$16 sps:$4 sm:$0xff]  }
 0x431   :  { %3894 = vmatprep.subr.bf16.mxu0 %v10023_v21  ;;  %3980 = vmatprep.subr.bf16.mxu1 %v10026_v4  ;;  %v10098_v21 = vld [vmem:[#allocation5 + $0x116c] ss:$16 sps:$4 sm:$0xff]   ;;  %v10093_v4 = vld [vmem:[#allocation5 + $0x1160] ss:$16 sps:$4 sm:$0xff]  }
 0x434   :  { %3895 = vmatpush1.bf16.msra.mxu0 %v10021_v39  ;;  %3981 = vmatpush1.bf16.msra.mxu1 %v10024_v6  ;;  %v10096_v39 = vld [vmem:[#allocation5 + $0x1168] ss:$16 sps:$4 sm:$0xff]   ;;  %v10101_v6 = vld [vmem:[#allocation5 + $0x1184] ss:$16 sps:$4 sm:$0xff]  }
 0x435   :  { %4797 = vmatprep.subr.bf16.mxu0 %v10029_v7  ;;  %4883 = vmatprep.subr.bf16.mxu1 %v10032_v8  ;;  %v10099_v7 = vld [vmem:[#allocation5 + $0x1180] ss:$16 sps:$4 sm:$0xff]   ;;  %v10102_v8 = vld [vmem:[#allocation5 + $0x1188] ss:$16 sps:$4 sm:$0xff]  }
 0x437   :  { %3897 = vmatmul.mubr.bf16.vlgmr.msra.gmra.mrb[12].mxu0 %v3027_v11  ;;  %3983 = vmatmul.mubr.bf16.vlgmr.msra.gmra.mrb[12].mxu1 %v3027_v11  ;;  %v10108_v11 = vld [vmem:[#allocation5 + $0x11a8] ss:$16 sps:$4 sm:$0xff]  }
 0x438   :  { %4798 = vmatpush1.bf16.msra.mxu0 %v10027_v9  ;;  %4884 = vmatpush1.bf16.msra.mxu1 %v10030_v10  ;;  %v10110_v9 = vld [vmem:[#allocation5 + $0x11ac] ss:$16 sps:$4 sm:$0xff]   ;;  %v10105_v10 = vld [vmem:[#allocation5 + $0x11a0] ss:$16 sps:$4 sm:$0xff]  }
 0x439   :  { %4799 = vmatprep.subr.bf16.mxu0 %v10035_v59  ;;  %4885 = vmatprep.subr.bf16.mxu1 %v10038_v12  ;;  %v10113_v59 = vld [vmem:[#allocation5 + $0x11c4] ss:$16 sps:$4 sm:$0xff]   ;;  %v10116_v12 = vld [vmem:[#allocation5 + $0x11cc] ss:$16 sps:$4 sm:$0xff]  }
 0x43c   :  { %4800 = vmatpush1.bf16.msra.mxu0 %v10033_v13  ;;  %4886 = vmatpush1.bf16.msra.mxu1 %v10036_v14  ;;  %v10111_v13 = vld [vmem:[#allocation5 + $0x11c0] ss:$16 sps:$4 sm:$0xff]   ;;  %v10114_v14 = vld [vmem:[#allocation5 + $0x11c8] ss:$16 sps:$4 sm:$0xff]  }
 0x43d   :  { %4801 = vmatprep.subr.bf16.mxu0 %v10041_v20  ;;  %4887 = vmatprep.subr.bf16.mxu1 %v10044_v54  ;;  %v10119_v20 = vld [vmem:[#allocation5 + $0x11e4] ss:$16 sps:$4 sm:$0xff]   ;;  %v10122_v54 = vld [vmem:[#allocation5 + $0x11ec] ss:$16 sps:$4 sm:$0xff]  }
 0x440   :  { %4802 = vmatpush1.bf16.msra.mxu0 %v10039_v22  ;;  %4888 = vmatpush1.bf16.msra.mxu1 %v10042_v24  ;;  %v10117_v22 = vld [vmem:[#allocation5 + $0x11e0] ss:$16 sps:$4 sm:$0xff]   ;;  %v10120_v24 = vld [vmem:[#allocation5 + $0x11e8] ss:$16 sps:$4 sm:$0xff]  }
 0x441   :  { %4803 = vmatprep.subr.bf16.mxu0 %v10047_v25  ;;  %4889 = vmatprep.subr.bf16.mxu1 %v10050_v28  ;;  %v10125_v25 = vld [vmem:[#allocation5 + $0x1204] ss:$16 sps:$4 sm:$0xff]   ;;  %v10128_v28 = vld [vmem:[#allocation5 + $0x120c] ss:$16 sps:$4 sm:$0xff]  }
 0x444   :  { %4804 = vmatpush1.bf16.msra.mxu0 %v10045_v32  ;;  %4890 = vmatpush1.bf16.msra.mxu1 %v10048_v33  ;;  %v3159_v32 = vld [vmem:[#allocation7 + $0x3] ss:$8 sm:$0xf] }
 0x445   :  { %4805 = vmatprep.subr.bf16.mxu0 %v10053_v37  ;;  %4891 = vmatprep.subr.bf16.mxu1 %v10056_v38  ;;  %v3164_v33 = vrot.slane %v3159_v32, %v11054_v18  ;;  %v3172_v37 = vrot.slane %v3159_v32, %v11088_v49  ;;  %v3168_v38 = vrot.slane %v3159_v32, %v11051_v17 }
 0x448   :  { %4806 = vmatpush1.bf16.msra.mxu0 %v10051_v40  ;;  %4892 = vmatpush1.bf16.msra.mxu1 %v10054_v41  ;;  %v3176_v40 = vrot.slane %v3159_v32, %v11057_v19  ;;  %v10158_v32 = vld [vmem:[#allocation5 + $0x12ac] ss:$16 sps:$4 sm:$0xff]  }
 0x449   :  { %4807 = vmatprep.subr.bf16.mxu0 %v10059_v42  ;;  %4893 = vmatprep.subr.bf16.mxu1 %v10062_v43 }
 0x44c   :  { %4808 = vmatpush1.bf16.msra.mxu0 %v10057_v45  ;;  %4894 = vmatpush1.bf16.msra.mxu1 %v10060_v46 }
 0x44d   :  { %4809 = vmatprep.subr.bf16.mxu0 %v10065_v27  ;;  %4895 = vmatprep.subr.bf16.mxu1 %v10068_v53 }
 0x450   :  { %4810 = vmatpush1.bf16.msra.mxu0 %v10063_v55  ;;  %4896 = vmatpush1.bf16.msra.mxu1 %v10066_v30 }
 0x451   :  { %4811 = vmatprep.subr.bf16.mxu0 %v10071_v31  ;;  %4897 = vmatprep.subr.bf16.mxu1 %v10074_v56 }
 0x454   :  { %4812 = vmatpush1.bf16.msra.mxu0 %v10069_v15  ;;  %4898 = vmatpush1.bf16.msra.mxu1 %v10072_v34 }
 0x455   :  { %4813 = vmatprep.subr.bf16.mxu0 %v10077_v58  ;;  %4899 = vmatprep.subr.bf16.mxu1 %v10080_v35 }
 0x458   :  { %4814 = vmatpush1.bf16.msra.mxu0 %v10075_v36  ;;  %4900 = vmatpush1.bf16.msra.mxu1 %v10078_v60 }
 0x459   :  { %4815 = vmatprep.subr.bf16.mxu0 %v10083_v61  ;;  %4901 = vmatprep.subr.bf16.mxu1 %v10086_v16 }
 0x45c   :  { %4816 = vmatpush1.bf16.msra.mxu0 %v10081_v62  ;;  %4902 = vmatpush1.bf16.msra.mxu1 %v10084_v63 }
 0x45d   :  { %4817 = vmatprep.subr.bf16.mxu0 %v10089_v29  ;;  %4903 = vmatprep.subr.bf16.mxu1 %v10092_v0 }
 0x460   :  { %4818 = vmatpush1.bf16.msra.mxu0 %v10087_v1  ;;  %4904 = vmatpush1.bf16.msra.mxu1 %v10090_v2 }
 0x461   :  { %4819 = vmatprep.subr.bf16.mxu0 %v10095_v23  ;;  %4905 = vmatprep.subr.bf16.mxu1 %v10098_v21 }
 0x464   :  { %4820 = vmatpush1.bf16.msra.mxu0 %v10093_v4  ;;  %4906 = vmatpush1.bf16.msra.mxu1 %v10096_v39  ;;  %v10123_v39 = vld [vmem:[#allocation5 + $0x1200] ss:$16 sps:$4 sm:$0xff]  }
 0x465   :  { %4821 = vmatprep.subr.bf16.mxu0 %v10101_v6  ;;  %4907 = vmatprep.subr.bf16.mxu1 %v10104_v26  ;;  %v10126_v6 = vld [vmem:[#allocation5 + $0x1208] ss:$16 sps:$4 sm:$0xff]   ;;  %v10131_v26 = vld [vmem:[#allocation5 + $0x1224] ss:$16 sps:$4 sm:$0xff]  }
 0x468   :  { %4822 = vmatpush1.bf16.msra.mxu0 %v10099_v7  ;;  %4908 = vmatpush1.bf16.msra.mxu1 %v10102_v8  ;;  %v10134_v7 = vld [vmem:[#allocation5 + $0x122c] ss:$16 sps:$4 sm:$0xff]   ;;  %v10129_v8 = vld [vmem:[#allocation5 + $0x1220] ss:$16 sps:$4 sm:$0xff]  }
 0x469   :  { %4823 = vmatprep.subr.bf16.mxu0 %v10107_v57  ;;  %4909 = vmatprep.subr.bf16.mxu1 %v10110_v9  ;;  %v10132_v57 = vld [vmem:[#allocation5 + $0x1228] ss:$16 sps:$4 sm:$0xff]   ;;  %v10137_v9 = vld [vmem:[#allocation5 + $0x1244] ss:$16 sps:$4 sm:$0xff]  }
 0x46c   :  { %4824 = vmatpush1.bf16.msra.mxu0 %v10105_v10  ;;  %4910 = vmatpush1.bf16.msra.mxu1 %v10108_v11  ;;  %v10140_v10 = vld [vmem:[#allocation5 + $0x124c] ss:$16 sps:$4 sm:$0xff]   ;;  %v10135_v11 = vld [vmem:[#allocation5 + $0x1240] ss:$16 sps:$4 sm:$0xff]  }
 0x46d   :  { %4825 = vmatprep.subr.bf16.mxu0 %v10113_v59  ;;  %4911 = vmatprep.subr.bf16.mxu1 %v10116_v12  ;;  %v10138_v59 = vld [vmem:[#allocation5 + $0x1248] ss:$16 sps:$4 sm:$0xff]   ;;  %v10143_v12 = vld [vmem:[#allocation5 + $0x1264] ss:$16 sps:$4 sm:$0xff]  }
 0x470   :  { %4826 = vmatpush1.bf16.msra.mxu0 %v10111_v13  ;;  %4912 = vmatpush1.bf16.msra.mxu1 %v10114_v14  ;;  %v10146_v13 = vld [vmem:[#allocation5 + $0x126c] ss:$16 sps:$4 sm:$0xff]   ;;  %v10141_v14 = vld [vmem:[#allocation5 + $0x1260] ss:$16 sps:$4 sm:$0xff]  }
 0x471   :  { %4827 = vmatprep.subr.bf16.mxu0 %v10119_v20  ;;  %4913 = vmatprep.subr.bf16.mxu1 %v10122_v54  ;;  %v10144_v20 = vld [vmem:[#allocation5 + $0x1268] ss:$16 sps:$4 sm:$0xff]   ;;  %v10149_v54 = vld [vmem:[#allocation5 + $0x1284] ss:$16 sps:$4 sm:$0xff]  }
 0x474   :  { %4828 = vmatpush1.bf16.msra.mxu0 %v10117_v22  ;;  %4914 = vmatpush1.bf16.msra.mxu1 %v10120_v24  ;;  %v10152_v22 = vld [vmem:[#allocation5 + $0x128c] ss:$16 sps:$4 sm:$0xff]   ;;  %v10147_v24 = vld [vmem:[#allocation5 + $0x1280] ss:$16 sps:$4 sm:$0xff]  }
 0x475   :  { %4840 = vmatprep.subr.bf16.mxu0 %v10125_v25  ;;  %4926 = vmatprep.subr.bf16.mxu1 %v10128_v28  ;;  %v10150_v25 = vld [vmem:[#allocation5 + $0x1288] ss:$16 sps:$4 sm:$0xff]   ;;  %v10155_v28 = vld [vmem:[#allocation5 + $0x12a4] ss:$16 sps:$4 sm:$0xff]  }
 0x50a   :  { %v3898_v41 = vpop.f32.mrb[12].mxu0  ;;  %v3984_v42 = vpop.f32.mrb[12].mxu1 }
 0x50b   :  { %v9145_v43 = vadd.f32 %v3898_v41, %v3164_v33  ;;  %v9149_v45 = vadd.f32 %v3984_v42, %v3172_v37  ;;  %v3900_v46 = vpop.f32.mrb[13].mxu0  ;;  %v3986_v27 = vpop.f32.mrb[13].mxu1  ;;  %v10159_v41 = vld [vmem:[#allocation5 + $0x12c0] ss:$16 sps:$4 sm:$0xff]   ;;  %v10162_v42 = vld [vmem:[#allocation5 + $0x12c8] ss:$16 sps:$4 sm:$0xff]  }
 0x50c   :  { %v9146_v53 = vadd.f32 %v3900_v46, %v3168_v38  ;;  %v9150_v55 = vadd.f32 %v3986_v27, %v3176_v40  ;;  %v3902_v30 = vpop.f32.mrb[14].mxu0  ;;  %v3988_v31 = vpop.f32.mrb[14].mxu1  ;;  %v10165_v46 = vld [vmem:[#allocation5 + $0x12e0] ss:$16 sps:$4 sm:$0xff]   ;;  %v10168_v27 = vld [vmem:[#allocation5 + $0x12e8] ss:$16 sps:$4 sm:$0xff]  }
 0x50d   :  { %v9147_v56 = vadd.f32 %v3902_v30, %v3164_v33  ;;  %v9151_v15 = vadd.f32 %v3988_v31, %v3172_v37  ;;  %v3904_v34 = vpop.f32.mrb[15].mxu0  ;;  %v3990_v58 = vpop.f32.mrb[15].mxu1  ;;  %v3993_v60 = vmax.f32 %v9145_v43, 0.0  ;;  %v3995_v61 = vmax.f32 %v9149_v45, 0.0  ;;  %v10153_v33 = vld [vmem:[#allocation5 + $0x12a0] ss:$16 sps:$4 sm:$0xff]  }
 0x50e   :  { %v9148_v35 = vadd.f32 %v3904_v34, %v3168_v38  ;;  %v9152_v36 = vadd.f32 %v3990_v58, %v3176_v40  ;;  %v3994_v63 = vmax.f32 %v9146_v53, 0.0  ;;  %v3996_v29 = vmax.f32 %v9150_v55, 0.0  ;;  %v10156_v37 = vld [vmem:[#allocation5 + $0x12a8] ss:$16 sps:$4 sm:$0xff]   ;;  %v10161_v38 = vld [vmem:[#allocation5 + $0x12c4] ss:$16 sps:$4 sm:$0xff]  }
 0x50f   :  { %v3997_v16 = vmax.f32 %v9147_v56, 0.0  ;;  %v3999_v62 = vmax.f32 %v9151_v15, 0.0  ;;  %v10164_v40 = vld [vmem:[#allocation5 + $0x12cc] ss:$16 sps:$4 sm:$0xff]   ;;  %v10167_v43 = vld [vmem:[#allocation5 + $0x12e4] ss:$16 sps:$4 sm:$0xff]  }
 0x510   :  { %v3998_v0 = vmax.f32 %v9148_v35, 0.0  ;;  %v4000_v1 = vmax.f32 %v9152_v36, 0.0  ;;  %v10170_v45 = vld [vmem:[#allocation5 + $0x12ec] ss:$16 sps:$4 sm:$0xff]   ;;  %v10173_v53 = vld [vmem:[#allocation5 + $0x1304] ss:$16 sps:$4 sm:$0xff]  }
 0x511   :  { %v4001_v2 = vpack.c.bf16 %v3997_v16, %v3993_v60  ;;  %v11160_v23 = vpack.c.bf16 %v3999_v62, %v3995_v61  ;;  %v10176_v55 = vld [vmem:[#allocation5 + $0x130c] ss:$16 sps:$4 sm:$0xff]   ;;  %v10171_v30 = vld [vmem:[#allocation5 + $0x1300] ss:$16 sps:$4 sm:$0xff]   ;;  %v10174_v31 = vld [vmem:[#allocation5 + $0x1308] ss:$16 sps:$4 sm:$0xff]  }
 0x512   :  { %v4002_v21 = vpack.c.bf16 %v3998_v0, %v3994_v63  ;;  %v4004_v4 = vpack.c.bf16 %v4000_v1, %v3996_v29  ;;  %v10179_v56 = vld [vmem:[#allocation5 + $0x1324] ss:$16 sps:$4 sm:$0xff]   ;;  %v10182_v15 = vld [vmem:[#allocation5 + $0x132c] ss:$16 sps:$4 sm:$0xff]   ;;  %v10177_v34 = vld [vmem:[#allocation5 + $0x1320] ss:$16 sps:$4 sm:$0xff]  }
 0x513   :  { %v10180_v58 = vld [vmem:[#allocation5 + $0x1328] ss:$16 sps:$4 sm:$0xff]   ;;  %v10185_v35 = vld [vmem:[#allocation5 + $0x1344] ss:$16 sps:$4 sm:$0xff]   ;;  %v10188_v36 = vld [vmem:[#allocation5 + $0x134c] ss:$16 sps:$4 sm:$0xff]  }
 0x514   :  { %4829 = vmatprep.mubr.bf16.mxu0 %v4002_v21  ;;  %4915 = vmatprep.mubr.bf16.mxu1 %v4002_v21  ;;  %v10183_v60 = vld [vmem:[#allocation5 + $0x1340] ss:$16 sps:$4 sm:$0xff]   ;;  %v10186_v61 = vld [vmem:[#allocation5 + $0x1348] ss:$16 sps:$4 sm:$0xff]   ;;  %v10191_v16 = vld [vmem:[#allocation5 + $0x1364] ss:$16 sps:$4 sm:$0xff]  }
 0x515   :  { %4830 = vmatmul.mubr.bf16.vlgmr.msra.gmra.mrb[16].mxu0 %v4001_v2  ;;  %4916 = vmatmul.mubr.bf16.vlgmr.msra.gmra.mrb[16].mxu1 %v4001_v2  ;;  %v10194_v62 = vld [vmem:[#allocation5 + $0x136c] ss:$16 sps:$4 sm:$0xff]   ;;  %v10189_v63 = vld [vmem:[#allocation5 + $0x1360] ss:$16 sps:$4 sm:$0xff]   ;;  %v10192_v29 = vld [vmem:[#allocation5 + $0x1368] ss:$16 sps:$4 sm:$0xff]  }
 0x516   :  { %4841 = vmatpush1.bf16.msra.mxu0 %v10123_v39  ;;  %4927 = vmatpush1.bf16.msra.mxu1 %v10126_v6  ;;  %v10197_v0 = vld [vmem:[#allocation5 + $0x1384] ss:$16 sps:$4 sm:$0xff]   ;;  %v10200_v1 = vld [vmem:[#allocation5 + $0x138c] ss:$16 sps:$4 sm:$0xff]   ;;  %v10195_v2 = vld [vmem:[#allocation5 + $0x1380] ss:$16 sps:$4 sm:$0xff]  }
 0x517   :  { %4872 = vmatprep.mubr.bf16.mxu0 %v4004_v4  ;;  %4958 = vmatprep.mubr.bf16.mxu1 %v4004_v4  ;;  %v10198_v21 = vld [vmem:[#allocation5 + $0x1388] ss:$16 sps:$4 sm:$0xff]   ;;  %v10203_v4 = vld [vmem:[#allocation5 + $0x13a4] ss:$16 sps:$4 sm:$0xff]   ;;  %v10206_v39 = vld [vmem:[#allocation5 + $0x13ac] ss:$16 sps:$4 sm:$0xff]  }
 0x518   :  { %4842 = vmatprep.subr.bf16.mxu0 %v10131_v26  ;;  %4928 = vmatprep.subr.bf16.mxu1 %v10134_v7  ;;  %v10201_v6 = vld [vmem:[#allocation5 + $0x13a0] ss:$16 sps:$4 sm:$0xff]   ;;  %v10204_v26 = vld [vmem:[#allocation5 + $0x13a8] ss:$16 sps:$4 sm:$0xff]   ;;  %v10209_v7 = vld [vmem:[#allocation5 + $0x13c4] ss:$16 sps:$4 sm:$0xff]  }
 0x51a   :  { %4843 = vmatpush1.bf16.msra.mxu0 %v10129_v8  ;;  %4929 = vmatpush1.bf16.msra.mxu1 %v10132_v57  ;;  %v10212_v8 = vld [vmem:[#allocation5 + $0x13cc] ss:$16 sps:$4 sm:$0xff]   ;;  %v10207_v57 = vld [vmem:[#allocation5 + $0x13c0] ss:$16 sps:$4 sm:$0xff]  }
 0x51b   :  { %4844 = vmatprep.subr.bf16.mxu0 %v10137_v9  ;;  %4930 = vmatprep.subr.bf16.mxu1 %v10140_v10  ;;  %v10210_v9 = vld [vmem:[#allocation5 + $0x13c8] ss:$16 sps:$4 sm:$0xff]   ;;  %v10215_v10 = vld [vmem:[#allocation5 + $0x13e4] ss:$16 sps:$4 sm:$0xff]  }
 0x51e   :  { %4845 = vmatpush1.bf16.msra.mxu0 %v10135_v11  ;;  %4931 = vmatpush1.bf16.msra.mxu1 %v10138_v59  ;;  %v10218_v11 = vld [vmem:[#allocation5 + $0x13ec] ss:$16 sps:$4 sm:$0xff]   ;;  %v10213_v59 = vld [vmem:[#allocation5 + $0x13e0] ss:$16 sps:$4 sm:$0xff]  }
 0x51f   :  { %4846 = vmatprep.subr.bf16.mxu0 %v10143_v12  ;;  %4932 = vmatprep.subr.bf16.mxu1 %v10146_v13  ;;  %v10216_v12 = vld [vmem:[#allocation5 + $0x13e8] ss:$16 sps:$4 sm:$0xff]   ;;  %v10221_v13 = vld [vmem:[#allocation5 + $0x1404] ss:$16 sps:$4 sm:$0xff]  }
 0x522   :  { %4847 = vmatpush1.bf16.msra.mxu0 %v10141_v14  ;;  %4933 = vmatpush1.bf16.msra.mxu1 %v10144_v20  ;;  %v10224_v14 = vld [vmem:[#allocation5 + $0x140c] ss:$16 sps:$4 sm:$0xff]   ;;  %v10219_v20 = vld [vmem:[#allocation5 + $0x1400] ss:$16 sps:$4 sm:$0xff]  }
 0x523   :  { %4848 = vmatprep.subr.bf16.mxu0 %v10149_v54  ;;  %4934 = vmatprep.subr.bf16.mxu1 %v10152_v22  ;;  %v10222_v54 = vld [vmem:[#allocation5 + $0x1408] ss:$16 sps:$4 sm:$0xff]   ;;  %v10227_v22 = vld [vmem:[#allocation5 + $0x1424] ss:$16 sps:$4 sm:$0xff]  }
 0x526   :  { %4849 = vmatpush1.bf16.msra.mxu0 %v10147_v24  ;;  %4935 = vmatpush1.bf16.msra.mxu1 %v10150_v25  ;;  %v10230_v24 = vld [vmem:[#allocation5 + $0x142c] ss:$16 sps:$4 sm:$0xff]   ;;  %v10225_v25 = vld [vmem:[#allocation5 + $0x1420] ss:$16 sps:$4 sm:$0xff]  }
 0x527   :  { %4850 = vmatprep.subr.bf16.mxu0 %v10155_v28  ;;  %4936 = vmatprep.subr.bf16.mxu1 %v10158_v32  ;;  %v10228_v28 = vld [vmem:[#allocation5 + $0x1428] ss:$16 sps:$4 sm:$0xff]   ;;  %v10233_v32 = vld [vmem:[#allocation5 + $0x1444] ss:$16 sps:$4 sm:$0xff]  }
 0x52a   :  { %4851 = vmatpush1.bf16.msra.mxu0 %v10153_v33  ;;  %4937 = vmatpush1.bf16.msra.mxu1 %v10156_v37  ;;  %v10236_v33 = vld [vmem:[#allocation5 + $0x144c] ss:$16 sps:$4 sm:$0xff]   ;;  %v10231_v37 = vld [vmem:[#allocation5 + $0x1440] ss:$16 sps:$4 sm:$0xff]  }
 0x52b   :  { %4852 = vmatprep.subr.bf16.mxu0 %v10161_v38  ;;  %4938 = vmatprep.subr.bf16.mxu1 %v10164_v40  ;;  %v10234_v38 = vld [vmem:[#allocation5 + $0x1448] ss:$16 sps:$4 sm:$0xff]   ;;  %v10239_v40 = vld [vmem:[#allocation5 + $0x1464] ss:$16 sps:$4 sm:$0xff]  }
 0x52e   :  { %4853 = vmatpush1.bf16.msra.mxu0 %v10159_v41  ;;  %4939 = vmatpush1.bf16.msra.mxu1 %v10162_v42  ;;  %v10242_v41 = vld [vmem:[#allocation5 + $0x146c] ss:$16 sps:$4 sm:$0xff]   ;;  %v10237_v42 = vld [vmem:[#allocation5 + $0x1460] ss:$16 sps:$4 sm:$0xff]  }
 0x52f   :  { %4854 = vmatprep.subr.bf16.mxu0 %v10167_v43  ;;  %4940 = vmatprep.subr.bf16.mxu1 %v10170_v45  ;;  %v10245_v43 = vld [vmem:[#allocation5 + $0x1484] ss:$16 sps:$4 sm:$0xff]   ;;  %v10248_v45 = vld [vmem:[#allocation5 + $0x148c] ss:$16 sps:$4 sm:$0xff]  }
 0x532   :  { %4855 = vmatpush1.bf16.msra.mxu0 %v10165_v46  ;;  %4941 = vmatpush1.bf16.msra.mxu1 %v10168_v27  ;;  %v10243_v46 = vld [vmem:[#allocation5 + $0x1480] ss:$16 sps:$4 sm:$0xff]   ;;  %v10246_v27 = vld [vmem:[#allocation5 + $0x1488] ss:$16 sps:$4 sm:$0xff]  }
 0x533   :  { %4856 = vmatprep.subr.bf16.mxu0 %v10173_v53  ;;  %4942 = vmatprep.subr.bf16.mxu1 %v10176_v55  ;;  %v10251_v53 = vld [vmem:[#allocation5 + $0x14a4] ss:$16 sps:$4 sm:$0xff]   ;;  %v10254_v55 = vld [vmem:[#allocation5 + $0x14ac] ss:$16 sps:$4 sm:$0xff]  }
 0x536   :  { %4857 = vmatpush1.bf16.msra.mxu0 %v10171_v30  ;;  %4943 = vmatpush1.bf16.msra.mxu1 %v10174_v31  ;;  %v10249_v30 = vld [vmem:[#allocation5 + $0x14a0] ss:$16 sps:$4 sm:$0xff]   ;;  %v10252_v31 = vld [vmem:[#allocation5 + $0x14a8] ss:$16 sps:$4 sm:$0xff]  }
 0x537   :  { %4858 = vmatprep.subr.bf16.mxu0 %v10179_v56  ;;  %4944 = vmatprep.subr.bf16.mxu1 %v10182_v15  ;;  %v10257_v56 = vld [vmem:[#allocation5 + $0x14c4] ss:$16 sps:$4 sm:$0xff]   ;;  %v10260_v15 = vld [vmem:[#allocation5 + $0x14cc] ss:$16 sps:$4 sm:$0xff]  }
 0x53a   :  { %4859 = vmatpush1.bf16.msra.mxu0 %v10177_v34  ;;  %4945 = vmatpush1.bf16.msra.mxu1 %v10180_v58  ;;  %v10255_v34 = vld [vmem:[#allocation5 + $0x14c0] ss:$16 sps:$4 sm:$0xff]   ;;  %v10258_v58 = vld [vmem:[#allocation5 + $0x14c8] ss:$16 sps:$4 sm:$0xff]  }
 0x53b   :  { %4860 = vmatprep.subr.bf16.mxu0 %v10185_v35  ;;  %4946 = vmatprep.subr.bf16.mxu1 %v10188_v36  ;;  %v10263_v35 = vld [vmem:[#allocation5 + $0x14e4] ss:$16 sps:$4 sm:$0xff]   ;;  %v10266_v36 = vld [vmem:[#allocation5 + $0x14ec] ss:$16 sps:$4 sm:$0xff]  }
 0x53e   :  { %4861 = vmatpush1.bf16.msra.mxu0 %v10183_v60  ;;  %4947 = vmatpush1.bf16.msra.mxu1 %v10186_v61  ;;  %v10261_v60 = vld [vmem:[#allocation5 + $0x14e0] ss:$16 sps:$4 sm:$0xff]   ;;  %v10264_v61 = vld [vmem:[#allocation5 + $0x14e8] ss:$16 sps:$4 sm:$0xff]  }
 0x53f   :  { %4862 = vmatprep.subr.bf16.mxu0 %v10191_v16  ;;  %4948 = vmatprep.subr.bf16.mxu1 %v10194_v62  ;;  %v10269_v16 = vld [vmem:[#allocation5 + $0x1504] ss:$16 sps:$4 sm:$0xff]   ;;  %v10272_v62 = vld [vmem:[#allocation5 + $0x150c] ss:$16 sps:$4 sm:$0xff]  }
 0x542   :  { %4863 = vmatpush1.bf16.msra.mxu0 %v10189_v63  ;;  %4949 = vmatpush1.bf16.msra.mxu1 %v10192_v29  ;;  %v10267_v63 = vld [vmem:[#allocation5 + $0x1500] ss:$16 sps:$4 sm:$0xff]   ;;  %v10270_v29 = vld [vmem:[#allocation5 + $0x1508] ss:$16 sps:$4 sm:$0xff]  }
 0x543   :  { %4864 = vmatprep.subr.bf16.mxu0 %v10197_v0  ;;  %4950 = vmatprep.subr.bf16.mxu1 %v10200_v1  ;;  %v10275_v0 = vld [vmem:[#allocation5 + $0x1524] ss:$16 sps:$4 sm:$0xff]   ;;  %v10278_v1 = vld [vmem:[#allocation5 + $0x152c] ss:$16 sps:$4 sm:$0xff]  }
 0x546   :  { %4865 = vmatpush1.bf16.msra.mxu0 %v10195_v2  ;;  %4951 = vmatpush1.bf16.msra.mxu1 %v10198_v21  ;;  %v10273_v2 = vld [vmem:[#allocation5 + $0x1520] ss:$16 sps:$4 sm:$0xff]   ;;  %v10276_v21 = vld [vmem:[#allocation5 + $0x1528] ss:$16 sps:$4 sm:$0xff]  }
 0x547   :  { %4866 = vmatprep.subr.bf16.mxu0 %v10203_v4  ;;  %4952 = vmatprep.subr.bf16.mxu1 %v10206_v39  ;;  %v10281_v4 = vld [vmem:[#allocation5 + $0x1544] ss:$16 sps:$4 sm:$0xff]   ;;  %v10284_v39 = vld [vmem:[#allocation5 + $0x154c] ss:$16 sps:$4 sm:$0xff]  }
 0x54a   :  { %4867 = vmatpush1.bf16.msra.mxu0 %v10201_v6  ;;  %4953 = vmatpush1.bf16.msra.mxu1 %v10204_v26  ;;  %v10279_v6 = vld [vmem:[#allocation5 + $0x1540] ss:$16 sps:$4 sm:$0xff]   ;;  %v10282_v26 = vld [vmem:[#allocation5 + $0x1548] ss:$16 sps:$4 sm:$0xff]  }
 0x54b   :  { %4868 = vmatprep.subr.bf16.mxu0 %v10209_v7  ;;  %4954 = vmatprep.subr.bf16.mxu1 %v10212_v8  ;;  %v10287_v7 = vld [vmem:[#allocation5 + $0x1564] ss:$16 sps:$4 sm:$0xff]   ;;  %v10290_v8 = vld [vmem:[#allocation5 + $0x156c] ss:$16 sps:$4 sm:$0xff]  }
 0x54e   :  { %4869 = vmatpush1.bf16.msra.mxu0 %v10207_v57  ;;  %4955 = vmatpush1.bf16.msra.mxu1 %v10210_v9  ;;  %v10285_v57 = vld [vmem:[#allocation5 + $0x1560] ss:$16 sps:$4 sm:$0xff]   ;;  %v10288_v9 = vld [vmem:[#allocation5 + $0x1568] ss:$16 sps:$4 sm:$0xff]  }
 0x54f   :  { %4870 = vmatprep.subr.bf16.mxu0 %v10215_v10  ;;  %4956 = vmatprep.subr.bf16.mxu1 %v10218_v11  ;;  %v10293_v10 = vld [vmem:[#allocation5 + $0x1584] ss:$16 sps:$4 sm:$0xff]   ;;  %v10296_v11 = vld [vmem:[#allocation5 + $0x158c] ss:$16 sps:$4 sm:$0xff]  }
 0x552   :  { %4871 = vmatpush1.bf16.msra.mxu0 %v10213_v59  ;;  %4957 = vmatpush1.bf16.msra.mxu1 %v10216_v12  ;;  %v10291_v59 = vld [vmem:[#allocation5 + $0x1580] ss:$16 sps:$4 sm:$0xff]   ;;  %v10294_v12 = vld [vmem:[#allocation5 + $0x1588] ss:$16 sps:$4 sm:$0xff]  }
 0x553   :  { %5781 = vmatprep.subr.bf16.mxu0 %v10221_v13  ;;  %5867 = vmatprep.subr.bf16.mxu1 %v10224_v14  ;;  %v10299_v13 = vld [vmem:[#allocation5 + $0x15a4] ss:$16 sps:$4 sm:$0xff]   ;;  %v10302_v14 = vld [vmem:[#allocation5 + $0x15ac] ss:$16 sps:$4 sm:$0xff]  }
 0x555   :  { %4873 = vmatmul.mubr.bf16.vlgmr.msra.gmra.mrb[16].mxu0 %v11160_v23  ;;  %4959 = vmatmul.mubr.bf16.vlgmr.msra.gmra.mrb[16].mxu1 %v11160_v23  ;;  %v10240_v23 = vld [vmem:[#allocation5 + $0x1468] ss:$16 sps:$4 sm:$0xff]  }
 0x556   :  { %5782 = vmatpush1.bf16.msra.mxu0 %v10219_v20  ;;  %5868 = vmatpush1.bf16.msra.mxu1 %v10222_v54  ;;  %v10297_v20 = vld [vmem:[#allocation5 + $0x15a0] ss:$16 sps:$4 sm:$0xff]   ;;  %v10300_v54 = vld [vmem:[#allocation5 + $0x15a8] ss:$16 sps:$4 sm:$0xff]  }
 0x557   :  { %5783 = vmatprep.subr.bf16.mxu0 %v10227_v22  ;;  %5869 = vmatprep.subr.bf16.mxu1 %v10230_v24  ;;  %v10305_v22 = vld [vmem:[#allocation5 + $0x15c4] ss:$16 sps:$4 sm:$0xff]   ;;  %v10308_v24 = vld [vmem:[#allocation5 + $0x15cc] ss:$16 sps:$4 sm:$0xff]  }
 0x55a   :  { %5784 = vmatpush1.bf16.msra.mxu0 %v10225_v25  ;;  %5870 = vmatpush1.bf16.msra.mxu1 %v10228_v28  ;;  %v10303_v25 = vld [vmem:[#allocation5 + $0x15c0] ss:$16 sps:$4 sm:$0xff]   ;;  %v10306_v28 = vld [vmem:[#allocation5 + $0x15c8] ss:$16 sps:$4 sm:$0xff]  }
 0x55b   :  { %5785 = vmatprep.subr.bf16.mxu0 %v10233_v32  ;;  %5871 = vmatprep.subr.bf16.mxu1 %v10236_v33  ;;  %v10311_v32 = vld [vmem:[#allocation5 + $0x15e4] ss:$16 sps:$4 sm:$0xff]   ;;  %v10314_v33 = vld [vmem:[#allocation5 + $0x15ec] ss:$16 sps:$4 sm:$0xff]  }
 0x55e   :  { %5786 = vmatpush1.bf16.msra.mxu0 %v10231_v37  ;;  %5872 = vmatpush1.bf16.msra.mxu1 %v10234_v38  ;;  %v10309_v37 = vld [vmem:[#allocation5 + $0x15e0] ss:$16 sps:$4 sm:$0xff]   ;;  %v10312_v38 = vld [vmem:[#allocation5 + $0x15e8] ss:$16 sps:$4 sm:$0xff]  }
 0x55f   :  { %5787 = vmatprep.subr.bf16.mxu0 %v10239_v40  ;;  %5873 = vmatprep.subr.bf16.mxu1 %v10242_v41  ;;  %v10317_v40 = vld [vmem:[#allocation5 + $0x1604] ss:$16 sps:$4 sm:$0xff]   ;;  %v10320_v41 = vld [vmem:[#allocation5 + $0x160c] ss:$16 sps:$4 sm:$0xff]  }
 0x562   :  { %5788 = vmatpush1.bf16.msra.mxu0 %v10237_v42  ;;  %5874 = vmatpush1.bf16.msra.mxu1 %v10240_v23  ;;  %v11164_v42 = vld [vmem:[#allocation7 + $0x4] ss:$8 sm:$0xf] }
 0x563   :  { %5789 = vmatprep.subr.bf16.mxu0 %v10245_v43  ;;  %5875 = vmatprep.subr.bf16.mxu1 %v10248_v45  ;;  %v4140_v23 = vrot.slane %v11164_v42, %v11054_v18  ;;  %v4144_v43 = vrot.slane %v11164_v42, %v11051_v17  ;;  %v4152_v45 = vrot.slane %v11164_v42, %v11057_v19 }
 0x566   :  { %5790 = vmatpush1.bf16.msra.mxu0 %v10243_v46  ;;  %5876 = vmatpush1.bf16.msra.mxu1 %v10246_v27 }
 0x567   :  { %5791 = vmatprep.subr.bf16.mxu0 %v10251_v53  ;;  %5877 = vmatprep.subr.bf16.mxu1 %v10254_v55 }
 0x56a   :  { %5792 = vmatpush1.bf16.msra.mxu0 %v10249_v30  ;;  %5878 = vmatpush1.bf16.msra.mxu1 %v10252_v31 }
 0x56b   :  { %5793 = vmatprep.subr.bf16.mxu0 %v10257_v56  ;;  %5879 = vmatprep.subr.bf16.mxu1 %v10260_v15 }
 0x56e   :  { %5794 = vmatpush1.bf16.msra.mxu0 %v10255_v34  ;;  %5880 = vmatpush1.bf16.msra.mxu1 %v10258_v58 }
 0x56f   :  { %5795 = vmatprep.subr.bf16.mxu0 %v10263_v35  ;;  %5881 = vmatprep.subr.bf16.mxu1 %v10266_v36 }
 0x572   :  { %5796 = vmatpush1.bf16.msra.mxu0 %v10261_v60  ;;  %5882 = vmatpush1.bf16.msra.mxu1 %v10264_v61 }
 0x573   :  { %5797 = vmatprep.subr.bf16.mxu0 %v10269_v16  ;;  %5883 = vmatprep.subr.bf16.mxu1 %v10272_v62 }
 0x576   :  { %5798 = vmatpush1.bf16.msra.mxu0 %v10267_v63  ;;  %5884 = vmatpush1.bf16.msra.mxu1 %v10270_v29 }
 0x577   :  { %5799 = vmatprep.subr.bf16.mxu0 %v10275_v0  ;;  %5885 = vmatprep.subr.bf16.mxu1 %v10278_v1 }
 0x57a   :  { %5800 = vmatpush1.bf16.msra.mxu0 %v10273_v2  ;;  %5886 = vmatpush1.bf16.msra.mxu1 %v10276_v21 }
 0x57b   :  { %5801 = vmatprep.subr.bf16.mxu0 %v10281_v4  ;;  %5887 = vmatprep.subr.bf16.mxu1 %v10284_v39  ;;  %v10315_v39 = vld [vmem:[#allocation5 + $0x1600] ss:$16 sps:$4 sm:$0xff]  }
 0x57e   :  { %5802 = vmatpush1.bf16.msra.mxu0 %v10279_v6  ;;  %5888 = vmatpush1.bf16.msra.mxu1 %v10282_v26  ;;  %v10326_v26 = vld [vmem:[#allocation5 + $0x162c] ss:$16 sps:$4 sm:$0xff]  }
 0x57f   :  { %5803 = vmatprep.subr.bf16.mxu0 %v10287_v7  ;;  %5889 = vmatprep.subr.bf16.mxu1 %v10290_v8  ;;  %v10321_v8 = vld [vmem:[#allocation5 + $0x1620] ss:$16 sps:$4 sm:$0xff]  }
 0x582   :  { %5804 = vmatpush1.bf16.msra.mxu0 %v10285_v57  ;;  %5890 = vmatpush1.bf16.msra.mxu1 %v10288_v9  ;;  %v10324_v57 = vld [vmem:[#allocation5 + $0x1628] ss:$16 sps:$4 sm:$0xff]   ;;  %v10329_v9 = vld [vmem:[#allocation5 + $0x1644] ss:$16 sps:$4 sm:$0xff]  }
 0x583   :  { %5805 = vmatprep.subr.bf16.mxu0 %v10293_v10  ;;  %5891 = vmatprep.subr.bf16.mxu1 %v10296_v11  ;;  %v10332_v10 = vld [vmem:[#allocation5 + $0x164c] ss:$16 sps:$4 sm:$0xff]   ;;  %v10327_v11 = vld [vmem:[#allocation5 + $0x1640] ss:$16 sps:$4 sm:$0xff]  }
 0x586   :  { %5806 = vmatpush1.bf16.msra.mxu0 %v10291_v59  ;;  %5892 = vmatpush1.bf16.msra.mxu1 %v10294_v12  ;;  %v10330_v59 = vld [vmem:[#allocation5 + $0x1648] ss:$16 sps:$4 sm:$0xff]   ;;  %v10335_v12 = vld [vmem:[#allocation5 + $0x1664] ss:$16 sps:$4 sm:$0xff]  }
 0x587   :  { %5807 = vmatprep.subr.bf16.mxu0 %v10299_v13  ;;  %5893 = vmatprep.subr.bf16.mxu1 %v10302_v14  ;;  %v10338_v13 = vld [vmem:[#allocation5 + $0x166c] ss:$16 sps:$4 sm:$0xff]   ;;  %v10333_v14 = vld [vmem:[#allocation5 + $0x1660] ss:$16 sps:$4 sm:$0xff]  }
 0x58a   :  { %5808 = vmatpush1.bf16.msra.mxu0 %v10297_v20  ;;  %5894 = vmatpush1.bf16.msra.mxu1 %v10300_v54  ;;  %v10336_v20 = vld [vmem:[#allocation5 + $0x1668] ss:$16 sps:$4 sm:$0xff]   ;;  %v10341_v54 = vld [vmem:[#allocation5 + $0x1684] ss:$16 sps:$4 sm:$0xff]  }
 0x58b   :  { %5809 = vmatprep.subr.bf16.mxu0 %v10305_v22  ;;  %5895 = vmatprep.subr.bf16.mxu1 %v10308_v24  ;;  %v10344_v22 = vld [vmem:[#allocation5 + $0x168c] ss:$16 sps:$4 sm:$0xff]   ;;  %v10339_v24 = vld [vmem:[#allocation5 + $0x1680] ss:$16 sps:$4 sm:$0xff]  }
 0x58e   :  { %5810 = vmatpush1.bf16.msra.mxu0 %v10303_v25  ;;  %5896 = vmatpush1.bf16.msra.mxu1 %v10306_v28  ;;  %v10342_v25 = vld [vmem:[#allocation5 + $0x1688] ss:$16 sps:$4 sm:$0xff]   ;;  %v10347_v28 = vld [vmem:[#allocation5 + $0x16a4] ss:$16 sps:$4 sm:$0xff]  }
 0x58f   :  { %5811 = vmatprep.subr.bf16.mxu0 %v10311_v32  ;;  %5897 = vmatprep.subr.bf16.mxu1 %v10314_v33  ;;  %v10350_v32 = vld [vmem:[#allocation5 + $0x16ac] ss:$16 sps:$4 sm:$0xff]   ;;  %v10345_v33 = vld [vmem:[#allocation5 + $0x16a0] ss:$16 sps:$4 sm:$0xff]  }
 0x592   :  { %5812 = vmatpush1.bf16.msra.mxu0 %v10309_v37  ;;  %5898 = vmatpush1.bf16.msra.mxu1 %v10312_v38  ;;  %v10348_v37 = vld [vmem:[#allocation5 + $0x16a8] ss:$16 sps:$4 sm:$0xff]   ;;  %v10353_v38 = vld [vmem:[#allocation5 + $0x16c4] ss:$16 sps:$4 sm:$0xff]  }
 0x593   :  { %5824 = vmatprep.subr.bf16.mxu0 %v10317_v40  ;;  %5910 = vmatprep.subr.bf16.mxu1 %v10320_v41  ;;  %v10356_v40 = vld [vmem:[#allocation5 + $0x16cc] ss:$16 sps:$4 sm:$0xff]   ;;  %v10351_v41 = vld [vmem:[#allocation5 + $0x16c0] ss:$16 sps:$4 sm:$0xff]  }
 0x628   :  { %v4874_v46 = vpop.f32.mrb[16].mxu0  ;;  %v11172_v27 = vpop.f32.mrb[16].mxu1 }
 0x629   :  { %v9153_v53 = vadd.f32 %v4874_v46, %v4140_v23  ;;  %v4876_v55 = vpop.f32.mrb[17].mxu0  ;;  %v4962_v30 = vpop.f32.mrb[17].mxu1  ;;  %v10357_v46 = vld [vmem:[#allocation5 + $0x16e0] ss:$16 sps:$4 sm:$0xff]  }
 0x62a   :  { %v9154_v31 = vadd.f32 %v4876_v55, %v4144_v43  ;;  %v4878_v56 = vpop.f32.mrb[18].mxu0  ;;  %v11174_v15 = vpop.f32.mrb[18].mxu1  ;;  %v9158_v34 = vadd.f32 %v4962_v30, %v4152_v45  ;;  %v10365_v55 = vld [vmem:[#allocation5 + $0x1704] ss:$16 sps:$4 sm:$0xff]   ;;  %v10368_v30 = vld [vmem:[#allocation5 + $0x170c] ss:$16 sps:$4 sm:$0xff]  }
 0x62b   :  { %v9155_v58 = vadd.f32 %v4878_v56, %v4140_v23  ;;  %v4880_v35 = vpop.f32.mrb[19].mxu0  ;;  %v4966_v36 = vpop.f32.mrb[19].mxu1  ;;  %v11180_v62 = vadd.f32 %v9153_v53, %v11124_v47  ;;  %v10354_v23 = vld [vmem:[#allocation5 + $0x16c8] ss:$16 sps:$4 sm:$0xff]  }
 0x62c   :  { %v11177_v60 = vadd.f32 %v9154_v31, %v11121_v44  ;;  %v9156_v61 = vadd.f32 %v4880_v35, %v4144_v43  ;;  %v9160_v16 = vadd.f32 %v4966_v36, %v4152_v45  ;;  %v11192_v1 = vadd.f32 %v9158_v34, %v11136_v52  ;;  %v10323_v52 = vld [vmem:[#allocation5 + $0x1624] ss:$16 sps:$4 sm:$0xff]   ;;  %v10362_v45 = vld [vmem:[#allocation5 + $0x16ec] ss:$16 sps:$4 sm:$0xff]   ;;  %v10360_v53 = vld [vmem:[#allocation5 + $0x16e8] ss:$16 sps:$4 sm:$0xff]  }
 0x62d   :  { %v11183_v63 = vadd.f32 %v9155_v58, %v11127_v48  ;;  %v4977_v47 = vmax.f32 %v11180_v62, 0.0  ;;  %v10359_v43 = vld [vmem:[#allocation5 + $0x16e4] ss:$16 sps:$4 sm:$0xff]   ;;  %v10363_v31 = vld [vmem:[#allocation5 + $0x1700] ss:$16 sps:$4 sm:$0xff]  }
 0x62e   :  { %v11186_v29 = vadd.f32 %v9156_v61, %v11130_v50  ;;  %v11189_v0 = vadd.f32 %v9160_v16, %v11133_v51  ;;  %v4978_v2 = vmax.f32 %v11177_v60, 0.0  ;;  %v10318_v50 = vld [vmem:[#allocation5 + $0x1608] ss:$16 sps:$4 sm:$0xff]   ;;  %v4980_v6 = vmax.f32 %v11192_v1, 0.0  ;;  %v10371_v34 = vld [vmem:[#allocation5 + $0x1724] ss:$16 sps:$4 sm:$0xff]  }
 0x62f   :  { %v4981_v44 = vmax.f32 %v11183_v63, 0.0  ;;  %v10366_v56 = vld [vmem:[#allocation5 + $0x1708] ss:$16 sps:$4 sm:$0xff]   ;;  %v10374_v58 = vld [vmem:[#allocation5 + $0x172c] ss:$16 sps:$4 sm:$0xff]  }
 0x630   :  { %v4982_v21 = vmax.f32 %v11186_v29, 0.0  ;;  %v4984_v48 = vmax.f32 %v11189_v0, 0.0  ;;  %v10369_v35 = vld [vmem:[#allocation5 + $0x1720] ss:$16 sps:$4 sm:$0xff]   ;;  %v10372_v36 = vld [vmem:[#allocation5 + $0x1728] ss:$16 sps:$4 sm:$0xff]  }
 0x631   :  { %v4985_v51 = vpack.c.bf16 %v4981_v44, %v4977_v47  ;;  %v10377_v61 = vld [vmem:[#allocation5 + $0x1744] ss:$16 sps:$4 sm:$0xff]   ;;  %v10380_v16 = vld [vmem:[#allocation5 + $0x174c] ss:$16 sps:$4 sm:$0xff]   ;;  %v10375_v44 = vld [vmem:[#allocation5 + $0x1740] ss:$16 sps:$4 sm:$0xff]  }
 0x632   :  { %v4986_v4 = vpack.c.bf16 %v4982_v21, %v4978_v2  ;;  %v4988_v7 = vpack.c.bf16 %v4984_v48, %v4980_v6  ;;  %v10378_v2 = vld [vmem:[#allocation5 + $0x1748] ss:$16 sps:$4 sm:$0xff]   ;;  %v10383_v21 = vld [vmem:[#allocation5 + $0x1764] ss:$16 sps:$4 sm:$0xff]   ;;  %v10386_v47 = vld [vmem:[#allocation5 + $0x176c] ss:$16 sps:$4 sm:$0xff]  }
 0x633   :  { %v10381_v48 = vld [vmem:[#allocation5 + $0x1760] ss:$16 sps:$4 sm:$0xff]  }
 0x634   :  { %5813 = vmatprep.mubr.bf16.mxu0 %v4986_v4  ;;  %5899 = vmatprep.mubr.bf16.mxu1 %v4986_v4  ;;  %v10384_v4 = vld [vmem:[#allocation5 + $0x1768] ss:$16 sps:$4 sm:$0xff]   ;;  %v10387_v6 = vld [vmem:[#allocation5 + $0x1780] ss:$16 sps:$4 sm:$0xff]  }
 0x635   :  { %5814 = vmatmul.mubr.bf16.vlgmr.msra.gmra.mrb[20].mxu0 %v4985_v51  ;;  %5900 = vmatmul.mubr.bf16.vlgmr.msra.gmra.mrb[20].mxu1 %v4985_v51  ;;  %v10390_v51 = vld [vmem:[#allocation5 + $0x1788] ss:$16 sps:$4 sm:$0xff]  }
 0x636   :  { %5825 = vmatpush1.bf16.msra.mxu0 %v10315_v39  ;;  %5911 = vmatpush1.bf16.msra.mxu1 %v10318_v50  ;;  %v10389_v39 = vld [vmem:[#allocation5 + $0x1784] ss:$16 sps:$4 sm:$0xff]   ;;  %v10392_v50 = vld [vmem:[#allocation5 + $0x178c] ss:$16 sps:$4 sm:$0xff]  }
 0x637   :  { %5856 = vmatprep.mubr.bf16.mxu0 %v4988_v7  ;;  %5942 = vmatprep.mubr.bf16.mxu1 %v4988_v7  ;;  %v4148_v7 = vrot.slane %v11164_v42, %v11088_v49  ;;  %v10407_v42 = vld [vmem:[#allocation5 + $0x17e4] ss:$16 sps:$4 sm:$0xff]  }
 0x638   :  { %5826 = vmatprep.subr.bf16.mxu0 %v10323_v52  ;;  %5912 = vmatprep.subr.bf16.mxu1 %v10326_v26  ;;  %v10395_v52 = vld [vmem:[#allocation5 + $0x17a4] ss:$16 sps:$4 sm:$0xff]   ;;  %v10398_v26 = vld [vmem:[#allocation5 + $0x17ac] ss:$16 sps:$4 sm:$0xff]  }
 0x63a   :  { %5827 = vmatpush1.bf16.msra.mxu0 %v10321_v8  ;;  %5913 = vmatpush1.bf16.msra.mxu1 %v10324_v57  ;;  %v10393_v8 = vld [vmem:[#allocation5 + $0x17a0] ss:$16 sps:$4 sm:$0xff]   ;;  %v10396_v57 = vld [vmem:[#allocation5 + $0x17a8] ss:$16 sps:$4 sm:$0xff]  }
 0x63b   :  { %5828 = vmatprep.subr.bf16.mxu0 %v10329_v9  ;;  %5914 = vmatprep.subr.bf16.mxu1 %v10332_v10  ;;  %v9159_v9 = vadd.f32 %v11174_v15, %v4148_v7  ;;  %v10401_v10 = vld [vmem:[#allocation5 + $0x17c4] ss:$16 sps:$4 sm:$0xff]   ;;  %v10405_v15 = vld [vmem:[#allocation5 + $0x17e0] ss:$16 sps:$4 sm:$0xff]  }
 0x63e   :  { %5829 = vmatpush1.bf16.msra.mxu0 %v10327_v11  ;;  %5915 = vmatpush1.bf16.msra.mxu1 %v10330_v59  ;;  %v10404_v11 = vld [vmem:[#allocation5 + $0x17cc] ss:$16 sps:$4 sm:$0xff]   ;;  %v9157_v59 = vadd.f32 %v11172_v27, %v4148_v7  ;;  %v10467_v7 = vld [vmem:[#allocation5 + $0x1924] ss:$16 sps:$4 sm:$0xff]  }
 0x63f   :  { %5830 = vmatprep.subr.bf16.mxu0 %v10335_v12  ;;  %5916 = vmatprep.subr.bf16.mxu1 %v10338_v13  ;;  %v10399_v12 = vld [vmem:[#allocation5 + $0x17c0] ss:$16 sps:$4 sm:$0xff]   ;;  %v10402_v13 = vld [vmem:[#allocation5 + $0x17c8] ss:$16 sps:$4 sm:$0xff]  }
 0x642   :  { %5831 = vmatpush1.bf16.msra.mxu0 %v10333_v14  ;;  %5917 = vmatpush1.bf16.msra.mxu1 %v10336_v20  ;;  %v11205_v14 = vadd.f32 %v9159_v9, %v11149_v3  ;;  %v10410_v20 = vld [vmem:[#allocation5 + $0x17ec] ss:$16 sps:$4 sm:$0xff]   ;;  %v10468_v9 = vld [vmem:[#allocation5 + $0x1928] ss:$16 sps:$4 sm:$0xff]  }
 0x643   :  { %5832 = vmatprep.subr.bf16.mxu0 %v10341_v54  ;;  %5918 = vmatprep.subr.bf16.mxu1 %v10344_v22  ;;  %v11208_v54 = vadd.f32 %v9157_v59, %v11152_v5  ;;  %v10408_v22 = vld [vmem:[#allocation5 + $0x17e8] ss:$16 sps:$4 sm:$0xff]   ;;  %v10419_v5 = vld [vmem:[#allocation5 + $0x1824] ss:$16 sps:$4 sm:$0xff]   ;;  %v10471_v59 = vld [vmem:[#allocation5 + $0x1940] ss:$16 sps:$4 sm:$0xff]  }
 0x644   :  { %v4983_v27 = vmax.f32 %v11205_v14, 0.0 }
 0x645   :  { %v4979_v3 = vmax.f32 %v11208_v54, 0.0 }
 0x646   :  { %5833 = vmatpush1.bf16.msra.mxu0 %v10339_v24  ;;  %5919 = vmatpush1.bf16.msra.mxu1 %v10342_v25  ;;  %v10413_v24 = vld [vmem:[#allocation5 + $0x1804] ss:$16 sps:$4 sm:$0xff]   ;;  %v10416_v25 = vld [vmem:[#allocation5 + $0x180c] ss:$16 sps:$4 sm:$0xff]  }
 0x647   :  { %5834 = vmatprep.subr.bf16.mxu0 %v10347_v28  ;;  %5920 = vmatprep.subr.bf16.mxu1 %v10350_v32  ;;  %v10411_v28 = vld [vmem:[#allocation5 + $0x1800] ss:$16 sps:$4 sm:$0xff]   ;;  %v10414_v32 = vld [vmem:[#allocation5 + $0x1808] ss:$16 sps:$4 sm:$0xff]  }
 0x64a   :  { %5835 = vmatpush1.bf16.msra.mxu0 %v10345_v33  ;;  %5921 = vmatpush1.bf16.msra.mxu1 %v10348_v37  ;;  %v4987_v33 = vpack.c.bf16 %v4983_v27, %v4979_v3  ;;  %v10422_v37 = vld [vmem:[#allocation5 + $0x182c] ss:$16 sps:$4 sm:$0xff]   ;;  %v10491_v3 = vld [vmem:[#allocation5 + $0x19a4] ss:$16 sps:$4 sm:$0xff]  }
 0x64b   :  { %5836 = vmatprep.subr.bf16.mxu0 %v10353_v38  ;;  %5922 = vmatprep.subr.bf16.mxu1 %v10356_v40  ;;  %v10417_v38 = vld [vmem:[#allocation5 + $0x1820] ss:$16 sps:$4 sm:$0xff]   ;;  %v10420_v40 = vld [vmem:[#allocation5 + $0x1828] ss:$16 sps:$4 sm:$0xff]   ;;  %v10488_v27 = vld [vmem:[#allocation5 + $0x198c] ss:$16 sps:$4 sm:$0xff]  }
 0x64e   :  { %5837 = vmatpush1.bf16.msra.mxu0 %v10351_v41  ;;  %5923 = vmatpush1.bf16.msra.mxu1 %v10354_v23  ;;  %v10425_v41 = vld [vmem:[#allocation5 + $0x1844] ss:$16 sps:$4 sm:$0xff]   ;;  %v10428_v23 = vld [vmem:[#allocation5 + $0x184c] ss:$16 sps:$4 sm:$0xff]  }
 0x64f   :  { %5838 = vmatprep.subr.bf16.mxu0 %v10359_v43  ;;  %5924 = vmatprep.subr.bf16.mxu1 %v10362_v45  ;;  %v10423_v43 = vld [vmem:[#allocation5 + $0x1840] ss:$16 sps:$4 sm:$0xff]   ;;  %v10426_v45 = vld [vmem:[#allocation5 + $0x1848] ss:$16 sps:$4 sm:$0xff]  }
 0x652   :  { %5839 = vmatpush1.bf16.msra.mxu0 %v10357_v46  ;;  %5925 = vmatpush1.bf16.msra.mxu1 %v10360_v53  ;;  %v10431_v46 = vld [vmem:[#allocation5 + $0x1864] ss:$16 sps:$4 sm:$0xff]   ;;  %v10434_v53 = vld [vmem:[#allocation5 + $0x186c] ss:$16 sps:$4 sm:$0xff]  }
 0x653   :  { %5840 = vmatprep.subr.bf16.mxu0 %v10365_v55  ;;  %5926 = vmatprep.subr.bf16.mxu1 %v10368_v30  ;;  %v10429_v55 = vld [vmem:[#allocation5 + $0x1860] ss:$16 sps:$4 sm:$0xff]   ;;  %v10432_v30 = vld [vmem:[#allocation5 + $0x1868] ss:$16 sps:$4 sm:$0xff]  }
 0x656   :  { %5841 = vmatpush1.bf16.msra.mxu0 %v10363_v31  ;;  %5927 = vmatpush1.bf16.msra.mxu1 %v10366_v56  ;;  %v10437_v31 = vld [vmem:[#allocation5 + $0x1884] ss:$16 sps:$4 sm:$0xff]   ;;  %v10440_v56 = vld [vmem:[#allocation5 + $0x188c] ss:$16 sps:$4 sm:$0xff]  }
 0x657   :  { %5842 = vmatprep.subr.bf16.mxu0 %v10371_v34  ;;  %5928 = vmatprep.subr.bf16.mxu1 %v10374_v58  ;;  %v10435_v34 = vld [vmem:[#allocation5 + $0x1880] ss:$16 sps:$4 sm:$0xff]   ;;  %v10438_v58 = vld [vmem:[#allocation5 + $0x1888] ss:$16 sps:$4 sm:$0xff]  }
 0x65a   :  { %5843 = vmatpush1.bf16.msra.mxu0 %v10369_v35  ;;  %5929 = vmatpush1.bf16.msra.mxu1 %v10372_v36  ;;  %v10443_v35 = vld [vmem:[#allocation5 + $0x18a4] ss:$16 sps:$4 sm:$0xff]   ;;  %v10446_v36 = vld [vmem:[#allocation5 + $0x18ac] ss:$16 sps:$4 sm:$0xff]  }
 0x65b   :  { %5844 = vmatprep.subr.bf16.mxu0 %v10377_v61  ;;  %5930 = vmatprep.subr.bf16.mxu1 %v10380_v16  ;;  %v10441_v61 = vld [vmem:[#allocation5 + $0x18a0] ss:$16 sps:$4 sm:$0xff]   ;;  %v10444_v16 = vld [vmem:[#allocation5 + $0x18a8] ss:$16 sps:$4 sm:$0xff]  }
 0x65e   :  { %5845 = vmatpush1.bf16.msra.mxu0 %v10375_v44  ;;  %5931 = vmatpush1.bf16.msra.mxu1 %v10378_v2  ;;  %v10449_v44 = vld [vmem:[#allocation5 + $0x18c4] ss:$16 sps:$4 sm:$0xff]   ;;  %v10452_v2 = vld [vmem:[#allocation5 + $0x18cc] ss:$16 sps:$4 sm:$0xff]  }
 0x65f   :  { %5846 = vmatprep.subr.bf16.mxu0 %v10383_v21  ;;  %5932 = vmatprep.subr.bf16.mxu1 %v10386_v47  ;;  %v10447_v21 = vld [vmem:[#allocation5 + $0x18c0] ss:$16 sps:$4 sm:$0xff]   ;;  %v10450_v47 = vld [vmem:[#allocation5 + $0x18c8] ss:$16 sps:$4 sm:$0xff]  }
 0x662   :  { %5847 = vmatpush1.bf16.msra.mxu0 %v10381_v48  ;;  %5933 = vmatpush1.bf16.msra.mxu1 %v10384_v4  ;;  %v10455_v48 = vld [vmem:[#allocation5 + $0x18e4] ss:$16 sps:$4 sm:$0xff]   ;;  %v10458_v4 = vld [vmem:[#allocation5 + $0x18ec] ss:$16 sps:$4 sm:$0xff]  }
 0x663   :  { %5848 = vmatprep.subr.bf16.mxu0 %v10389_v39  ;;  %5934 = vmatprep.subr.bf16.mxu1 %v10392_v50  ;;  %v10453_v39 = vld [vmem:[#allocation5 + $0x18e0] ss:$16 sps:$4 sm:$0xff]   ;;  %v10456_v50 = vld [vmem:[#allocation5 + $0x18e8] ss:$16 sps:$4 sm:$0xff]  }
 0x666   :  { %5849 = vmatpush1.bf16.msra.mxu0 %v10387_v6  ;;  %5935 = vmatpush1.bf16.msra.mxu1 %v10390_v51  ;;  %v10461_v6 = vld [vmem:[#allocation5 + $0x1904] ss:$16 sps:$4 sm:$0xff]   ;;  %v10464_v51 = vld [vmem:[#allocation5 + $0x190c] ss:$16 sps:$4 sm:$0xff]  }
 0x667   :  { %5850 = vmatprep.subr.bf16.mxu0 %v10395_v52  ;;  %5936 = vmatprep.subr.bf16.mxu1 %v10398_v26  ;;  %v10459_v52 = vld [vmem:[#allocation5 + $0x1900] ss:$16 sps:$4 sm:$0xff]   ;;  %v10462_v26 = vld [vmem:[#allocation5 + $0x1908] ss:$16 sps:$4 sm:$0xff]  }
 0x66a   :  { %5851 = vmatpush1.bf16.msra.mxu0 %v10393_v8  ;;  %5937 = vmatpush1.bf16.msra.mxu1 %v10396_v57  ;;  %v10470_v8 = vld [vmem:[#allocation5 + $0x192c] ss:$16 sps:$4 sm:$0xff]   ;;  %v10465_v57 = vld [vmem:[#allocation5 + $0x1920] ss:$16 sps:$4 sm:$0xff]  }
 0x66b   :  { %5852 = vmatprep.subr.bf16.mxu0 %v10401_v10  ;;  %5938 = vmatprep.subr.bf16.mxu1 %v10404_v11  ;;  %v10473_v10 = vld [vmem:[#allocation5 + $0x1944] ss:$16 sps:$4 sm:$0xff]   ;;  %v10476_v11 = vld [vmem:[#allocation5 + $0x194c] ss:$16 sps:$4 sm:$0xff]  }
 0x66e   :  { %5853 = vmatpush1.bf16.msra.mxu0 %v10399_v12  ;;  %5939 = vmatpush1.bf16.msra.mxu1 %v10402_v13  ;;  %v10474_v12 = vld [vmem:[#allocation5 + $0x1948] ss:$16 sps:$4 sm:$0xff]   ;;  %v10479_v13 = vld [vmem:[#allocation5 + $0x1964] ss:$16 sps:$4 sm:$0xff]  }
 0x66f   :  { %5854 = vmatprep.subr.bf16.mxu0 %v10407_v42  ;;  %5940 = vmatprep.subr.bf16.mxu1 %v10410_v20  ;;  %v10482_v42 = vld [vmem:[#allocation5 + $0x196c] ss:$16 sps:$4 sm:$0xff]   ;;  %v10477_v20 = vld [vmem:[#allocation5 + $0x1960] ss:$16 sps:$4 sm:$0xff]  }
 0x672   :  { %5855 = vmatpush1.bf16.msra.mxu0 %v10405_v15  ;;  %5941 = vmatpush1.bf16.msra.mxu1 %v10408_v22  ;;  %v10480_v15 = vld [vmem:[#allocation5 + $0x1968] ss:$16 sps:$4 sm:$0xff]   ;;  %v10485_v22 = vld [vmem:[#allocation5 + $0x1984] ss:$16 sps:$4 sm:$0xff]  }
 0x673   :  { %6757 = vmatprep.subr.bf16.mxu0 %v10413_v24  ;;  %6843 = vmatprep.subr.bf16.mxu1 %v10416_v25  ;;  %v10483_v24 = vld [vmem:[#allocation5 + $0x1980] ss:$16 sps:$4 sm:$0xff]   ;;  %v10486_v25 = vld [vmem:[#allocation5 + $0x1988] ss:$16 sps:$4 sm:$0xff]  }
 0x675   :  { %5857 = vmatmul.mubr.bf16.vlgmr.msra.gmra.mrb[20].mxu0 %v4987_v33  ;;  %5943 = vmatmul.mubr.bf16.vlgmr.msra.gmra.mrb[20].mxu1 %v4987_v33  ;;  %v10492_v33 = vld [vmem:[#allocation5 + $0x19a8] ss:$16 sps:$4 sm:$0xff]  }
 0x676   :  { %6758 = vmatpush1.bf16.msra.mxu0 %v10411_v28  ;;  %6844 = vmatpush1.bf16.msra.mxu1 %v10414_v32  ;;  %v10494_v28 = vld [vmem:[#allocation5 + $0x19ac] ss:$16 sps:$4 sm:$0xff]   ;;  %v10489_v32 = vld [vmem:[#allocation5 + $0x19a0] ss:$16 sps:$4 sm:$0xff]  }
 0x677   :  { %6759 = vmatprep.subr.bf16.mxu0 %v10419_v5  ;;  %6845 = vmatprep.subr.bf16.mxu1 %v10422_v37  ;;  %v10497_v5 = vld [vmem:[#allocation5 + $0x19c4] ss:$16 sps:$4 sm:$0xff]   ;;  %v10500_v37 = vld [vmem:[#allocation5 + $0x19cc] ss:$16 sps:$4 sm:$0xff]  }
 0x67a   :  { %6760 = vmatpush1.bf16.msra.mxu0 %v10417_v38  ;;  %6846 = vmatpush1.bf16.msra.mxu1 %v10420_v40  ;;  %v10495_v38 = vld [vmem:[#allocation5 + $0x19c0] ss:$16 sps:$4 sm:$0xff]   ;;  %v10498_v40 = vld [vmem:[#allocation5 + $0x19c8] ss:$16 sps:$4 sm:$0xff]  }
 0x67b   :  { %6761 = vmatprep.subr.bf16.mxu0 %v10425_v41  ;;  %6847 = vmatprep.subr.bf16.mxu1 %v10428_v23  ;;  %v10503_v41 = vld [vmem:[#allocation5 + $0x19e4] ss:$16 sps:$4 sm:$0xff]   ;;  %v10506_v23 = vld [vmem:[#allocation5 + $0x19ec] ss:$16 sps:$4 sm:$0xff]  }
 0x67e   :  { %6762 = vmatpush1.bf16.msra.mxu0 %v10423_v43  ;;  %6848 = vmatpush1.bf16.msra.mxu1 %v10426_v45  ;;  %v10501_v43 = vld [vmem:[#allocation5 + $0x19e0] ss:$16 sps:$4 sm:$0xff]   ;;  %v10504_v45 = vld [vmem:[#allocation5 + $0x19e8] ss:$16 sps:$4 sm:$0xff]  }
 0x67f   :  { %6763 = vmatprep.subr.bf16.mxu0 %v10431_v46  ;;  %6849 = vmatprep.subr.bf16.mxu1 %v10434_v53  ;;  %v10509_v46 = vld [vmem:[#allocation5 + $0x1a04] ss:$16 sps:$4 sm:$0xff]   ;;  %v10512_v53 = vld [vmem:[#allocation5 + $0x1a0c] ss:$16 sps:$4 sm:$0xff]  }
 0x682   :  { %6764 = vmatpush1.bf16.msra.mxu0 %v10429_v55  ;;  %6850 = vmatpush1.bf16.msra.mxu1 %v10432_v30  ;;  %v5119_v55 = vld [vmem:[#allocation7 + $0x5] ss:$8 sm:$0xf] }
 0x683   :  { %6765 = vmatprep.subr.bf16.mxu0 %v10437_v31  ;;  %6851 = vmatprep.subr.bf16.mxu1 %v10440_v56  ;;  %v5124_v30 = vrot.slane %v5119_v55, %v11054_v18  ;;  %v5132_v31 = vrot.slane %v5119_v55, %v11088_v49  ;;  %v5128_v56 = vrot.slane %v5119_v55, %v11051_v17 }
 0x686   :  { %6766 = vmatpush1.bf16.msra.mxu0 %v10435_v34  ;;  %6852 = vmatpush1.bf16.msra.mxu1 %v10438_v58  ;;  %v5136_v34 = vrot.slane %v5119_v55, %v11057_v19  ;;  %v10542_v55 = vld [vmem:[#allocation5 + $0x1aac] ss:$16 sps:$4 sm:$0xff]  }
 0x687   :  { %6767 = vmatprep.subr.bf16.mxu0 %v10443_v35  ;;  %6853 = vmatprep.subr.bf16.mxu1 %v10446_v36 }
 0x68a   :  { %6768 = vmatpush1.bf16.msra.mxu0 %v10441_v61  ;;  %6854 = vmatpush1.bf16.msra.mxu1 %v10444_v16 }
 0x68b   :  { %6769 = vmatprep.subr.bf16.mxu0 %v10449_v44  ;;  %6855 = vmatprep.subr.bf16.mxu1 %v10452_v2 }
 0x68e   :  { %6770 = vmatpush1.bf16.msra.mxu0 %v10447_v21  ;;  %6856 = vmatpush1.bf16.msra.mxu1 %v10450_v47 }
 0x68f   :  { %6771 = vmatprep.subr.bf16.mxu0 %v10455_v48  ;;  %6857 = vmatprep.subr.bf16.mxu1 %v10458_v4 }
 0x692   :  { %6772 = vmatpush1.bf16.msra.mxu0 %v10453_v39  ;;  %6858 = vmatpush1.bf16.msra.mxu1 %v10456_v50 }
 0x693   :  { %6773 = vmatprep.subr.bf16.mxu0 %v10461_v6  ;;  %6859 = vmatprep.subr.bf16.mxu1 %v10464_v51 }
 0x696   :  { %6774 = vmatpush1.bf16.msra.mxu0 %v10459_v52  ;;  %6860 = vmatpush1.bf16.msra.mxu1 %v10462_v26 }
 0x697   :  { %6775 = vmatprep.subr.bf16.mxu0 %v10467_v7  ;;  %6861 = vmatprep.subr.bf16.mxu1 %v10470_v8 }
 0x69a   :  { %6776 = vmatpush1.bf16.msra.mxu0 %v10465_v57  ;;  %6862 = vmatpush1.bf16.msra.mxu1 %v10468_v9 }
 0x69b   :  { %6777 = vmatprep.subr.bf16.mxu0 %v10473_v10  ;;  %6863 = vmatprep.subr.bf16.mxu1 %v10476_v11 }
 0x69e   :  { %6778 = vmatpush1.bf16.msra.mxu0 %v10471_v59  ;;  %6864 = vmatpush1.bf16.msra.mxu1 %v10474_v12 }
 0x69f   :  { %6779 = vmatprep.subr.bf16.mxu0 %v10479_v13  ;;  %6865 = vmatprep.subr.bf16.mxu1 %v10482_v42 }
 0x6a2   :  { %6780 = vmatpush1.bf16.msra.mxu0 %v10477_v20  ;;  %6866 = vmatpush1.bf16.msra.mxu1 %v10480_v15  ;;  %v10507_v15 = vld [vmem:[#allocation5 + $0x1a00] ss:$16 sps:$4 sm:$0xff]  }
 0x6a3   :  { %6781 = vmatprep.subr.bf16.mxu0 %v10485_v22  ;;  %6867 = vmatprep.subr.bf16.mxu1 %v10488_v27  ;;  %v10510_v22 = vld [vmem:[#allocation5 + $0x1a08] ss:$16 sps:$4 sm:$0xff]   ;;  %v10515_v27 = vld [vmem:[#allocation5 + $0x1a24] ss:$16 sps:$4 sm:$0xff]  }
 0x6a6   :  { %6782 = vmatpush1.bf16.msra.mxu0 %v10483_v24  ;;  %6868 = vmatpush1.bf16.msra.mxu1 %v10486_v25  ;;  %v10518_v24 = vld [vmem:[#allocation5 + $0x1a2c] ss:$16 sps:$4 sm:$0xff]   ;;  %v10513_v25 = vld [vmem:[#allocation5 + $0x1a20] ss:$16 sps:$4 sm:$0xff]  }
 0x6a7   :  { %6783 = vmatprep.subr.bf16.mxu0 %v10491_v3  ;;  %6869 = vmatprep.subr.bf16.mxu1 %v10494_v28  ;;  %v10516_v3 = vld [vmem:[#allocation5 + $0x1a28] ss:$16 sps:$4 sm:$0xff]   ;;  %v10521_v28 = vld [vmem:[#allocation5 + $0x1a44] ss:$16 sps:$4 sm:$0xff]  }
 0x6aa   :  { %6784 = vmatpush1.bf16.msra.mxu0 %v10489_v32  ;;  %6870 = vmatpush1.bf16.msra.mxu1 %v10492_v33  ;;  %v10524_v32 = vld [vmem:[#allocation5 + $0x1a4c] ss:$16 sps:$4 sm:$0xff]   ;;  %v10519_v33 = vld [vmem:[#allocation5 + $0x1a40] ss:$16 sps:$4 sm:$0xff]  }
 0x6ab   :  { %6785 = vmatprep.subr.bf16.mxu0 %v10497_v5  ;;  %6871 = vmatprep.subr.bf16.mxu1 %v10500_v37  ;;  %v10522_v5 = vld [vmem:[#allocation5 + $0x1a48] ss:$16 sps:$4 sm:$0xff]   ;;  %v10527_v37 = vld [vmem:[#allocation5 + $0x1a64] ss:$16 sps:$4 sm:$0xff]  }
 0x6ae   :  { %6786 = vmatpush1.bf16.msra.mxu0 %v10495_v38  ;;  %6872 = vmatpush1.bf16.msra.mxu1 %v10498_v40  ;;  %v10530_v38 = vld [vmem:[#allocation5 + $0x1a6c] ss:$16 sps:$4 sm:$0xff]   ;;  %v10525_v40 = vld [vmem:[#allocation5 + $0x1a60] ss:$16 sps:$4 sm:$0xff]  }
 0x6af   :  { %6787 = vmatprep.subr.bf16.mxu0 %v10503_v41  ;;  %6873 = vmatprep.subr.bf16.mxu1 %v10506_v23  ;;  %v10528_v41 = vld [vmem:[#allocation5 + $0x1a68] ss:$16 sps:$4 sm:$0xff]   ;;  %v10533_v23 = vld [vmem:[#allocation5 + $0x1a84] ss:$16 sps:$4 sm:$0xff]  }
 0x6b2   :  { %6788 = vmatpush1.bf16.msra.mxu0 %v10501_v43  ;;  %6874 = vmatpush1.bf16.msra.mxu1 %v10504_v45  ;;  %v10536_v43 = vld [vmem:[#allocation5 + $0x1a8c] ss:$16 sps:$4 sm:$0xff]   ;;  %v10531_v45 = vld [vmem:[#allocation5 + $0x1a80] ss:$16 sps:$4 sm:$0xff]  }
 0x6b3   :  { %6800 = vmatprep.subr.bf16.mxu0 %v10509_v46  ;;  %6886 = vmatprep.subr.bf16.mxu1 %v10512_v53  ;;  %v10534_v46 = vld [vmem:[#allocation5 + $0x1a88] ss:$16 sps:$4 sm:$0xff]   ;;  %v10539_v53 = vld [vmem:[#allocation5 + $0x1aa4] ss:$16 sps:$4 sm:$0xff]  }
 0x748   :  { %v5858_v58 = vpop.f32.mrb[20].mxu0  ;;  %v5944_v35 = vpop.f32.mrb[20].mxu1 }
 0x749   :  { %v9161_v36 = vadd.f32 %v5858_v58, %v5124_v30  ;;  %v9165_v61 = vadd.f32 %v5944_v35, %v5132_v31  ;;  %v5860_v16 = vpop.f32.mrb[21].mxu0  ;;  %v5946_v44 = vpop.f32.mrb[21].mxu1  ;;  %v10543_v58 = vld [vmem:[#allocation5 + $0x1ac0] ss:$16 sps:$4 sm:$0xff]   ;;  %v10546_v35 = vld [vmem:[#allocation5 + $0x1ac8] ss:$16 sps:$4 sm:$0xff]  }
 0x74a   :  { %v9162_v2 = vadd.f32 %v5860_v16, %v5128_v56  ;;  %v9166_v21 = vadd.f32 %v5946_v44, %v5136_v34  ;;  %v5862_v47 = vpop.f32.mrb[22].mxu0  ;;  %v5948_v48 = vpop.f32.mrb[22].mxu1  ;;  %v10549_v16 = vld [vmem:[#allocation5 + $0x1ae0] ss:$16 sps:$4 sm:$0xff]   ;;  %v10552_v44 = vld [vmem:[#allocation5 + $0x1ae8] ss:$16 sps:$4 sm:$0xff]  }
 0x74b   :  { %v9163_v4 = vadd.f32 %v5862_v47, %v5124_v30  ;;  %v9167_v39 = vadd.f32 %v5948_v48, %v5132_v31  ;;  %v5864_v50 = vpop.f32.mrb[23].mxu0  ;;  %v5950_v6 = vpop.f32.mrb[23].mxu1  ;;  %v5953_v26 = vmax.f32 %v9161_v36, 0.0  ;;  %v5955_v7 = vmax.f32 %v9165_v61, 0.0  ;;  %v10537_v30 = vld [vmem:[#allocation5 + $0x1aa0] ss:$16 sps:$4 sm:$0xff]  }
 0x74c   :  { %v9164_v51 = vadd.f32 %v5864_v50, %v5128_v56  ;;  %v9168_v52 = vadd.f32 %v5950_v6, %v5136_v34  ;;  %v5954_v9 = vmax.f32 %v9162_v2, 0.0  ;;  %v5956_v10 = vmax.f32 %v9166_v21, 0.0  ;;  %v10540_v31 = vld [vmem:[#allocation5 + $0x1aa8] ss:$16 sps:$4 sm:$0xff]   ;;  %v10545_v56 = vld [vmem:[#allocation5 + $0x1ac4] ss:$16 sps:$4 sm:$0xff]  }
 0x74d   :  { %v5957_v8 = vmax.f32 %v9163_v4, 0.0  ;;  %v5959_v57 = vmax.f32 %v9167_v39, 0.0  ;;  %v10548_v34 = vld [vmem:[#allocation5 + $0x1acc] ss:$16 sps:$4 sm:$0xff]   ;;  %v10551_v36 = vld [vmem:[#allocation5 + $0x1ae4] ss:$16 sps:$4 sm:$0xff]  }
 0x74e   :  { %v5958_v11 = vmax.f32 %v9164_v51, 0.0  ;;  %v5960_v59 = vmax.f32 %v9168_v52, 0.0  ;;  %v10554_v61 = vld [vmem:[#allocation5 + $0x1aec] ss:$16 sps:$4 sm:$0xff]   ;;  %v10557_v2 = vld [vmem:[#allocation5 + $0x1b04] ss:$16 sps:$4 sm:$0xff]  }
 0x74f   :  { %v5961_v12 = vpack.c.bf16 %v5957_v8, %v5953_v26  ;;  %v11216_v13 = vpack.c.bf16 %v5959_v57, %v5955_v7  ;;  %v10560_v21 = vld [vmem:[#allocation5 + $0x1b0c] ss:$16 sps:$4 sm:$0xff]   ;;  %v10555_v47 = vld [vmem:[#allocation5 + $0x1b00] ss:$16 sps:$4 sm:$0xff]   ;;  %v10558_v48 = vld [vmem:[#allocation5 + $0x1b08] ss:$16 sps:$4 sm:$0xff]  }
 0x750   :  { %v5962_v42 = vpack.c.bf16 %v5958_v11, %v5954_v9  ;;  %v5964_v20 = vpack.c.bf16 %v5960_v59, %v5956_v10  ;;  %v10563_v4 = vld [vmem:[#allocation5 + $0x1b24] ss:$16 sps:$4 sm:$0xff]   ;;  %v10566_v39 = vld [vmem:[#allocation5 + $0x1b2c] ss:$16 sps:$4 sm:$0xff]   ;;  %v10561_v50 = vld [vmem:[#allocation5 + $0x1b20] ss:$16 sps:$4 sm:$0xff]  }
 0x751   :  { %v10564_v6 = vld [vmem:[#allocation5 + $0x1b28] ss:$16 sps:$4 sm:$0xff]   ;;  %v10569_v51 = vld [vmem:[#allocation5 + $0x1b44] ss:$16 sps:$4 sm:$0xff]   ;;  %v10572_v52 = vld [vmem:[#allocation5 + $0x1b4c] ss:$16 sps:$4 sm:$0xff]  }
 0x752   :  { %6789 = vmatprep.mubr.bf16.mxu0 %v5962_v42  ;;  %6875 = vmatprep.mubr.bf16.mxu1 %v5962_v42  ;;  %v10567_v26 = vld [vmem:[#allocation5 + $0x1b40] ss:$16 sps:$4 sm:$0xff]   ;;  %v10570_v7 = vld [vmem:[#allocation5 + $0x1b48] ss:$16 sps:$4 sm:$0xff]   ;;  %v10575_v8 = vld [vmem:[#allocation5 + $0x1b64] ss:$16 sps:$4 sm:$0xff]  }
 0x753   :  { %6790 = vmatmul.mubr.bf16.vlgmr.msra.gmra.mrb[24].mxu0 %v5961_v12  ;;  %6876 = vmatmul.mubr.bf16.vlgmr.msra.gmra.mrb[24].mxu1 %v5961_v12  ;;  %v10578_v57 = vld [vmem:[#allocation5 + $0x1b6c] ss:$16 sps:$4 sm:$0xff]   ;;  %v10573_v9 = vld [vmem:[#allocation5 + $0x1b60] ss:$16 sps:$4 sm:$0xff]   ;;  %v10576_v10 = vld [vmem:[#allocation5 + $0x1b68] ss:$16 sps:$4 sm:$0xff]  }
 0x754   :  { %6801 = vmatpush1.bf16.msra.mxu0 %v10507_v15  ;;  %6887 = vmatpush1.bf16.msra.mxu1 %v10510_v22  ;;  %v10581_v11 = vld [vmem:[#allocation5 + $0x1b84] ss:$16 sps:$4 sm:$0xff]   ;;  %v10584_v59 = vld [vmem:[#allocation5 + $0x1b8c] ss:$16 sps:$4 sm:$0xff]   ;;  %v10579_v12 = vld [vmem:[#allocation5 + $0x1b80] ss:$16 sps:$4 sm:$0xff]  }
 0x755   :  { %6832 = vmatprep.mubr.bf16.mxu0 %v5964_v20  ;;  %6918 = vmatprep.mubr.bf16.mxu1 %v5964_v20  ;;  %v10582_v42 = vld [vmem:[#allocation5 + $0x1b88] ss:$16 sps:$4 sm:$0xff]   ;;  %v10587_v20 = vld [vmem:[#allocation5 + $0x1ba4] ss:$16 sps:$4 sm:$0xff]   ;;  %v10590_v15 = vld [vmem:[#allocation5 + $0x1bac] ss:$16 sps:$4 sm:$0xff]  }
 0x756   :  { %6802 = vmatprep.subr.bf16.mxu0 %v10515_v27  ;;  %6888 = vmatprep.subr.bf16.mxu1 %v10518_v24  ;;  %v10585_v22 = vld [vmem:[#allocation5 + $0x1ba0] ss:$16 sps:$4 sm:$0xff]   ;;  %v10588_v27 = vld [vmem:[#allocation5 + $0x1ba8] ss:$16 sps:$4 sm:$0xff]   ;;  %v10593_v24 = vld [vmem:[#allocation5 + $0x1bc4] ss:$16 sps:$4 sm:$0xff]  }
 0x758   :  { %6803 = vmatpush1.bf16.msra.mxu0 %v10513_v25  ;;  %6889 = vmatpush1.bf16.msra.mxu1 %v10516_v3  ;;  %v10596_v25 = vld [vmem:[#allocation5 + $0x1bcc] ss:$16 sps:$4 sm:$0xff]   ;;  %v10591_v3 = vld [vmem:[#allocation5 + $0x1bc0] ss:$16 sps:$4 sm:$0xff]  }
 0x759   :  { %6804 = vmatprep.subr.bf16.mxu0 %v10521_v28  ;;  %6890 = vmatprep.subr.bf16.mxu1 %v10524_v32  ;;  %v10594_v28 = vld [vmem:[#allocation5 + $0x1bc8] ss:$16 sps:$4 sm:$0xff]   ;;  %v10599_v32 = vld [vmem:[#allocation5 + $0x1be4] ss:$16 sps:$4 sm:$0xff]  }
 0x75c   :  { %6805 = vmatpush1.bf16.msra.mxu0 %v10519_v33  ;;  %6891 = vmatpush1.bf16.msra.mxu1 %v10522_v5  ;;  %v10602_v33 = vld [vmem:[#allocation5 + $0x1bec] ss:$16 sps:$4 sm:$0xff]   ;;  %v10597_v5 = vld [vmem:[#allocation5 + $0x1be0] ss:$16 sps:$4 sm:$0xff]  }
 0x75d   :  { %6806 = vmatprep.subr.bf16.mxu0 %v10527_v37  ;;  %6892 = vmatprep.subr.bf16.mxu1 %v10530_v38  ;;  %v10600_v37 = vld [vmem:[#allocation5 + $0x1be8] ss:$16 sps:$4 sm:$0xff]   ;;  %v10605_v38 = vld [vmem:[#allocation5 + $0x1c04] ss:$16 sps:$4 sm:$0xff]  }
 0x760   :  { %6807 = vmatpush1.bf16.msra.mxu0 %v10525_v40  ;;  %6893 = vmatpush1.bf16.msra.mxu1 %v10528_v41  ;;  %v10608_v40 = vld [vmem:[#allocation5 + $0x1c0c] ss:$16 sps:$4 sm:$0xff]   ;;  %v10603_v41 = vld [vmem:[#allocation5 + $0x1c00] ss:$16 sps:$4 sm:$0xff]  }
 0x761   :  { %6808 = vmatprep.subr.bf16.mxu0 %v10533_v23  ;;  %6894 = vmatprep.subr.bf16.mxu1 %v10536_v43  ;;  %v10606_v23 = vld [vmem:[#allocation5 + $0x1c08] ss:$16 sps:$4 sm:$0xff]   ;;  %v10611_v43 = vld [vmem:[#allocation5 + $0x1c24] ss:$16 sps:$4 sm:$0xff]  }
 0x764   :  { %6809 = vmatpush1.bf16.msra.mxu0 %v10531_v45  ;;  %6895 = vmatpush1.bf16.msra.mxu1 %v10534_v46  ;;  %v10614_v45 = vld [vmem:[#allocation5 + $0x1c2c] ss:$16 sps:$4 sm:$0xff]   ;;  %v10609_v46 = vld [vmem:[#allocation5 + $0x1c20] ss:$16 sps:$4 sm:$0xff]  }
 0x765   :  { %6810 = vmatprep.subr.bf16.mxu0 %v10539_v53  ;;  %6896 = vmatprep.subr.bf16.mxu1 %v10542_v55  ;;  %v10612_v53 = vld [vmem:[#allocation5 + $0x1c28] ss:$16 sps:$4 sm:$0xff]   ;;  %v10617_v55 = vld [vmem:[#allocation5 + $0x1c44] ss:$16 sps:$4 sm:$0xff]  }
 0x768   :  { %6811 = vmatpush1.bf16.msra.mxu0 %v10537_v30  ;;  %6897 = vmatpush1.bf16.msra.mxu1 %v10540_v31  ;;  %v10620_v30 = vld [vmem:[#allocation5 + $0x1c4c] ss:$16 sps:$4 sm:$0xff]   ;;  %v10615_v31 = vld [vmem:[#allocation5 + $0x1c40] ss:$16 sps:$4 sm:$0xff]  }
 0x769   :  { %6812 = vmatprep.subr.bf16.mxu0 %v10545_v56  ;;  %6898 = vmatprep.subr.bf16.mxu1 %v10548_v34  ;;  %v10623_v56 = vld [vmem:[#allocation5 + $0x1c64] ss:$16 sps:$4 sm:$0xff]   ;;  %v10626_v34 = vld [vmem:[#allocation5 + $0x1c6c] ss:$16 sps:$4 sm:$0xff]  }
 0x76c   :  { %6813 = vmatpush1.bf16.msra.mxu0 %v10543_v58  ;;  %6899 = vmatpush1.bf16.msra.mxu1 %v10546_v35  ;;  %v10621_v58 = vld [vmem:[#allocation5 + $0x1c60] ss:$16 sps:$4 sm:$0xff]   ;;  %v10624_v35 = vld [vmem:[#allocation5 + $0x1c68] ss:$16 sps:$4 sm:$0xff]  }
 0x76d   :  { %6814 = vmatprep.subr.bf16.mxu0 %v10551_v36  ;;  %6900 = vmatprep.subr.bf16.mxu1 %v10554_v61  ;;  %v10629_v36 = vld [vmem:[#allocation5 + $0x1c84] ss:$16 sps:$4 sm:$0xff]   ;;  %v10632_v61 = vld [vmem:[#allocation5 + $0x1c8c] ss:$16 sps:$4 sm:$0xff]  }
 0x770   :  { %6815 = vmatpush1.bf16.msra.mxu0 %v10549_v16  ;;  %6901 = vmatpush1.bf16.msra.mxu1 %v10552_v44  ;;  %v10627_v16 = vld [vmem:[#allocation5 + $0x1c80] ss:$16 sps:$4 sm:$0xff]   ;;  %v10630_v44 = vld [vmem:[#allocation5 + $0x1c88] ss:$16 sps:$4 sm:$0xff]  }
 0x771   :  { %6816 = vmatprep.subr.bf16.mxu0 %v10557_v2  ;;  %6902 = vmatprep.subr.bf16.mxu1 %v10560_v21  ;;  %v10635_v2 = vld [vmem:[#allocation5 + $0x1ca4] ss:$16 sps:$4 sm:$0xff]   ;;  %v10638_v21 = vld [vmem:[#allocation5 + $0x1cac] ss:$16 sps:$4 sm:$0xff]  }
 0x774   :  { %6817 = vmatpush1.bf16.msra.mxu0 %v10555_v47  ;;  %6903 = vmatpush1.bf16.msra.mxu1 %v10558_v48  ;;  %v10633_v47 = vld [vmem:[#allocation5 + $0x1ca0] ss:$16 sps:$4 sm:$0xff]   ;;  %v10636_v48 = vld [vmem:[#allocation5 + $0x1ca8] ss:$16 sps:$4 sm:$0xff]  }
 0x775   :  { %6818 = vmatprep.subr.bf16.mxu0 %v10563_v4  ;;  %6904 = vmatprep.subr.bf16.mxu1 %v10566_v39  ;;  %v10641_v4 = vld [vmem:[#allocation5 + $0x1cc4] ss:$16 sps:$4 sm:$0xff]   ;;  %v10644_v39 = vld [vmem:[#allocation5 + $0x1ccc] ss:$16 sps:$4 sm:$0xff]  }
 0x778   :  { %6819 = vmatpush1.bf16.msra.mxu0 %v10561_v50  ;;  %6905 = vmatpush1.bf16.msra.mxu1 %v10564_v6  ;;  %v10639_v50 = vld [vmem:[#allocation5 + $0x1cc0] ss:$16 sps:$4 sm:$0xff]   ;;  %v10642_v6 = vld [vmem:[#allocation5 + $0x1cc8] ss:$16 sps:$4 sm:$0xff]  }
 0x779   :  { %6820 = vmatprep.subr.bf16.mxu0 %v10569_v51  ;;  %6906 = vmatprep.subr.bf16.mxu1 %v10572_v52  ;;  %v10647_v51 = vld [vmem:[#allocation5 + $0x1ce4] ss:$16 sps:$4 sm:$0xff]   ;;  %v10650_v52 = vld [vmem:[#allocation5 + $0x1cec] ss:$16 sps:$4 sm:$0xff]  }
 0x77c   :  { %6821 = vmatpush1.bf16.msra.mxu0 %v10567_v26  ;;  %6907 = vmatpush1.bf16.msra.mxu1 %v10570_v7  ;;  %v10645_v26 = vld [vmem:[#allocation5 + $0x1ce0] ss:$16 sps:$4 sm:$0xff]   ;;  %v10648_v7 = vld [vmem:[#allocation5 + $0x1ce8] ss:$16 sps:$4 sm:$0xff]  }
 0x77d   :  { %6822 = vmatprep.subr.bf16.mxu0 %v10575_v8  ;;  %6908 = vmatprep.subr.bf16.mxu1 %v10578_v57  ;;  %v10653_v8 = vld [vmem:[#allocation5 + $0x1d04] ss:$16 sps:$4 sm:$0xff]   ;;  %v10656_v57 = vld [vmem:[#allocation5 + $0x1d0c] ss:$16 sps:$4 sm:$0xff]  }
 0x780   :  { %6823 = vmatpush1.bf16.msra.mxu0 %v10573_v9  ;;  %6909 = vmatpush1.bf16.msra.mxu1 %v10576_v10  ;;  %v10651_v9 = vld [vmem:[#allocation5 + $0x1d00] ss:$16 sps:$4 sm:$0xff]   ;;  %v10654_v10 = vld [vmem:[#allocation5 + $0x1d08] ss:$16 sps:$4 sm:$0xff]  }
 0x781   :  { %6824 = vmatprep.subr.bf16.mxu0 %v10581_v11  ;;  %6910 = vmatprep.subr.bf16.mxu1 %v10584_v59  ;;  %v10659_v11 = vld [vmem:[#allocation5 + $0x1d24] ss:$16 sps:$4 sm:$0xff]   ;;  %v10662_v59 = vld [vmem:[#allocation5 + $0x1d2c] ss:$16 sps:$4 sm:$0xff]  }
 0x784   :  { %6825 = vmatpush1.bf16.msra.mxu0 %v10579_v12  ;;  %6911 = vmatpush1.bf16.msra.mxu1 %v10582_v42  ;;  %v10657_v12 = vld [vmem:[#allocation5 + $0x1d20] ss:$16 sps:$4 sm:$0xff]   ;;  %v10660_v42 = vld [vmem:[#allocation5 + $0x1d28] ss:$16 sps:$4 sm:$0xff]  }
 0x785   :  { %6826 = vmatprep.subr.bf16.mxu0 %v10587_v20  ;;  %6912 = vmatprep.subr.bf16.mxu1 %v10590_v15  ;;  %v10665_v20 = vld [vmem:[#allocation5 + $0x1d44] ss:$16 sps:$4 sm:$0xff]   ;;  %v10668_v15 = vld [vmem:[#allocation5 + $0x1d4c] ss:$16 sps:$4 sm:$0xff]  }
 0x788   :  { %6827 = vmatpush1.bf16.msra.mxu0 %v10585_v22  ;;  %6913 = vmatpush1.bf16.msra.mxu1 %v10588_v27  ;;  %v10663_v22 = vld [vmem:[#allocation5 + $0x1d40] ss:$16 sps:$4 sm:$0xff]   ;;  %v10666_v27 = vld [vmem:[#allocation5 + $0x1d48] ss:$16 sps:$4 sm:$0xff]  }
 0x789   :  { %6828 = vmatprep.subr.bf16.mxu0 %v10593_v24  ;;  %6914 = vmatprep.subr.bf16.mxu1 %v10596_v25  ;;  %v10671_v24 = vld [vmem:[#allocation5 + $0x1d64] ss:$16 sps:$4 sm:$0xff]   ;;  %v10674_v25 = vld [vmem:[#allocation5 + $0x1d6c] ss:$16 sps:$4 sm:$0xff]  }
 0x78c   :  { %6829 = vmatpush1.bf16.msra.mxu0 %v10591_v3  ;;  %6915 = vmatpush1.bf16.msra.mxu1 %v10594_v28  ;;  %v10669_v3 = vld [vmem:[#allocation5 + $0x1d60] ss:$16 sps:$4 sm:$0xff]   ;;  %v10672_v28 = vld [vmem:[#allocation5 + $0x1d68] ss:$16 sps:$4 sm:$0xff]  }
 0x78d   :  { %6830 = vmatprep.subr.bf16.mxu0 %v10599_v32  ;;  %6916 = vmatprep.subr.bf16.mxu1 %v10602_v33  ;;  %v10677_v32 = vld [vmem:[#allocation5 + $0x1d84] ss:$16 sps:$4 sm:$0xff]   ;;  %v10680_v33 = vld [vmem:[#allocation5 + $0x1d8c] ss:$16 sps:$4 sm:$0xff]  }
 0x790   :  { %6831 = vmatpush1.bf16.msra.mxu0 %v10597_v5  ;;  %6917 = vmatpush1.bf16.msra.mxu1 %v10600_v37  ;;  %v10675_v5 = vld [vmem:[#allocation5 + $0x1d80] ss:$16 sps:$4 sm:$0xff]   ;;  %v10678_v37 = vld [vmem:[#allocation5 + $0x1d88] ss:$16 sps:$4 sm:$0xff]  }
 0x791   :  { %7898 = vmatprep.subr.bf16.mxu0 %v10605_v38  ;;  %7984 = vmatprep.subr.bf16.mxu1 %v10608_v40  ;;  %v10683_v38 = vld [vmem:[#allocation5 + $0x1da4] ss:$16 sps:$4 sm:$0xff]   ;;  %v10686_v40 = vld [vmem:[#allocation5 + $0x1dac] ss:$16 sps:$4 sm:$0xff]  }
 0x793   :  { %6833 = vmatmul.mubr.bf16.vlgmr.msra.gmra.mrb[24].mxu0 %v11216_v13  ;;  %6919 = vmatmul.mubr.bf16.vlgmr.msra.gmra.mrb[24].mxu1 %v11216_v13  ;;  %v10618_v13 = vld [vmem:[#allocation5 + $0x1c48] ss:$16 sps:$4 sm:$0xff]  }
 0x794   :  { %7899 = vmatpush1.bf16.msra.mxu0 %v10603_v41  ;;  %7985 = vmatpush1.bf16.msra.mxu1 %v10606_v23  ;;  %v10681_v41 = vld [vmem:[#allocation5 + $0x1da0] ss:$16 sps:$4 sm:$0xff]   ;;  %v10684_v23 = vld [vmem:[#allocation5 + $0x1da8] ss:$16 sps:$4 sm:$0xff]  }
 0x795   :  { %7900 = vmatprep.subr.bf16.mxu0 %v10611_v43  ;;  %7986 = vmatprep.subr.bf16.mxu1 %v10614_v45  ;;  %v10687_v43 = vld [vmem:[#allocation5 + $0x1dc0] ss:$16 sps:$4 sm:$0xff]   ;;  %v10689_v45 = vld [vmem:[#allocation5 + $0x1dc4] ss:$16 sps:$4 sm:$0xff]  }
 0x798   :  { %7901 = vmatpush1.bf16.msra.mxu0 %v10609_v46  ;;  %7987 = vmatpush1.bf16.msra.mxu1 %v10612_v53  ;;  %v10690_v46 = vld [vmem:[#allocation5 + $0x1dc8] ss:$16 sps:$4 sm:$0xff]   ;;  %v10692_v53 = vld [vmem:[#allocation5 + $0x1dcc] ss:$16 sps:$4 sm:$0xff]  }
 0x799   :  { %7902 = vmatprep.subr.bf16.mxu0 %v10617_v55  ;;  %7988 = vmatprep.subr.bf16.mxu1 %v10620_v30  ;;  %v10695_v55 = vld [vmem:[#allocation5 + $0x1de4] ss:$16 sps:$4 sm:$0xff]   ;;  %v10698_v30 = vld [vmem:[#allocation5 + $0x1dec] ss:$16 sps:$4 sm:$0xff]  }
 0x79c   :  { %7903 = vmatpush1.bf16.msra.mxu0 %v10615_v31  ;;  %7989 = vmatpush1.bf16.msra.mxu1 %v10618_v13  ;;  %v10693_v31 = vld [vmem:[#allocation5 + $0x1de0] ss:$16 sps:$4 sm:$0xff]   ;;  %v10696_v13 = vld [vmem:[#allocation5 + $0x1de8] ss:$16 sps:$4 sm:$0xff]  }
 0x79d   :  { %7904 = vmatprep.subr.bf16.mxu0 %v10623_v56  ;;  %7990 = vmatprep.subr.bf16.mxu1 %v10626_v34  ;;  %v10701_v56 = vld [vmem:[#allocation5 + $0x1e04] ss:$16 sps:$4 sm:$0xff]   ;;  %v10704_v34 = vld [vmem:[#allocation5 + $0x1e0c] ss:$16 sps:$4 sm:$0xff]  }
 0x7a0   :  { %7905 = vmatpush1.bf16.msra.mxu0 %v10621_v58  ;;  %7991 = vmatpush1.bf16.msra.mxu1 %v10624_v35  ;;  %v6095_v58 = vld [vmem:[#allocation7 + $0x6] ss:$8 sm:$0xf] }
 0x7a1   :  { %7906 = vmatprep.subr.bf16.mxu0 %v10629_v36  ;;  %7992 = vmatprep.subr.bf16.mxu1 %v10632_v61  ;;  %v6100_v35 = vrot.slane %v6095_v58, %v11054_v18  ;;  %v6108_v36 = vrot.slane %v6095_v58, %v11088_v49  ;;  %v6104_v61 = vrot.slane %v6095_v58, %v11051_v17 }
 0x7a4   :  { %7907 = vmatpush1.bf16.msra.mxu0 %v10627_v16  ;;  %7993 = vmatpush1.bf16.msra.mxu1 %v10630_v44  ;;  %v6112_v16 = vrot.slane %v6095_v58, %v11057_v19 }
 0x7a5   :  { %7908 = vmatprep.subr.bf16.mxu0 %v10635_v2  ;;  %7994 = vmatprep.subr.bf16.mxu1 %v10638_v21 }
 0x7a8   :  { %7909 = vmatpush1.bf16.msra.mxu0 %v10633_v47  ;;  %7995 = vmatpush1.bf16.msra.mxu1 %v10636_v48 }
 0x7a9   :  { %7910 = vmatprep.subr.bf16.mxu0 %v10641_v4  ;;  %7996 = vmatprep.subr.bf16.mxu1 %v10644_v39 }
 0x7ac   :  { %7911 = vmatpush1.bf16.msra.mxu0 %v10639_v50  ;;  %7997 = vmatpush1.bf16.msra.mxu1 %v10642_v6 }
 0x7ad   :  { %7912 = vmatprep.subr.bf16.mxu0 %v10647_v51  ;;  %7998 = vmatprep.subr.bf16.mxu1 %v10650_v52 }
 0x7b0   :  { %7913 = vmatpush1.bf16.msra.mxu0 %v10645_v26  ;;  %7999 = vmatpush1.bf16.msra.mxu1 %v10648_v7 }
 0x7b1   :  { %7914 = vmatprep.subr.bf16.mxu0 %v10653_v8  ;;  %8000 = vmatprep.subr.bf16.mxu1 %v10656_v57 }
 0x7b4   :  { %7915 = vmatpush1.bf16.msra.mxu0 %v10651_v9  ;;  %8001 = vmatpush1.bf16.msra.mxu1 %v10654_v10 }
 0x7b5   :  { %7916 = vmatprep.subr.bf16.mxu0 %v10659_v11  ;;  %8002 = vmatprep.subr.bf16.mxu1 %v10662_v59 }
 0x7b8   :  { %7917 = vmatpush1.bf16.msra.mxu0 %v10657_v12  ;;  %8003 = vmatpush1.bf16.msra.mxu1 %v10660_v42 }
 0x7b9   :  { %7918 = vmatprep.subr.bf16.mxu0 %v10665_v20  ;;  %8004 = vmatprep.subr.bf16.mxu1 %v10668_v15 }
 0x7bc   :  { %7919 = vmatpush1.bf16.msra.mxu0 %v10663_v22  ;;  %8005 = vmatpush1.bf16.msra.mxu1 %v10666_v27 }
 0x7bd   :  { %7920 = vmatprep.subr.bf16.mxu0 %v10671_v24  ;;  %8006 = vmatprep.subr.bf16.mxu1 %v10674_v25 }
 0x7c0   :  { %7921 = vmatpush1.bf16.msra.mxu0 %v10669_v3  ;;  %8007 = vmatpush1.bf16.msra.mxu1 %v10672_v28 }
 0x7c1   :  { %7922 = vmatprep.subr.bf16.mxu0 %v10677_v32  ;;  %8008 = vmatprep.subr.bf16.mxu1 %v10680_v33 }
 0x7c4   :  { %7923 = vmatpush1.bf16.msra.mxu0 %v10675_v5  ;;  %8009 = vmatpush1.bf16.msra.mxu1 %v10678_v37 }
 0x7c5   :  { %7924 = vmatprep.subr.bf16.mxu0 %v10683_v38  ;;  %8010 = vmatprep.subr.bf16.mxu1 %v10686_v40 }
 0x7c8   :  { %7925 = vmatpush1.bf16.msra.mxu0 %v10681_v41  ;;  %8011 = vmatpush1.bf16.msra.mxu1 %v10684_v23 }
 0x7c9   :  { %7926 = vmatprep.subr.bf16.mxu0 %v10689_v45  ;;  %8012 = vmatprep.subr.bf16.mxu1 %v10692_v53 }
 0x7cc   :  { %7927 = vmatpush1.bf16.msra.mxu0 %v10687_v43  ;;  %8013 = vmatpush1.bf16.msra.mxu1 %v10690_v46 }
 0x7cd   :  { %7928 = vmatprep.subr.bf16.mxu0 %v10695_v55  ;;  %8014 = vmatprep.subr.bf16.mxu1 %v10698_v30 }
 0x7d0   :  { %7929 = vmatpush1.bf16.msra.mxu0 %v10693_v31  ;;  %8015 = vmatpush1.bf16.msra.mxu1 %v10696_v13 }
 0x7d1   :  { %7941 = vmatprep.subr.bf16.mxu0 %v10701_v56  ;;  %8027 = vmatprep.subr.bf16.mxu1 %v10704_v34 }
 0x866   :  { %v6834_v44 = vpop.f32.mrb[24].mxu0  ;;  %v6920_v2 = vpop.f32.mrb[24].mxu1 }
 0x867   :  { %v9169_v21 = vadd.f32 %v6834_v44, %v6100_v35  ;;  %v9173_v47 = vadd.f32 %v6920_v2, %v6108_v36  ;;  %v6836_v48 = vpop.f32.mrb[25].mxu0  ;;  %v6922_v4 = vpop.f32.mrb[25].mxu1 }
 0x868   :  { %v9170_v39 = vadd.f32 %v6836_v48, %v6104_v61  ;;  %v9174_v50 = vadd.f32 %v6922_v4, %v6112_v16  ;;  %v6838_v6 = vpop.f32.mrb[26].mxu0  ;;  %v6924_v51 = vpop.f32.mrb[26].mxu1 }
 0x869   :  { %v9171_v52 = vadd.f32 %v6838_v6, %v6100_v35  ;;  %v9175_v26 = vadd.f32 %v6924_v51, %v6108_v36  ;;  %v6840_v7 = vpop.f32.mrb[27].mxu0  ;;  %v6926_v8 = vpop.f32.mrb[27].mxu1  ;;  %v6929_v10 = vadd.f32 %v9169_v21, %v11180_v62  ;;  %v6931_v11 = vadd.f32 %v9173_v47, %v11208_v54 }
 0x86a   :  { %v9172_v57 = vadd.f32 %v6840_v7, %v6104_v61  ;;  %v9176_v9 = vadd.f32 %v6926_v8, %v6112_v16  ;;  %v6930_v42 = vadd.f32 %v9170_v39, %v11177_v60  ;;  %v6932_v20 = vadd.f32 %v9174_v50, %v11192_v1 }
 0x86b   :  { %v6933_v59 = vadd.f32 %v9171_v52, %v11183_v63  ;;  %v6935_v12 = vadd.f32 %v9175_v26, %v11205_v14 }
 0x86c   :  { %v6934_v15 = vadd.f32 %v9172_v57, %v11186_v29  ;;  %v6936_v22 = vadd.f32 %v9176_v9, %v11189_v0 }
 0x86d   :  { %v6937_v27 = vadd.f32 %v6933_v59, %v6929_v10  ;;  %v6951_v24 = vadd.f32 %v6935_v12, %v6931_v11 }
 0x86e   :  { %v6944_v25 = vadd.f32 %v6934_v15, %v6930_v42  ;;  %v6958_v3 = vadd.f32 %v6936_v22, %v6932_v20 }
 0x86f   :  { %v6938_v28 = vrot.slane %v6937_v27, 4  ;;  %v6952_v62 = vrot.slane %v6951_v24, 4 }
 0x870   :  { %v6945_v32 = vrot.slane %v6944_v25, 4  ;;  %v6959_v54 = vrot.slane %v6958_v3, 4 }
 0x871   :  { %v6939_v33 = vadd.f32 %v6938_v28, %v6937_v27  ;;  %v6953_v63 = vadd.f32 %v6952_v62, %v6951_v24 }
 0x872   :  { %v6946_v5 = vadd.f32 %v6945_v32, %v6944_v25  ;;  %v6960_v14 = vadd.f32 %v6959_v54, %v6958_v3 }
 0x873   :  { %v6940_v37 = vrot.slane %v6939_v33, 2  ;;  %v6954_v60 = vrot.slane %v6953_v63, 2 }
 0x874   :  { %v6947_v38 = vrot.slane %v6946_v5, 2  ;;  %v6961_v1 = vrot.slane %v6960_v14, 2 }
 0x875   :  { %v6941_v40 = vadd.f32 %v6940_v37, %v6939_v33  ;;  %v6955_v29 = vadd.f32 %v6954_v60, %v6953_v63 }
 0x876   :  { %v6948_v41 = vadd.f32 %v6947_v38, %v6946_v5  ;;  %v6962_v0 = vadd.f32 %v6961_v1, %v6960_v14 }
 0x877   :  { %v6942_v23 = vrot.slane %v6941_v40, 1  ;;  %v6956_v43 = vrot.slane %v6955_v29, 1 }
 0x878   :  { %v6949_v45 = vrot.slane %v6948_v41, 1  ;;  %v6963_v46 = vrot.slane %v6962_v0, 1 }
 0x879   :  { %v6943_v53 = vadd.f32 %v6942_v23, %v6941_v40  ;;  %v6957_v55 = vadd.f32 %v6956_v43, %v6955_v29 }
 0x87a   :  { %v6950_v30 = vadd.f32 %v6949_v45, %v6948_v41  ;;  %v6964_v31 = vadd.f32 %v6963_v46, %v6962_v0 }
 0x87b   :  { %v6966_v13 = vmul.f32 0.0625, %v6943_v53  ;;  %v6968_v56 = vmul.f32 0.0625, %v6957_v55  ;;  %v7034_v53 = vld [vmem:[#allocation8] sm:$0xf]  ;;  %v7064_v55 = vld [vmem:[#allocation10] sm:$0xf] }
 0x87c   :  { %v6967_v34 = vmul.f32 0.0625, %v6950_v30  ;;  %v6969_v58 = vmul.f32 0.0625, %v6964_v31  ;;  %v7039_v30 = vrot.slane %v7034_v53, %v11054_v18 }
 0x87d   :  { %v11232_v35 = vsub.f32 %v6929_v10, %v6966_v13  ;;  %v11234_v36 = vsub.f32 %v6933_v59, %v6966_v13  ;;  %v11236_v61 = vsub.f32 %v6931_v11, %v6968_v56  ;;  %v11238_v16 = vsub.f32 %v6935_v12, %v6968_v56 }
 0x87e   :  { %v11240_v44 = vsub.f32 %v6930_v42, %v6967_v34  ;;  %v11242_v2 = vsub.f32 %v6934_v15, %v6967_v34  ;;  %v11244_v21 = vsub.f32 %v6932_v20, %v6969_v58  ;;  %v11246_v47 = vsub.f32 %v6936_v22, %v6969_v58 }
 0x87f   :  { %v6978_v48 = vmul.f32 %v11232_v35, %v11232_v35  ;;  %v6982_v4 = vmul.f32 %v11234_v36, %v11234_v36  ;;  %v6980_v39 = vmul.f32 %v11236_v61, %v11236_v61  ;;  %v6984_v50 = vmul.f32 %v11238_v16, %v11238_v16 }
 0x880   :  { %v6979_v6 = vmul.f32 %v11240_v44, %v11240_v44  ;;  %v6983_v51 = vmul.f32 %v11242_v2, %v11242_v2  ;;  %v6981_v52 = vmul.f32 %v11244_v21, %v11244_v21  ;;  %v6985_v26 = vmul.f32 %v11246_v47, %v11246_v47 }
 0x881   :  { %v6986_v7 = vadd.f32 %v6982_v4, %v6978_v48  ;;  %v7000_v8 = vadd.f32 %v6984_v50, %v6980_v39  ;;  %v7047_v13 = vrot.slane %v7034_v53, %v11088_v49  ;;  %v7043_v56 = vrot.slane %v7034_v53, %v11051_v17 }
 0x882   :  { %v6993_v57 = vadd.f32 %v6983_v51, %v6979_v6  ;;  %v7007_v9 = vadd.f32 %v6985_v26, %v6981_v52  ;;  %v7051_v34 = vrot.slane %v7034_v53, %v11057_v19  ;;  %v7073_v39 = vrot.slane %v7064_v55, %v11051_v17  ;;  %v10719_v53 = vld [vmem:[#allocation5 + $0x1e64] ss:$16 sps:$4 sm:$0xff]  }
 0x883   :  { %v6987_v10 = vrot.slane %v6986_v7, 4  ;;  %v7001_v11 = vrot.slane %v7000_v8, 4  ;;  %v7069_v50 = vrot.slane %v7064_v55, %v11054_v18  ;;  %v7081_v26 = vrot.slane %v7064_v55, %v11057_v19 }
 0x884   :  { %v6994_v59 = vrot.slane %v6993_v57, 4  ;;  %v7008_v12 = vrot.slane %v7007_v9, 4 }
 0x885   :  { %v6988_v42 = vadd.f32 %v6987_v10, %v6986_v7  ;;  %v7002_v20 = vadd.f32 %v7001_v11, %v7000_v8  ;;  %v7077_v7 = vrot.slane %v7064_v55, %v11088_v49  ;;  %v10722_v55 = vld [vmem:[#allocation5 + $0x1e6c] ss:$16 sps:$4 sm:$0xff]  }
 0x886   :  { %v6995_v15 = vadd.f32 %v6994_v59, %v6993_v57  ;;  %v7009_v22 = vadd.f32 %v7008_v12, %v7007_v9 }
 0x887   :  { %v6989_v27 = vrot.slane %v6988_v42, 2  ;;  %v7003_v24 = vrot.slane %v7002_v20, 2 }
 0x888   :  { %v6996_v25 = vrot.slane %v6995_v15, 2  ;;  %v7010_v3 = vrot.slane %v7009_v22, 2 }
 0x889   :  { %v6990_v28 = vadd.f32 %v6989_v27, %v6988_v42  ;;  %v7004_v62 = vadd.f32 %v7003_v24, %v7002_v20 }
 0x88a   :  { %v6997_v32 = vadd.f32 %v6996_v25, %v6995_v15  ;;  %v7011_v54 = vadd.f32 %v7010_v3, %v7009_v22 }
 0x88b   :  { %v6991_v33 = vrot.slane %v6990_v28, 1  ;;  %v7005_v63 = vrot.slane %v7004_v62, 1 }
 0x88c   :  { %v6998_v5 = vrot.slane %v6997_v32, 1  ;;  %v7012_v14 = vrot.slane %v7011_v54, 1 }
 0x88d   :  { %v6992_v37 = vadd.f32 %v6991_v33, %v6990_v28  ;;  %v7006_v60 = vadd.f32 %v7005_v63, %v7004_v62 }
 0x88e   :  { %v6999_v38 = vadd.f32 %v6998_v5, %v6997_v32  ;;  %v7013_v1 = vadd.f32 %v7012_v14, %v7011_v54 }
 0x88f   :  { %v7014_v40 = vmul.f32 0.0625, %v6992_v37  ;;  %v7016_v29 = vmul.f32 0.0625, %v7006_v60  ;;  %v10699_v60 = vld [vmem:[#allocation5 + $0x1e00] ss:$16 sps:$4 sm:$0xff]  }
 0x890   :  { %v7015_v41 = vmul.f32 0.0625, %v6999_v38  ;;  %v7017_v0 = vmul.f32 0.0625, %v7013_v1  ;;  %v10702_v38 = vld [vmem:[#allocation5 + $0x1e08] ss:$16 sps:$4 sm:$0xff]  }
 0x891   :  { %v7018_v23 = vadd.f32 1e-05, %v7014_v40  ;;  %v7020_v43 = vadd.f32 1e-05, %v7016_v29  ;;  %v10707_v40 = vld [vmem:[#allocation5 + $0x1e24] ss:$16 sps:$4 sm:$0xff]  }
 0x892   :  { %v7019_v45 = vadd.f32 1e-05, %v7015_v41  ;;  %v7021_v46 = vadd.f32 1e-05, %v7017_v0  ;;  %v10710_v29 = vld [vmem:[#allocation5 + $0x1e2c] ss:$16 sps:$4 sm:$0xff]  }
 0x893   :  { %10795 = vrsqrt.f32 %v7018_v23  ;;  %v10705_v41 = vld [vmem:[#allocation5 + $0x1e20] ss:$16 sps:$4 sm:$0xff]   ;;  %v10708_v0 = vld [vmem:[#allocation5 + $0x1e28] ss:$16 sps:$4 sm:$0xff]   ;;  %v10713_v23 = vld [vmem:[#allocation5 + $0x1e44] ss:$16 sps:$4 sm:$0xff]  }
 0x894   :  { %10797 = vrsqrt.f32 %v7020_v43  ;;  %v10716_v43 = vld [vmem:[#allocation5 + $0x1e4c] ss:$16 sps:$4 sm:$0xff]  }
 0x895   :  { %10799 = vrsqrt.f32 %v7019_v45  ;;  %v10711_v45 = vld [vmem:[#allocation5 + $0x1e40] ss:$16 sps:$4 sm:$0xff]  }
 0x896   :  { %10801 = vrsqrt.f32 %v7021_v46  ;;  %v10714_v46 = vld [vmem:[#allocation5 + $0x1e48] ss:$16 sps:$4 sm:$0xff]  }
 0x89d   :  { %v10796_v31 = vpop.eup %10795 }
 0x89e   :  { %v10798_v58 = vpop.eup %10797  ;;  %v7026_v48 = vmul.f32 %v10796_v31, %v11232_v35  ;;  %v7030_v4 = vmul.f32 %v10796_v31, %v11234_v36  ;;  %v10720_v31 = vld [vmem:[#allocation5 + $0x1e68] ss:$16 sps:$4 sm:$0xff]  }
 0x89f   :  { %v10800_v6 = vpop.eup %10799  ;;  %v7028_v51 = vmul.f32 %v10798_v58, %v11236_v61  ;;  %v7032_v52 = vmul.f32 %v10798_v58, %v11238_v16  ;;  %v10726_v58 = vld [vmem:[#allocation5 + $0x1e88] ss:$16 sps:$4 sm:$0xff]  }
 0x8a0   :  { %v10802_v8 = vpop.eup %10801  ;;  %v7060_v57 = vmul.f32 %v7039_v30, %v7030_v4  ;;  %v7031_v9 = vmul.f32 %v10800_v6, %v11242_v2  ;;  %v7027_v35 = vmul.f32 %v10800_v6, %v11240_v44  ;;  %v7056_v36 = vmul.f32 %v7039_v30, %v7026_v48  ;;  %v10717_v30 = vld [vmem:[#allocation5 + $0x1e60] ss:$16 sps:$4 sm:$0xff]   ;;  %v10731_v48 = vld [vmem:[#allocation5 + $0x1ea4] ss:$16 sps:$4 sm:$0xff]   ;;  %v10734_v4 = vld [vmem:[#allocation5 + $0x1eac] ss:$16 sps:$4 sm:$0xff]  }
 0x8a1   :  { %v7062_v10 = vmul.f32 %v7047_v13, %v7032_v52  ;;  %v7033_v11 = vmul.f32 %v10802_v8, %v11246_v47  ;;  %v7029_v59 = vmul.f32 %v10802_v8, %v11244_v21  ;;  %v7058_v12 = vmul.f32 %v7047_v13, %v7028_v51  ;;  %v10725_v13 = vld [vmem:[#allocation5 + $0x1e84] ss:$16 sps:$4 sm:$0xff]   ;;  %v10740_v51 = vld [vmem:[#allocation5 + $0x1ecc] ss:$16 sps:$4 sm:$0xff]   ;;  %v10735_v52 = vld [vmem:[#allocation5 + $0x1ec0] ss:$16 sps:$4 sm:$0xff]  }
 0x8a2   :  { %v7057_v61 = vmul.f32 %v7043_v56, %v7027_v35  ;;  %v7061_v42 = vmul.f32 %v7043_v56, %v7031_v9  ;;  %v7086_v16 = vadd.f32 %v7069_v50, %v7056_v36  ;;  %v7090_v20 = vadd.f32 %v7069_v50, %v7060_v57  ;;  %v10728_v56 = vld [vmem:[#allocation5 + $0x1e8c] ss:$16 sps:$4 sm:$0xff]   ;;  %v10732_v50 = vld [vmem:[#allocation5 + $0x1ea8] ss:$16 sps:$4 sm:$0xff]   ;;  %v10737_v6 = vld [vmem:[#allocation5 + $0x1ec4] ss:$16 sps:$4 sm:$0xff]  }
 0x8a3   :  { %v7059_v15 = vmul.f32 %v7051_v34, %v7029_v59  ;;  %v7063_v22 = vmul.f32 %v7051_v34, %v7033_v11  ;;  %v7088_v27 = vadd.f32 %v7077_v7, %v7058_v12  ;;  %v7092_v24 = vadd.f32 %v7077_v7, %v7062_v10  ;;  %v10723_v34 = vld [vmem:[#allocation5 + $0x1e80] ss:$16 sps:$4 sm:$0xff]   ;;  %v10743_v7 = vld [vmem:[#allocation5 + $0x1ee4] ss:$16 sps:$4 sm:$0xff]   ;;  %v10746_v8 = vld [vmem:[#allocation5 + $0x1eec] ss:$16 sps:$4 sm:$0xff]  }
 0x8a4   :  { %v7087_v25 = vadd.f32 %v7073_v39, %v7057_v61  ;;  %v7091_v3 = vadd.f32 %v7073_v39, %v7061_v42  ;;  %v7094_v2 = vmax.f32 %v7086_v16, 0.0  ;;  %v7098_v28 = vmax.f32 %v7090_v20, 0.0  ;;  %v10729_v39 = vld [vmem:[#allocation5 + $0x1ea0] ss:$16 sps:$4 sm:$0xff]   ;;  %v10744_v9 = vld [vmem:[#allocation5 + $0x1ee8] ss:$16 sps:$4 sm:$0xff]  }
 0x8a5   :  { %v7089_v44 = vadd.f32 %v7081_v26, %v7059_v15  ;;  %v7093_v62 = vadd.f32 %v7081_v26, %v7063_v22  ;;  %v7096_v32 = vmax.f32 %v7088_v27, 0.0  ;;  %v7100_v54 = vmax.f32 %v7092_v24, 0.0  ;;  %v10738_v26 = vld [vmem:[#allocation5 + $0x1ec8] ss:$16 sps:$4 sm:$0xff]   ;;  %v10741_v57 = vld [vmem:[#allocation5 + $0x1ee0] ss:$16 sps:$4 sm:$0xff]  }
 0x8a6   :  { %v7095_v47 = vmax.f32 %v7087_v25, 0.0  ;;  %v7099_v33 = vmax.f32 %v7091_v3, 0.0  ;;  %v7102_v21 = vpack.c.bf16 %v7098_v28, %v7094_v2  ;;  %v10749_v35 = vld [vmem:[#allocation5 + $0x1f04] ss:$16 sps:$4 sm:$0xff]   ;;  %v10752_v36 = vld [vmem:[#allocation5 + $0x1f0c] ss:$16 sps:$4 sm:$0xff]  }
 0x8a7   :  { %v7097_v63 = vmax.f32 %v7089_v44, 0.0  ;;  %v7101_v5 = vmax.f32 %v7093_v62, 0.0  ;;  %v11280_v14 = vpack.c.bf16 %v7100_v54, %v7096_v32  ;;  %v10747_v10 = vld [vmem:[#allocation5 + $0x1f00] ss:$16 sps:$4 sm:$0xff]   ;;  %v10750_v11 = vld [vmem:[#allocation5 + $0x1f08] ss:$16 sps:$4 sm:$0xff]  }
 0x8a8   :  { %v7103_v37 = vpack.c.bf16 %v7099_v33, %v7095_v47  ;;  %v10755_v59 = vld [vmem:[#allocation5 + $0x1f24] ss:$16 sps:$4 sm:$0xff]   ;;  %v10758_v12 = vld [vmem:[#allocation5 + $0x1f2c] ss:$16 sps:$4 sm:$0xff]   ;;  %v10753_v61 = vld [vmem:[#allocation5 + $0x1f20] ss:$16 sps:$4 sm:$0xff]  }
 0x8a9   :  { %v7105_v1 = vpack.c.bf16 %v7101_v5, %v7097_v63  ;;  %v10756_v42 = vld [vmem:[#allocation5 + $0x1f28] ss:$16 sps:$4 sm:$0xff]   ;;  %v10761_v16 = vld [vmem:[#allocation5 + $0x1f44] ss:$16 sps:$4 sm:$0xff]   ;;  %v10764_v20 = vld [vmem:[#allocation5 + $0x1f4c] ss:$16 sps:$4 sm:$0xff]  }
 0x8aa   :  { %7930 = vmatprep.mubr.bf16.mxu0 %v7103_v37  ;;  %8016 = vmatprep.mubr.bf16.mxu1 %v7103_v37  ;;  %v10759_v15 = vld [vmem:[#allocation5 + $0x1f40] ss:$16 sps:$4 sm:$0xff]   ;;  %v10762_v22 = vld [vmem:[#allocation5 + $0x1f48] ss:$16 sps:$4 sm:$0xff]   ;;  %v10767_v27 = vld [vmem:[#allocation5 + $0x1f64] ss:$16 sps:$4 sm:$0xff]  }
 0x8ab   :  { %7931 = vmatmul.mubr.bf16.vlgmr.msra.gmra.mrb[28].mxu0 %v7102_v21  ;;  %8017 = vmatmul.mubr.bf16.vlgmr.msra.gmra.mrb[28].mxu1 %v7102_v21  ;;  %v10770_v24 = vld [vmem:[#allocation5 + $0x1f6c] ss:$16 sps:$4 sm:$0xff]   ;;  %v10765_v25 = vld [vmem:[#allocation5 + $0x1f60] ss:$16 sps:$4 sm:$0xff]   ;;  %v10768_v3 = vld [vmem:[#allocation5 + $0x1f68] ss:$16 sps:$4 sm:$0xff]  }
 0x8ac   :  { %7942 = vmatpush1.bf16.msra.mxu0 %v10699_v60  ;;  %8028 = vmatpush1.bf16.msra.mxu1 %v10702_v38  ;;  %v10773_v2 = vld [vmem:[#allocation5 + $0x1f84] ss:$16 sps:$4 sm:$0xff]   ;;  %v10776_v28 = vld [vmem:[#allocation5 + $0x1f8c] ss:$16 sps:$4 sm:$0xff]   ;;  %v10771_v44 = vld [vmem:[#allocation5 + $0x1f80] ss:$16 sps:$4 sm:$0xff]  }
 0x8ad   :  { %7973 = vmatprep.mubr.bf16.mxu0 %v7105_v1  ;;  %8059 = vmatprep.mubr.bf16.mxu1 %v7105_v1  ;;  %v10774_v62 = vld [vmem:[#allocation5 + $0x1f88] ss:$16 sps:$4 sm:$0xff]   ;;  %v10779_v32 = vld [vmem:[#allocation5 + $0x1fa4] ss:$16 sps:$4 sm:$0xff]   ;;  %v10782_v54 = vld [vmem:[#allocation5 + $0x1fac] ss:$16 sps:$4 sm:$0xff]  }
 0x8ae   :  { %7943 = vmatprep.subr.bf16.mxu0 %v10707_v40  ;;  %8029 = vmatprep.subr.bf16.mxu1 %v10710_v29  ;;  %v10777_v47 = vld [vmem:[#allocation5 + $0x1fa0] ss:$16 sps:$4 sm:$0xff]   ;;  %v10780_v33 = vld [vmem:[#allocation5 + $0x1fa8] ss:$16 sps:$4 sm:$0xff]   ;;  %v10785_v21 = vld [vmem:[#allocation5 + $0x1fc4] ss:$16 sps:$4 sm:$0xff]  }
 0x8af   :  { %v10788_v63 = vld [vmem:[#allocation5 + $0x1fcc] ss:$16 sps:$4 sm:$0xff]   ;;  %v10783_v5 = vld [vmem:[#allocation5 + $0x1fc0] ss:$16 sps:$4 sm:$0xff]   ;;  %v10786_v37 = vld [vmem:[#allocation5 + $0x1fc8] ss:$16 sps:$4 sm:$0xff]  }
 0x8b0   :  { %7944 = vmatpush1.bf16.msra.mxu0 %v10705_v41  ;;  %8030 = vmatpush1.bf16.msra.mxu1 %v10708_v0  ;;  %v10791_v60 = vld [vmem:[#allocation5 + $0x1fe4] ss:$16 sps:$4 sm:$0xff]   ;;  %v10794_v38 = vld [vmem:[#allocation5 + $0x1fec] ss:$16 sps:$4 sm:$0xff]   ;;  %v10789_v1 = vld [vmem:[#allocation5 + $0x1fe0] ss:$16 sps:$4 sm:$0xff]  }
 0x8b1   :  { %7945 = vmatprep.subr.bf16.mxu0 %v10713_v23  ;;  %8031 = vmatprep.subr.bf16.mxu1 %v10716_v43  ;;  %v10792_v40 = vld [vmem:[#allocation5 + $0x1fe8] ss:$16 sps:$4 sm:$0xff]   ;;  %v7236_v29 = vld [vmem:[#allocation7 + $0x7] ss:$8 sm:$0xf] }
 0x8b2   :  { %v7241_v41 = vrot.slane %v7236_v29, %v11054_v18  ;;  %v7249_v0 = vrot.slane %v7236_v29, %v11088_v49  ;;  %v7245_v23 = vrot.slane %v7236_v29, %v11051_v17  ;;  %v7253_v43 = vrot.slane %v7236_v29, %v11057_v19 }
 0x8b4   :  { %7946 = vmatpush1.bf16.msra.mxu0 %v10711_v45  ;;  %8032 = vmatpush1.bf16.msra.mxu1 %v10714_v46 }
 0x8b5   :  { %7947 = vmatprep.subr.bf16.mxu0 %v10719_v53  ;;  %8033 = vmatprep.subr.bf16.mxu1 %v10722_v55 }
 0x8b8   :  { %7948 = vmatpush1.bf16.msra.mxu0 %v10717_v30  ;;  %8034 = vmatpush1.bf16.msra.mxu1 %v10720_v31 }
 0x8b9   :  { %7949 = vmatprep.subr.bf16.mxu0 %v10725_v13  ;;  %8035 = vmatprep.subr.bf16.mxu1 %v10728_v56 }
 0x8bc   :  { %7950 = vmatpush1.bf16.msra.mxu0 %v10723_v34  ;;  %8036 = vmatpush1.bf16.msra.mxu1 %v10726_v58 }
 0x8bd   :  { %7951 = vmatprep.subr.bf16.mxu0 %v10731_v48  ;;  %8037 = vmatprep.subr.bf16.mxu1 %v10734_v4 }
 0x8c0   :  { %7952 = vmatpush1.bf16.msra.mxu0 %v10729_v39  ;;  %8038 = vmatpush1.bf16.msra.mxu1 %v10732_v50 }
 0x8c1   :  { %7953 = vmatprep.subr.bf16.mxu0 %v10737_v6  ;;  %8039 = vmatprep.subr.bf16.mxu1 %v10740_v51 }
 0x8c4   :  { %7954 = vmatpush1.bf16.msra.mxu0 %v10735_v52  ;;  %8040 = vmatpush1.bf16.msra.mxu1 %v10738_v26 }
 0x8c5   :  { %7955 = vmatprep.subr.bf16.mxu0 %v10743_v7  ;;  %8041 = vmatprep.subr.bf16.mxu1 %v10746_v8 }
 0x8c8   :  { %7956 = vmatpush1.bf16.msra.mxu0 %v10741_v57  ;;  %8042 = vmatpush1.bf16.msra.mxu1 %v10744_v9 }
 0x8c9   :  { %7957 = vmatprep.subr.bf16.mxu0 %v10749_v35  ;;  %8043 = vmatprep.subr.bf16.mxu1 %v10752_v36 }
 0x8cc   :  { %7958 = vmatpush1.bf16.msra.mxu0 %v10747_v10  ;;  %8044 = vmatpush1.bf16.msra.mxu1 %v10750_v11 }
 0x8cd   :  { %7959 = vmatprep.subr.bf16.mxu0 %v10755_v59  ;;  %8045 = vmatprep.subr.bf16.mxu1 %v10758_v12 }
 0x8d0   :  { %7960 = vmatpush1.bf16.msra.mxu0 %v10753_v61  ;;  %8046 = vmatpush1.bf16.msra.mxu1 %v10756_v42 }
 0x8d1   :  { %7961 = vmatprep.subr.bf16.mxu0 %v10761_v16  ;;  %8047 = vmatprep.subr.bf16.mxu1 %v10764_v20 }
 0x8d4   :  { %7962 = vmatpush1.bf16.msra.mxu0 %v10759_v15  ;;  %8048 = vmatpush1.bf16.msra.mxu1 %v10762_v22 }
 0x8d5   :  { %7963 = vmatprep.subr.bf16.mxu0 %v10767_v27  ;;  %8049 = vmatprep.subr.bf16.mxu1 %v10770_v24 }
 0x8d8   :  { %7964 = vmatpush1.bf16.msra.mxu0 %v10765_v25  ;;  %8050 = vmatpush1.bf16.msra.mxu1 %v10768_v3 }
 0x8d9   :  { %7965 = vmatprep.subr.bf16.mxu0 %v10773_v2  ;;  %8051 = vmatprep.subr.bf16.mxu1 %v10776_v28 }
 0x8dc   :  { %7966 = vmatpush1.bf16.msra.mxu0 %v10771_v44  ;;  %8052 = vmatpush1.bf16.msra.mxu1 %v10774_v62 }
 0x8dd   :  { %7967 = vmatprep.subr.bf16.mxu0 %v10779_v32  ;;  %8053 = vmatprep.subr.bf16.mxu1 %v10782_v54 }
 0x8e0   :  { %7968 = vmatpush1.bf16.msra.mxu0 %v10777_v47  ;;  %8054 = vmatpush1.bf16.msra.mxu1 %v10780_v33 }
 0x8e1   :  { %7969 = vmatprep.subr.bf16.mxu0 %v10785_v21  ;;  %8055 = vmatprep.subr.bf16.mxu1 %v10788_v63 }
 0x8e4   :  { %7970 = vmatpush1.bf16.msra.mxu0 %v10783_v5  ;;  %8056 = vmatpush1.bf16.msra.mxu1 %v10786_v37 }
 0x8e5   :  { %7971 = vmatprep.subr.bf16.mxu0 %v10791_v60  ;;  %8057 = vmatprep.subr.bf16.mxu1 %v10794_v38 }
 0x8e8   :  { %7972 = vmatpush1.bf16.msra.mxu0 %v10789_v1  ;;  %8058 = vmatpush1.bf16.msra.mxu1 %v10792_v40 }
 0x8eb   :  { %7974 = vmatmul.mubr.bf16.vlgmr.msra.gmra.mrb[28].mxu0 %v11280_v14  ;;  %8060 = vmatmul.mubr.bf16.vlgmr.msra.gmra.mrb[28].mxu1 %v11280_v14 }
 0x9be   :  { %v7975_v45 = vpop.f32.mrb[28].mxu0  ;;  %v8061_v46 = vpop.f32.mrb[28].mxu1 }
 0x9bf   :  { %v9177_v53 = vadd.f32 %v7975_v45, %v7241_v41  ;;  %v9181_v55 = vadd.f32 %v8061_v46, %v7249_v0  ;;  %v7977_v30 = vpop.f32.mrb[29].mxu0  ;;  %v8063_v31 = vpop.f32.mrb[29].mxu1 }
 0x9c0   :  { %v9178_v13 = vadd.f32 %v7977_v30, %v7245_v23  ;;  %v9182_v56 = vadd.f32 %v8063_v31, %v7253_v43  ;;  %v7979_v14 = vpop.f32.mrb[30].mxu0  ;;  %v8065_v34 = vpop.f32.mrb[30].mxu1 }
 0x9c1   :  { %8070 = vst [vmem:[#allocation11] sm:$0xff] %v9177_v53  ;;  %8072 = vst [vmem:[#allocation11 + $0x10] sm:$0xff] %v9181_v55  ;;  %v9179_v18 = vadd.f32 %v7979_v14, %v7241_v41  ;;  %v9183_v49 = vadd.f32 %v8065_v34, %v7249_v0  ;;  %v7981_v58 = vpop.f32.mrb[31].mxu0  ;;  %v8067_v17 = vpop.f32.mrb[31].mxu1 }
 0x9c2   :  { %8071 = vst [vmem:[#allocation11 + $0x8] sm:$0xff] %v9178_v13  ;;  %8073 = vst [vmem:[#allocation11 + $0x18] sm:$0xff] %v9182_v56  ;;  %v9180_v19 = vadd.f32 %v7981_v58, %v7245_v23  ;;  %v9184_v48 = vadd.f32 %v8067_v17, %v7253_v43 }
 0x9c3   :  { %8074 = vst [vmem:[#allocation11 + $0x20] sm:$0xff] %v9179_v18  ;;  %8076 = vst [vmem:[#allocation11 + $0x30] sm:$0xff] %v9183_v49 }
 0x9c4   :  { %8075 = vst [vmem:[#allocation11 + $0x28] sm:$0xff] %v9180_v19  ;;  %8077 = vst [vmem:[#allocation11 + $0x38] sm:$0xff] %v9184_v48 }
 0x9c5   :  { %10924 = shalt.err (!%p10921_p2)
}
 0x9c6   :  { %s10925_s7 = scalar_lea.hbm %s11308_s5, 1024 }
 0x9c7   :  { %p10926_p3 = scmp.ne.s32.totalorder %s11308_s5, %s10925_s7  ;;  %p10929_p4 = scmp.lt.u32.totalorder %s10925_s7, %s11308_s5 }
 0x9c9   :  { %p10931_p5 = pnand %p10929_p4, %p10926_p3 }
 0x9cb   :  { %10934 = shalt.err (!%p10931_p5)
}
 0x9cc   :  { %8089 = dma.vmem_to_hbm [thread:$0]  %s8084_s27, 1024, %s11308_s5, [#allocation4], %s10948_s3, %s10948_s3, %s10949_s28  }
 0x9cd   :  { %10941 = dma.done.wait [#allocation4], 1024  }
 0x9ce   :  { %10942 = vsyncadd [#allocation4], 4294966272 }
 0x9cf   :  { %8093 = vsyncpa [#allocation3], 1 }
 0x9d0   :  { %8094 = vsyncpa [#allocation6], 1 }
 0x9d1   :  { %8095 = vsyncpa [#allocation9], 1 }
 0x9d2   :  { %8096 = vsyncpa [#allocation4], 1 }

</bundles_post_ra>
